<compile_context>
chip_gen: v7x
topology: tpu7x:2x2x1
jax: 0.10.0
libtpu: 0.0.40
codegen_flags: <defaults>
</compile_context>

<pallas_src>
import functools

import jax
import jax.numpy as jnp
from jax import lax
from jax.experimental import pallas as pl
from jax.experimental.pallas import tpu as pltpu

HIDDEN = 50        # forced by hardcoded h0/c0 = zeros(2, B, 50) in forward()
HID_PAD = 128      # one full lane tile per gate; 4*HID_PAD = 512
NUM_LAYERS = 2     # forced by hardcoded h0/c0
HEAD_PAD = 128     # MLP head widths padded to one lane tile
SUBLANE = 8


def _round_up(n, m):
    return (n + m - 1) // m * m


def _lstm_attn_kernel(x_ref,
                      wih0_ref, whh0_ref, b0_ref,
                      wih1_ref, whh1_ref, b1_ref,
                      wattn_ref, battn_ref,
                      wfc1_ref, bfc1_ref, wfc2_ref, bfc2_ref,
                      wfc3_ref, bfc3_ref, wfc4_ref, bfc4_ref,
                      out_ref,
                      gx_ref, h1_seq_ref, h2_seq_ref,
                      *, approx_recip):
    """Whole forward pass in VMEM. x_ref is time-major (T, Bp, I); weights are pre-transposed,
    padded to HID_PAD / HEAD_PAD and gate-reordered to [i, f, o, g] in the wrapper.
    Matmul operand dtype follows the weight dtype (f32 or bf16); accumulation is always f32."""
    T, Bp, I = x_ref.shape
    HP = HID_PAD
    G = 4 * HP
    S3 = 3 * HP                          # the three sigmoid gates (i, f, o) are contiguous

    def mm(a, w_ref):
        # MXU matmul; cast LHS to the (possibly bf16) weight dtype, accumulate in f32.
        return jnp.dot(a.astype(w_ref.dtype), w_ref[...],
                       preferred_element_type=jnp.float32)

    def run_layer(whh_ref, seq_out_ref):
        # gx_ref holds (T, Bp, 4*HP) precomputed input projection + bias (hoisted out of the
        # recurrence); only h @ W_hh remains on the serial critical path.
        def step(t, carry):
            h, c = carry
            gates = gx_ref[t] + mm(h, whh_ref)            # (Bp, 4*HP) f32, tile-aligned slices
            sig = jax.nn.sigmoid(gates[:, :S3])           # one wide EUP push for i, f, o
            g_g = jnp.tanh(gates[:, S3:])                 # tanh gate last
            i_g = sig[:, 0:HP]
            f_g = sig[:, HP:2 * HP]
            o_g = sig[:, 2 * HP:S3]
            c = f_g * c + i_g * g_g
            h = o_g * jnp.tanh(c)
            seq_out_ref[t] = h                            # full-vreg, unmasked store
            return h, c

        h0 = jnp.zeros((Bp, HP), jnp.float32)
        c0 = jnp.zeros((Bp, HP), jnp.float32)
        lax.fori_loop(0, T, step, (h0, c0), unroll=True)

    # ---- layer 0: all timestep input projections in a single matmul (bias folded in once) ----
    x = x_ref[...]                                        # (T, Bp, I)
    gx0 = mm(x.reshape(T * Bp, I), wih0_ref) + b0_ref[...]
    gx_ref[...] = gx0.reshape(T, Bp, G)                   # spill to VMEM scratch; re-read per step
    run_layer(whh0_ref, h1_seq_ref)

    # ---- layer 1: batched projection on the stacked layer-0 outputs (gx scratch reused) ----
    h1 = h1_seq_ref[...]                                  # (T, Bp, HP)
    gx1 = mm(h1.reshape(T * Bp, HP), wih1_ref) + b1_ref[...]
    gx_ref[...] = gx1.reshape(T, Bp, G)
    run_layer(whh1_ref, h2_seq_ref)
    h2 = h2_seq_ref[...]                                  # (T, Bp, HP) == LSTM output sequence

    # ---- attention over the time axis ----
    # scores[t, b] = <h2[t, b, :], w_attn> + b_attn
    scores = jnp.sum(h2 * wattn_ref[...], axis=-1, keepdims=True) + battn_ref[...]  # (T, Bp, 1)
    m = jnp.max(scores, axis=0, keepdims=True)
    e = jnp.exp(scores - m)
    denom = jnp.sum(e, axis=0, keepdims=True)             # (1, Bp, 1)
    if approx_recip:
        attn = e * pl.reciprocal(denom, approx=True)      # EUP-slot reciprocal (perf path)
    else:
        attn = e / denom                                  # exact divide (parity path)
    attn_b = jnp.broadcast_to(attn, h2.shape)             # single hoisted lane-broadcast
    context = jnp.sum(attn_b * h2, axis=0)                # (Bp, HP)

    # ---- MLP head: fc1 -> ReLU -> fc2 -> ReLU -> fc3 -> ReLU -> fc4 -> Sigmoid ----
    # All widths are padded to 128 lanes, so every activation is one unmasked vreg row-set.
    a = jnp.maximum(mm(context, wfc1_ref) + bfc1_ref[...], 0.0)
    a = jnp.maximum(mm(a, wfc2_ref) + bfc2_ref[...], 0.0)
    a = jnp.maximum(mm(a, wfc3_ref) + bfc3_ref[...], 0.0)
    logits = mm(a, wfc4_ref) + bfc4_ref[...]
    out_ref[...] = jax.nn.sigmoid(logits)                 # (Bp, HEAD_PAD), lane-dense store


def lstm_attention_forward(x, kparams, output_size, *, approx_recip=None):
    """Wrapper: pad batch to a sublane multiple, go time-major, run one gridless pallas_call."""
    B, T, I = x.shape
    Bp = max(_round_up(B, SUBLANE), SUBLANE)
    x_tm = jnp.transpose(x, (1, 0, 2)).astype(jnp.float32)           # (T, B, I)
    x_pad = jnp.zeros((T, Bp, I), jnp.float32).at[:, :B, :].set(x_tm)

    if approx_recip is None:
        # use the fast EUP reciprocal whenever we're already in the (non-bit-exact) bf16 path
        approx_recip = kparams["w_hh0"].dtype == jnp.bfloat16

    args = (x_pad,
            kparams["w_ih0"], kparams["w_hh0"], kparams["b0"],
            kparams["w_ih1"], kparams["w_hh1"], kparams["b1"],
            kparams["w_attn"], kparams["b_attn"],
            kparams["w_fc1"], kparams["b_fc1"],
            kparams["w_fc2"], kparams["b_fc2"],
            kparams["w_fc3"], kparams["b_fc3"],
            kparams["w_fc4"], kparams["b_fc4"])

    vmem = lambda: pl.BlockSpec(memory_space=pltpu.MemorySpace.VMEM)
    kernel = functools.partial(_lstm_attn_kernel, approx_recip=bool(approx_recip))
    out = pl.pallas_call(
        kernel,
        out_shape=jax.ShapeDtypeStruct((Bp, HEAD_PAD), jnp.float32),
        in_specs=[vmem() for _ in args],
        out_specs=vmem(),
        scratch_shapes=[pltpu.VMEM((T, Bp, 4 * HID_PAD), jnp.float32),  # gx (reused per layer)
                        pltpu.VMEM((T, Bp, HID_PAD), jnp.float32),      # layer-0 hidden sequence
                        pltpu.VMEM((T, Bp, HID_PAD), jnp.float32)],     # layer-1 hidden sequence
    )(*args)
    return out[:B, :output_size]


def init_params(key, input_size, hidden_size, output_size):
    """PyTorch-style init, natural (unpadded) shapes, LSTM gate order [i, f, g, o].
    Weights are stored pre-transposed as (in_features, out_features) for right-matmul."""
    assert hidden_size == HIDDEN
    H = hidden_size
    H4 = 4 * H
    ks = jax.random.split(key, 20)

    def u(k, shape, bound):
        return jax.random.uniform(k, shape, jnp.float32, -bound, bound)

    bh = 1.0 / float(H) ** 0.5
    return {
        # LSTM layer 0 / layer 1 (combined bias b_ih + b_hh)
        "w_ih0": u(ks[0], (input_size, H4), bh),
        "w_hh0": u(ks[1], (H, H4), bh),
        "b0":    u(ks[2], (1, H4), bh) + u(ks[3], (1, H4), bh),
        "w_ih1": u(ks[4], (H, H4), bh),
        "w_hh1": u(ks[5], (H, H4), bh),
        "b1":    u(ks[6], (1, H4), bh) + u(ks[7], (1, H4), bh),
        # attention: Linear(H, 1)
        "w_attn": u(ks[8], (H, 1), bh),
        "b_attn": u(ks[9], (1, 1), bh),
        # MLP head
        "w_fc1": u(ks[10], (H, 100), bh),
        "b_fc1": u(ks[11], (1, 100), bh),
        "w_fc2": u(ks[12], (100, 17), 1.0 / 100.0 ** 0.5),
        "b_fc2": u(ks[13], (1, 17), 1.0 / 100.0 ** 0.5),
        "w_fc3": u(ks[14], (17, 5), 1.0 / 17.0 ** 0.5),
        "b_fc3": u(ks[15], (1, 5), 1.0 / 17.0 ** 0.5),
        "w_fc4": u(ks[16], (5, output_size), 1.0 / 5.0 ** 0.5),
        "b_fc4": u(ks[17], (1, output_size), 1.0 / 5.0 ** 0.5),
    }


def prepare_kernel_params(params, compute_dtype=jnp.float32):
    """Pad hidden 50->128 and MLP widths ->128, reorder LSTM gate columns [i,f,g,o] -> [i,f,o,g]
    (sigmoid gates contiguous, tanh last; every gate = one 128-lane tile). Matmul weights are
    cast to `compute_dtype` (f32 or bf16); biases and the attention vector stay f32 because the
    elementwise path is f32 on all generations. All padding is exact zeros so padded lanes never
    affect real ones."""
    H, HP, P = HIDDEN, HID_PAD, HEAD_PAD

    def padmat(m, rows_to, cols_to):
        return jnp.pad(m, ((0, rows_to - m.shape[0]), (0, cols_to - m.shape[1])))

    def reorder_pad_gates(w):                       # w: (in, 4H), cols in order [i, f, g, o]
        i_, f_, g_, o_ = (w[:, 0:H], w[:, H:2 * H], w[:, 2 * H:3 * H], w[:, 3 * H:4 * H])
        padc = lambda m: jnp.pad(m, ((0, 0), (0, HP - H)))
        return jnp.concatenate([padc(i_), padc(f_), padc(o_), padc(g_)], axis=1)  # (in, 4*HP)

    def cast(m):
        return m.astype(compute_dtype)

    return {
        "w_ih0": cast(reorder_pad_gates(params["w_ih0"])),                         # (I, 4*HP)
        "w_hh0": cast(padmat(reorder_pad_gates(params["w_hh0"]), HP, 4 * HP)),     # (HP, 4*HP)
        "b0":    reorder_pad_gates(params["b0"]),                                  # (1, 4*HP) f32
        "w_ih1": cast(padmat(reorder_pad_gates(params["w_ih1"]), HP, 4 * HP)),
        "w_hh1": cast(padmat(reorder_pad_gates(params["w_hh1"]), HP, 4 * HP)),
        "b1":    reorder_pad_gates(params["b1"]),
        "w_attn": jnp.pad(params["w_attn"], ((0, HP - H), (0, 0))).T,              # (1, HP) f32
        "b_attn": params["b_attn"],                                                # (1, 1) f32
        "w_fc1": cast(padmat(params["w_fc1"], HP, P)),                             # (HP, 128)
        "b_fc1": padmat(params["b_fc1"], 1, P),
        "w_fc2": cast(padmat(params["w_fc2"], P, P)),
        "b_fc2": padmat(params["b_fc2"], 1, P),
        "w_fc3": cast(padmat(params["w_fc3"], P, P)),
        "b_fc3": padmat(params["b_fc3"], 1, P),
        "w_fc4": cast(padmat(params["w_fc4"], P, P)),
        "b_fc4": padmat(params["b_fc4"], 1, P),
    }


def reference_forward(x, params):
    """Pure-JAX reference matching the PyTorch module (eval mode), natural shapes."""
    B, T, _ = x.shape
    H = HIDDEN

    def lstm_layer(seq, wih, whh, b):               # seq: (B, T, in)
        h = jnp.zeros((B, H), jnp.float32)
        c = jnp.zeros((B, H), jnp.float32)
        outs = []
        for t in range(T):
            gates = seq[:, t, :] @ wih + h @ whh + b
            i_g = jax.nn.sigmoid(gates[:, 0:H])
            f_g = jax.nn.sigmoid(gates[:, H:2 * H])
            g_g = jnp.tanh(gates[:, 2 * H:3 * H])
            o_g = jax.nn.sigmoid(gates[:, 3 * H:4 * H])
            c = f_g * c + i_g * g_g
            h = o_g * jnp.tanh(c)
            outs.append(h)
        return jnp.stack(outs, axis=1)              # (B, T, H)

    out1 = lstm_layer(x, params["w_ih0"], params["w_hh0"], params["b0"])
    out2 = lstm_layer(out1, params["w_ih1"], params["w_hh1"], params["b1"])
    scores = out2 @ params["w_attn"] + params["b_attn"]       # (B, T, 1)
    attn = jax.nn.softmax(scores, axis=1)
    context = jnp.sum(attn * out2, axis=1)                    # (B, H)
    a = jax.nn.relu(context @ params["w_fc1"] + params["b_fc1"])
    a = jax.nn.relu(a @ params["w_fc2"] + params["b_fc2"])
    a = jax.nn.relu(a @ params["w_fc3"] + params["b_fc3"])
    return jax.nn.sigmoid(a @ params["w_fc4"] + params["b_fc4"])


if __name__ == "__main__":
    key = jax.random.PRNGKey(0)
    kx, kp = jax.random.split(key)

    # Small shapes consistent with the module: batch=2, seq=8, input_size=16, output_size=3.
    B, T, I, O = 2, 8, 16, 3
    x = jax.random.normal(kx, (B, T, I), jnp.float32)
    params = init_params(kp, I, HIDDEN, O)
    ref = reference_forward(x, params)

    # 1) f32 MXU operands + exact reciprocal: tight bit-level parity with the reference.
    kparams_f32 = prepare_kernel_params(params, compute_dtype=jnp.float32)
    out_f32 = jax.block_until_ready(lstm_attention_forward(x, kparams_f32, O))
    assert out_f32.shape == (B, O), out_f32.shape
    err32 = jnp.max(jnp.abs(out_f32 - ref))
    assert jnp.allclose(out_f32, ref, atol=1e-4, rtol=1e-4), f"f32 max abs err {err32}"

    # 2) bf16 MXU operands + approx reciprocal (perf path per review): looser sanity tolerance.
    kparams_bf16 = prepare_kernel_params(params, compute_dtype=jnp.bfloat16)
    out_bf16 = jax.block_until_ready(lstm_attention_forward(x, kparams_bf16, O))
    assert out_bf16.shape == (B, O), out_bf16.shape
    err16 = jnp.max(jnp.abs(out_bf16 - ref))
    assert jnp.allclose(out_bf16, ref, atol=5e-2, rtol=5e-2), f"bf16 max abs err {err16}"

    print("KERNEL_OK")
</pallas_src>

<mosaic_0001>
module attributes {stable_mosaic.version = 11 : i64} {
  func.func @_lstm_attn_kernel(%arg0: memref<8x8x16xf32, #tpu.memory_space<vmem>>, %arg1: memref<16x512xf32, #tpu.memory_space<vmem>>, %arg2: memref<128x512xf32, #tpu.memory_space<vmem>>, %arg3: memref<1x512xf32, #tpu.memory_space<vmem>>, %arg4: memref<128x512xf32, #tpu.memory_space<vmem>>, %arg5: memref<128x512xf32, #tpu.memory_space<vmem>>, %arg6: memref<1x512xf32, #tpu.memory_space<vmem>>, %arg7: memref<1x128xf32, #tpu.memory_space<vmem>>, %arg8: memref<1x1xf32, #tpu.memory_space<vmem>>, %arg9: memref<128x128xf32, #tpu.memory_space<vmem>>, %arg10: memref<1x128xf32, #tpu.memory_space<vmem>>, %arg11: memref<128x128xf32, #tpu.memory_space<vmem>>, %arg12: memref<1x128xf32, #tpu.memory_space<vmem>>, %arg13: memref<128x128xf32, #tpu.memory_space<vmem>>, %arg14: memref<1x128xf32, #tpu.memory_space<vmem>>, %arg15: memref<128x128xf32, #tpu.memory_space<vmem>>, %arg16: memref<1x128xf32, #tpu.memory_space<vmem>>, %arg17: memref<8x128xf32, #tpu.memory_space<vmem>>, %arg18: memref<8x8x512xf32, #tpu.memory_space<vmem>>, %arg19: memref<8x8x128xf32, #tpu.memory_space<vmem>>, %arg20: memref<8x8x128xf32, #tpu.memory_space<vmem>>) attributes {dimension_semantics = [], scalar_prefetch = 0 : i64, scratch_operands = 3 : i64, tpu.core_type = #tpu.core_type<tc>} {
    %c0 = arith.constant 0 : index
    %c0_0 = arith.constant 0 : index
    %c0_1 = arith.constant 0 : index
    %0 = vector.load %arg0[%c0, %c0_0, %c0_1] : memref<8x8x16xf32, #tpu.memory_space<vmem>>, vector<8x8x16xf32>
    %1 = vector.shape_cast %0 : vector<8x8x16xf32> to vector<64x16xf32>
    %c0_2 = arith.constant 0 : index
    %c0_3 = arith.constant 0 : index
    %2 = vector.load %arg1[%c0_2, %c0_3] : memref<16x512xf32, #tpu.memory_space<vmem>>, vector<16x512xf32>
    %cst = arith.constant dense<0.000000e+00> : vector<64x512xf32>
    %3 = tpu.matmul %1, %2, %cst {dimension_numbers = #tpu.dot_dimension_numbers<[1], [0], [0], [1], [0, 0, 1, 1], [], []>} : vector<64x16xf32>, vector<16x512xf32>, vector<64x512xf32> -> vector<64x512xf32>
    %c0_4 = arith.constant 0 : index
    %c0_5 = arith.constant 0 : index
    %4 = vector.load %arg3[%c0_4, %c0_5] : memref<1x512xf32, #tpu.memory_space<vmem>>, vector<1x512xf32>
    %5 = vector.broadcast %4 : vector<1x512xf32> to vector<64x512xf32>
    %6 = arith.addf %3, %5 : vector<64x512xf32>
    %7 = vector.shape_cast %6 : vector<64x512xf32> to vector<8x8x512xf32>
    %c0_6 = arith.constant 0 : index
    %c0_7 = arith.constant 0 : index
    %c0_8 = arith.constant 0 : index
    %8 = vector.load %arg18[%c0_6, %c0_7, %c0_8] : memref<8x8x512xf32, #tpu.memory_space<vmem>>, vector<8x8x512xf32>
    tpu.vector_store %arg18[%c0_6, %c0_7, %c0_8], %7 {strides = array<i32>} : memref<8x8x512xf32, #tpu.memory_space<vmem>>, vector<8x8x512xf32>,
    %cst_9 = arith.constant 0.000000e+00 : f32
    %9 = vector.broadcast %cst_9 : f32 to vector<8x128xf32>
    %cst_10 = arith.constant 0.000000e+00 : f32
    %10 = vector.broadcast %cst_10 : f32 to vector<8x128xf32>
    %c0_i32 = arith.constant 0 : i32
    %11 = arith.index_cast %c0_i32 : i32 to index
    %c0_11 = arith.constant 0 : index
    %c0_12 = arith.constant 0 : index
    %12 = vector.load %arg18[%11, %c0_11, %c0_12] : memref<8x8x512xf32, #tpu.memory_space<vmem>>, vector<1x8x512xf32>
    %13 = vector.shape_cast %12 : vector<1x8x512xf32> to vector<8x512xf32>
    %c0_13 = arith.constant 0 : index
    %c0_14 = arith.constant 0 : index
    %14 = vector.load %arg2[%c0_13, %c0_14] : memref<128x512xf32, #tpu.memory_space<vmem>>, vector<128x512xf32>
    %cst_15 = arith.constant dense<0.000000e+00> : vector<8x512xf32>
    %15 = tpu.matmul %9, %14, %cst_15 {dimension_numbers = #tpu.dot_dimension_numbers<[1], [0], [0], [1], [0, 0, 1, 1], [], []>} : vector<8x128xf32>, vector<128x512xf32>, vector<8x512xf32> -> vector<8x512xf32>
    %16 = arith.addf %13, %15 : vector<8x512xf32>
    %17 = vector.extract_strided_slice %16 {offsets = [0, 0], sizes = [8, 384], strides = [1, 1]} : vector<8x512xf32> to vector<8x384xf32>
    %18 = arith.negf %17 : vector<8x384xf32>
    %19 = math.exp %18 : vector<8x384xf32>
    %cst_16 = arith.constant 1.000000e+00 : f32
    %20 = vector.broadcast %cst_16 : f32 to vector<8x384xf32>
    %21 = arith.addf %20, %19 : vector<8x384xf32>
    %22 = arith.divf %20, %21 : vector<8x384xf32>
    %23 = vector.extract_strided_slice %16 {offsets = [0, 384], sizes = [8, 128], strides = [1, 1]} : vector<8x512xf32> to vector<8x128xf32>
    %24 = math.tanh %23 : vector<8x128xf32>
    %25 = vector.extract_strided_slice %22 {offsets = [0, 0], sizes = [8, 128], strides = [1, 1]} : vector<8x384xf32> to vector<8x128xf32>
    %26 = vector.extract_strided_slice %22 {offsets = [0, 128], sizes = [8, 128], strides = [1, 1]} : vector<8x384xf32> to vector<8x128xf32>
    %27 = vector.extract_strided_slice %22 {offsets = [0, 256], sizes = [8, 128], strides = [1, 1]} : vector<8x384xf32> to vector<8x128xf32>
    %28 = arith.mulf %26, %10 : vector<8x128xf32>
    %29 = arith.mulf %25, %24 : vector<8x128xf32>
    %30 = arith.addf %28, %29 : vector<8x128xf32>
    %31 = math.tanh %30 : vector<8x128xf32>
    %32 = arith.mulf %27, %31 : vector<8x128xf32>
    %33 = arith.index_cast %c0_i32 : i32 to index
    %c0_17 = arith.constant 0 : index
    %c0_18 = arith.constant 0 : index
    %34 = vector.load %arg19[%33, %c0_17, %c0_18] : memref<8x8x128xf32, #tpu.memory_space<vmem>>, vector<1x8x128xf32>
    %35 = vector.shape_cast %34 : vector<1x8x128xf32> to vector<8x128xf32>
    %36 = vector.shape_cast %32 : vector<8x128xf32> to vector<1x8x128xf32>
    tpu.vector_store %arg19[%33, %c0_17, %c0_18], %36 {strides = array<i32>} : memref<8x8x128xf32, #tpu.memory_space<vmem>>, vector<1x8x128xf32>,
    %c1_i32 = arith.constant 1 : i32
    %37 = arith.index_cast %c1_i32 : i32 to index
    %c0_19 = arith.constant 0 : index
    %c0_20 = arith.constant 0 : index
    %38 = vector.load %arg18[%37, %c0_19, %c0_20] : memref<8x8x512xf32, #tpu.memory_space<vmem>>, vector<1x8x512xf32>
    %39 = vector.shape_cast %38 : vector<1x8x512xf32> to vector<8x512xf32>
    %c0_21 = arith.constant 0 : index
    %c0_22 = arith.constant 0 : index
    %40 = vector.load %arg2[%c0_21, %c0_22] : memref<128x512xf32, #tpu.memory_space<vmem>>, vector<128x512xf32>
    %cst_23 = arith.constant dense<0.000000e+00> : vector<8x512xf32>
    %41 = tpu.matmul %32, %40, %cst_23 {dimension_numbers = #tpu.dot_dimension_numbers<[1], [0], [0], [1], [0, 0, 1, 1], [], []>} : vector<8x128xf32>, vector<128x512xf32>, vector<8x512xf32> -> vector<8x512xf32>
    %42 = arith.addf %39, %41 : vector<8x512xf32>
    %43 = vector.extract_strided_slice %42 {offsets = [0, 0], sizes = [8, 384], strides = [1, 1]} : vector<8x512xf32> to vector<8x384xf32>
    %44 = arith.negf %43 : vector<8x384xf32>
    %45 = math.exp %44 : vector<8x384xf32>
    %cst_24 = arith.constant 1.000000e+00 : f32
    %46 = vector.broadcast %cst_24 : f32 to vector<8x384xf32>
    %47 = arith.addf %46, %45 : vector<8x384xf32>
    %48 = arith.divf %46, %47 : vector<8x384xf32>
    %49 = vector.extract_strided_slice %42 {offsets = [0, 384], sizes = [8, 128], strides = [1, 1]} : vector<8x512xf32> to vector<8x128xf32>
    %50 = math.tanh %49 : vector<8x128xf32>
    %51 = vector.extract_strided_slice %48 {offsets = [0, 0], sizes = [8, 128], strides = [1, 1]} : vector<8x384xf32> to vector<8x128xf32>
    %52 = vector.extract_strided_slice %48 {offsets = [0, 128], sizes = [8, 128], strides = [1, 1]} : vector<8x384xf32> to vector<8x128xf32>
    %53 = vector.extract_strided_slice %48 {offsets = [0, 256], sizes = [8, 128], strides = [1, 1]} : vector<8x384xf32> to vector<8x128xf32>
    %54 = arith.mulf %52, %30 : vector<8x128xf32>
    %55 = arith.mulf %51, %50 : vector<8x128xf32>
    %56 = arith.addf %54, %55 : vector<8x128xf32>
    %57 = math.tanh %56 : vector<8x128xf32>
    %58 = arith.mulf %53, %57 : vector<8x128xf32>
    %59 = arith.index_cast %c1_i32 : i32 to index
    %c0_25 = arith.constant 0 : index
    %c0_26 = arith.constant 0 : index
    %60 = vector.load %arg19[%59, %c0_25, %c0_26] : memref<8x8x128xf32, #tpu.memory_space<vmem>>, vector<1x8x128xf32>
    %61 = vector.shape_cast %60 : vector<1x8x128xf32> to vector<8x128xf32>
    %62 = vector.shape_cast %58 : vector<8x128xf32> to vector<1x8x128xf32>
    tpu.vector_store %arg19[%59, %c0_25, %c0_26], %62 {strides = array<i32>} : memref<8x8x128xf32, #tpu.memory_space<vmem>>, vector<1x8x128xf32>,
    %c2_i32 = arith.constant 2 : i32
    %63 = arith.index_cast %c2_i32 : i32 to index
    %c0_27 = arith.constant 0 : index
    %c0_28 = arith.constant 0 : index
    %64 = vector.load %arg18[%63, %c0_27, %c0_28] : memref<8x8x512xf32, #tpu.memory_space<vmem>>, vector<1x8x512xf32>
    %65 = vector.shape_cast %64 : vector<1x8x512xf32> to vector<8x512xf32>
    %c0_29 = arith.constant 0 : index
    %c0_30 = arith.constant 0 : index
    %66 = vector.load %arg2[%c0_29, %c0_30] : memref<128x512xf32, #tpu.memory_space<vmem>>, vector<128x512xf32>
    %cst_31 = arith.constant dense<0.000000e+00> : vector<8x512xf32>
    %67 = tpu.matmul %58, %66, %cst_31 {dimension_numbers = #tpu.dot_dimension_numbers<[1], [0], [0], [1], [0, 0, 1, 1], [], []>} : vector<8x128xf32>, vector<128x512xf32>, vector<8x512xf32> -> vector<8x512xf32>
    %68 = arith.addf %65, %67 : vector<8x512xf32>
    %69 = vector.extract_strided_slice %68 {offsets = [0, 0], sizes = [8, 384], strides = [1, 1]} : vector<8x512xf32> to vector<8x384xf32>
    %70 = arith.negf %69 : vector<8x384xf32>
    %71 = math.exp %70 : vector<8x384xf32>
    %cst_32 = arith.constant 1.000000e+00 : f32
    %72 = vector.broadcast %cst_32 : f32 to vector<8x384xf32>
    %73 = arith.addf %72, %71 : vector<8x384xf32>
    %74 = arith.divf %72, %73 : vector<8x384xf32>
    %75 = vector.extract_strided_slice %68 {offsets = [0, 384], sizes = [8, 128], strides = [1, 1]} : vector<8x512xf32> to vector<8x128xf32>
    %76 = math.tanh %75 : vector<8x128xf32>
    %77 = vector.extract_strided_slice %74 {offsets = [0, 0], sizes = [8, 128], strides = [1, 1]} : vector<8x384xf32> to vector<8x128xf32>
    %78 = vector.extract_strided_slice %74 {offsets = [0, 128], sizes = [8, 128], strides = [1, 1]} : vector<8x384xf32> to vector<8x128xf32>
    %79 = vector.extract_strided_slice %74 {offsets = [0, 256], sizes = [8, 128], strides = [1, 1]} : vector<8x384xf32> to vector<8x128xf32>
    %80 = arith.mulf %78, %56 : vector<8x128xf32>
    %81 = arith.mulf %77, %76 : vector<8x128xf32>
    %82 = arith.addf %80, %81 : vector<8x128xf32>
    %83 = math.tanh %82 : vector<8x128xf32>
    %84 = arith.mulf %79, %83 : vector<8x128xf32>
    %85 = arith.index_cast %c2_i32 : i32 to index
    %c0_33 = arith.constant 0 : index
    %c0_34 = arith.constant 0 : index
    %86 = vector.load %arg19[%85, %c0_33, %c0_34] : memref<8x8x128xf32, #tpu.memory_space<vmem>>, vector<1x8x128xf32>
    %87 = vector.shape_cast %86 : vector<1x8x128xf32> to vector<8x128xf32>
    %88 = vector.shape_cast %84 : vector<8x128xf32> to vector<1x8x128xf32>
    tpu.vector_store %arg19[%85, %c0_33, %c0_34], %88 {strides = array<i32>} : memref<8x8x128xf32, #tpu.memory_space<vmem>>, vector<1x8x128xf32>,
    %c3_i32 = arith.constant 3 : i32
    %89 = arith.index_cast %c3_i32 : i32 to index
    %c0_35 = arith.constant 0 : index
    %c0_36 = arith.constant 0 : index
    %90 = vector.load %arg18[%89, %c0_35, %c0_36] : memref<8x8x512xf32, #tpu.memory_space<vmem>>, vector<1x8x512xf32>
    %91 = vector.shape_cast %90 : vector<1x8x512xf32> to vector<8x512xf32>
    %c0_37 = arith.constant 0 : index
    %c0_38 = arith.constant 0 : index
    %92 = vector.load %arg2[%c0_37, %c0_38] : memref<128x512xf32, #tpu.memory_space<vmem>>, vector<128x512xf32>
    %cst_39 = arith.constant dense<0.000000e+00> : vector<8x512xf32>
    %93 = tpu.matmul %84, %92, %cst_39 {dimension_numbers = #tpu.dot_dimension_numbers<[1], [0], [0], [1], [0, 0, 1, 1], [], []>} : vector<8x128xf32>, vector<128x512xf32>, vector<8x512xf32> -> vector<8x512xf32>
    %94 = arith.addf %91, %93 : vector<8x512xf32>
    %95 = vector.extract_strided_slice %94 {offsets = [0, 0], sizes = [8, 384], strides = [1, 1]} : vector<8x512xf32> to vector<8x384xf32>
    %96 = arith.negf %95 : vector<8x384xf32>
    %97 = math.exp %96 : vector<8x384xf32>
    %cst_40 = arith.constant 1.000000e+00 : f32
    %98 = vector.broadcast %cst_40 : f32 to vector<8x384xf32>
    %99 = arith.addf %98, %97 : vector<8x384xf32>
    %100 = arith.divf %98, %99 : vector<8x384xf32>
    %101 = vector.extract_strided_slice %94 {offsets = [0, 384], sizes = [8, 128], strides = [1, 1]} : vector<8x512xf32> to vector<8x128xf32>
    %102 = math.tanh %101 : vector<8x128xf32>
    %103 = vector.extract_strided_slice %100 {offsets = [0, 0], sizes = [8, 128], strides = [1, 1]} : vector<8x384xf32> to vector<8x128xf32>
    %104 = vector.extract_strided_slice %100 {offsets = [0, 128], sizes = [8, 128], strides = [1, 1]} : vector<8x384xf32> to vector<8x128xf32>
    %105 = vector.extract_strided_slice %100 {offsets = [0, 256], sizes = [8, 128], strides = [1, 1]} : vector<8x384xf32> to vector<8x128xf32>
    %106 = arith.mulf %104, %82 : vector<8x128xf32>
    %107 = arith.mulf %103, %102 : vector<8x128xf32>
    %108 = arith.addf %106, %107 : vector<8x128xf32>
    %109 = math.tanh %108 : vector<8x128xf32>
    %110 = arith.mulf %105, %109 : vector<8x128xf32>
    %111 = arith.index_cast %c3_i32 : i32 to index
    %c0_41 = arith.constant 0 : index
    %c0_42 = arith.constant 0 : index
    %112 = vector.load %arg19[%111, %c0_41, %c0_42] : memref<8x8x128xf32, #tpu.memory_space<vmem>>, vector<1x8x128xf32>
    %113 = vector.shape_cast %112 : vector<1x8x128xf32> to vector<8x128xf32>
    %114 = vector.shape_cast %110 : vector<8x128xf32> to vector<1x8x128xf32>
    tpu.vector_store %arg19[%111, %c0_41, %c0_42], %114 {strides = array<i32>} : memref<8x8x128xf32, #tpu.memory_space<vmem>>, vector<1x8x128xf32>,
    %c4_i32 = arith.constant 4 : i32
    %115 = arith.index_cast %c4_i32 : i32 to index
    %c0_43 = arith.constant 0 : index
    %c0_44 = arith.constant 0 : index
    %116 = vector.load %arg18[%115, %c0_43, %c0_44] : memref<8x8x512xf32, #tpu.memory_space<vmem>>, vector<1x8x512xf32>
    %117 = vector.shape_cast %116 : vector<1x8x512xf32> to vector<8x512xf32>
    %c0_45 = arith.constant 0 : index
    %c0_46 = arith.constant 0 : index
    %118 = vector.load %arg2[%c0_45, %c0_46] : memref<128x512xf32, #tpu.memory_space<vmem>>, vector<128x512xf32>
    %cst_47 = arith.constant dense<0.000000e+00> : vector<8x512xf32>
    %119 = tpu.matmul %110, %118, %cst_47 {dimension_numbers = #tpu.dot_dimension_numbers<[1], [0], [0], [1], [0, 0, 1, 1], [], []>} : vector<8x128xf32>, vector<128x512xf32>, vector<8x512xf32> -> vector<8x512xf32>
    %120 = arith.addf %117, %119 : vector<8x512xf32>
    %121 = vector.extract_strided_slice %120 {offsets = [0, 0], sizes = [8, 384], strides = [1, 1]} : vector<8x512xf32> to vector<8x384xf32>
    %122 = arith.negf %121 : vector<8x384xf32>
    %123 = math.exp %122 : vector<8x384xf32>
    %cst_48 = arith.constant 1.000000e+00 : f32
    %124 = vector.broadcast %cst_48 : f32 to vector<8x384xf32>
    %125 = arith.addf %124, %123 : vector<8x384xf32>
    %126 = arith.divf %124, %125 : vector<8x384xf32>
    %127 = vector.extract_strided_slice %120 {offsets = [0, 384], sizes = [8, 128], strides = [1, 1]} : vector<8x512xf32> to vector<8x128xf32>
    %128 = math.tanh %127 : vector<8x128xf32>
    %129 = vector.extract_strided_slice %126 {offsets = [0, 0], sizes = [8, 128], strides = [1, 1]} : vector<8x384xf32> to vector<8x128xf32>
    %130 = vector.extract_strided_slice %126 {offsets = [0, 128], sizes = [8, 128], strides = [1, 1]} : vector<8x384xf32> to vector<8x128xf32>
    %131 = vector.extract_strided_slice %126 {offsets = [0, 256], sizes = [8, 128], strides = [1, 1]} : vector<8x384xf32> to vector<8x128xf32>
    %132 = arith.mulf %130, %108 : vector<8x128xf32>
    %133 = arith.mulf %129, %128 : vector<8x128xf32>
    %134 = arith.addf %132, %133 : vector<8x128xf32>
    %135 = math.tanh %134 : vector<8x128xf32>
    %136 = arith.mulf %131, %135 : vector<8x128xf32>
    %137 = arith.index_cast %c4_i32 : i32 to index
    %c0_49 = arith.constant 0 : index
    %c0_50 = arith.constant 0 : index
    %138 = vector.load %arg19[%137, %c0_49, %c0_50] : memref<8x8x128xf32, #tpu.memory_space<vmem>>, vector<1x8x128xf32>
    %139 = vector.shape_cast %138 : vector<1x8x128xf32> to vector<8x128xf32>
    %140 = vector.shape_cast %136 : vector<8x128xf32> to vector<1x8x128xf32>
    tpu.vector_store %arg19[%137, %c0_49, %c0_50], %140 {strides = array<i32>} : memref<8x8x128xf32, #tpu.memory_space<vmem>>, vector<1x8x128xf32>,
    %c5_i32 = arith.constant 5 : i32
    %141 = arith.index_cast %c5_i32 : i32 to index
    %c0_51 = arith.constant 0 : index
    %c0_52 = arith.constant 0 : index
    %142 = vector.load %arg18[%141, %c0_51, %c0_52] : memref<8x8x512xf32, #tpu.memory_space<vmem>>, vector<1x8x512xf32>
    %143 = vector.shape_cast %142 : vector<1x8x512xf32> to vector<8x512xf32>
    %c0_53 = arith.constant 0 : index
    %c0_54 = arith.constant 0 : index
    %144 = vector.load %arg2[%c0_53, %c0_54] : memref<128x512xf32, #tpu.memory_space<vmem>>, vector<128x512xf32>
    %cst_55 = arith.constant dense<0.000000e+00> : vector<8x512xf32>
    %145 = tpu.matmul %136, %144, %cst_55 {dimension_numbers = #tpu.dot_dimension_numbers<[1], [0], [0], [1], [0, 0, 1, 1], [], []>} : vector<8x128xf32>, vector<128x512xf32>, vector<8x512xf32> -> vector<8x512xf32>
    %146 = arith.addf %143, %145 : vector<8x512xf32>
    %147 = vector.extract_strided_slice %146 {offsets = [0, 0], sizes = [8, 384], strides = [1, 1]} : vector<8x512xf32> to vector<8x384xf32>
    %148 = arith.negf %147 : vector<8x384xf32>
    %149 = math.exp %148 : vector<8x384xf32>
    %cst_56 = arith.constant 1.000000e+00 : f32
    %150 = vector.broadcast %cst_56 : f32 to vector<8x384xf32>
    %151 = arith.addf %150, %149 : vector<8x384xf32>
    %152 = arith.divf %150, %151 : vector<8x384xf32>
    %153 = vector.extract_strided_slice %146 {offsets = [0, 384], sizes = [8, 128], strides = [1, 1]} : vector<8x512xf32> to vector<8x128xf32>
    %154 = math.tanh %153 : vector<8x128xf32>
    %155 = vector.extract_strided_slice %152 {offsets = [0, 0], sizes = [8, 128], strides = [1, 1]} : vector<8x384xf32> to vector<8x128xf32>
    %156 = vector.extract_strided_slice %152 {offsets = [0, 128], sizes = [8, 128], strides = [1, 1]} : vector<8x384xf32> to vector<8x128xf32>
    %157 = vector.extract_strided_slice %152 {offsets = [0, 256], sizes = [8, 128], strides = [1, 1]} : vector<8x384xf32> to vector<8x128xf32>
    %158 = arith.mulf %156, %134 : vector<8x128xf32>
    %159 = arith.mulf %155, %154 : vector<8x128xf32>
    %160 = arith.addf %158, %159 : vector<8x128xf32>
    %161 = math.tanh %160 : vector<8x128xf32>
    %162 = arith.mulf %157, %161 : vector<8x128xf32>
    %163 = arith.index_cast %c5_i32 : i32 to index
    %c0_57 = arith.constant 0 : index
    %c0_58 = arith.constant 0 : index
    %164 = vector.load %arg19[%163, %c0_57, %c0_58] : memref<8x8x128xf32, #tpu.memory_space<vmem>>, vector<1x8x128xf32>
    %165 = vector.shape_cast %164 : vector<1x8x128xf32> to vector<8x128xf32>
    %166 = vector.shape_cast %162 : vector<8x128xf32> to vector<1x8x128xf32>
    tpu.vector_store %arg19[%163, %c0_57, %c0_58], %166 {strides = array<i32>} : memref<8x8x128xf32, #tpu.memory_space<vmem>>, vector<1x8x128xf32>,
    %c6_i32 = arith.constant 6 : i32
    %167 = arith.index_cast %c6_i32 : i32 to index
    %c0_59 = arith.constant 0 : index
    %c0_60 = arith.constant 0 : index
    %168 = vector.load %arg18[%167, %c0_59, %c0_60] : memref<8x8x512xf32, #tpu.memory_space<vmem>>, vector<1x8x512xf32>
    %169 = vector.shape_cast %168 : vector<1x8x512xf32> to vector<8x512xf32>
    %c0_61 = arith.constant 0 : index
    %c0_62 = arith.constant 0 : index
    %170 = vector.load %arg2[%c0_61, %c0_62] : memref<128x512xf32, #tpu.memory_space<vmem>>, vector<128x512xf32>
    %cst_63 = arith.constant dense<0.000000e+00> : vector<8x512xf32>
    %171 = tpu.matmul %162, %170, %cst_63 {dimension_numbers = #tpu.dot_dimension_numbers<[1], [0], [0], [1], [0, 0, 1, 1], [], []>} : vector<8x128xf32>, vector<128x512xf32>, vector<8x512xf32> -> vector<8x512xf32>
    %172 = arith.addf %169, %171 : vector<8x512xf32>
    %173 = vector.extract_strided_slice %172 {offsets = [0, 0], sizes = [8, 384], strides = [1, 1]} : vector<8x512xf32> to vector<8x384xf32>
    %174 = arith.negf %173 : vector<8x384xf32>
    %175 = math.exp %174 : vector<8x384xf32>
    %cst_64 = arith.constant 1.000000e+00 : f32
    %176 = vector.broadcast %cst_64 : f32 to vector<8x384xf32>
    %177 = arith.addf %176, %175 : vector<8x384xf32>
    %178 = arith.divf %176, %177 : vector<8x384xf32>
    %179 = vector.extract_strided_slice %172 {offsets = [0, 384], sizes = [8, 128], strides = [1, 1]} : vector<8x512xf32> to vector<8x128xf32>
    %180 = math.tanh %179 : vector<8x128xf32>
    %181 = vector.extract_strided_slice %178 {offsets = [0, 0], sizes = [8, 128], strides = [1, 1]} : vector<8x384xf32> to vector<8x128xf32>
    %182 = vector.extract_strided_slice %178 {offsets = [0, 128], sizes = [8, 128], strides = [1, 1]} : vector<8x384xf32> to vector<8x128xf32>
    %183 = vector.extract_strided_slice %178 {offsets = [0, 256], sizes = [8, 128], strides = [1, 1]} : vector<8x384xf32> to vector<8x128xf32>
    %184 = arith.mulf %182, %160 : vector<8x128xf32>
    %185 = arith.mulf %181, %180 : vector<8x128xf32>
    %186 = arith.addf %184, %185 : vector<8x128xf32>
    %187 = math.tanh %186 : vector<8x128xf32>
    %188 = arith.mulf %183, %187 : vector<8x128xf32>
    %189 = arith.index_cast %c6_i32 : i32 to index
    %c0_65 = arith.constant 0 : index
    %c0_66 = arith.constant 0 : index
    %190 = vector.load %arg19[%189, %c0_65, %c0_66] : memref<8x8x128xf32, #tpu.memory_space<vmem>>, vector<1x8x128xf32>
    %191 = vector.shape_cast %190 : vector<1x8x128xf32> to vector<8x128xf32>
    %192 = vector.shape_cast %188 : vector<8x128xf32> to vector<1x8x128xf32>
    tpu.vector_store %arg19[%189, %c0_65, %c0_66], %192 {strides = array<i32>} : memref<8x8x128xf32, #tpu.memory_space<vmem>>, vector<1x8x128xf32>,
    %c7_i32 = arith.constant 7 : i32
    %193 = arith.index_cast %c7_i32 : i32 to index
    %c0_67 = arith.constant 0 : index
    %c0_68 = arith.constant 0 : index
    %194 = vector.load %arg18[%193, %c0_67, %c0_68] : memref<8x8x512xf32, #tpu.memory_space<vmem>>, vector<1x8x512xf32>
    %195 = vector.shape_cast %194 : vector<1x8x512xf32> to vector<8x512xf32>
    %c0_69 = arith.constant 0 : index
    %c0_70 = arith.constant 0 : index
    %196 = vector.load %arg2[%c0_69, %c0_70] : memref<128x512xf32, #tpu.memory_space<vmem>>, vector<128x512xf32>
    %cst_71 = arith.constant dense<0.000000e+00> : vector<8x512xf32>
    %197 = tpu.matmul %188, %196, %cst_71 {dimension_numbers = #tpu.dot_dimension_numbers<[1], [0], [0], [1], [0, 0, 1, 1], [], []>} : vector<8x128xf32>, vector<128x512xf32>, vector<8x512xf32> -> vector<8x512xf32>
    %198 = arith.addf %195, %197 : vector<8x512xf32>
    %199 = vector.extract_strided_slice %198 {offsets = [0, 0], sizes = [8, 384], strides = [1, 1]} : vector<8x512xf32> to vector<8x384xf32>
    %200 = arith.negf %199 : vector<8x384xf32>
    %201 = math.exp %200 : vector<8x384xf32>
    %cst_72 = arith.constant 1.000000e+00 : f32
    %202 = vector.broadcast %cst_72 : f32 to vector<8x384xf32>
    %203 = arith.addf %202, %201 : vector<8x384xf32>
    %204 = arith.divf %202, %203 : vector<8x384xf32>
    %205 = vector.extract_strided_slice %198 {offsets = [0, 384], sizes = [8, 128], strides = [1, 1]} : vector<8x512xf32> to vector<8x128xf32>
    %206 = math.tanh %205 : vector<8x128xf32>
    %207 = vector.extract_strided_slice %204 {offsets = [0, 0], sizes = [8, 128], strides = [1, 1]} : vector<8x384xf32> to vector<8x128xf32>
    %208 = vector.extract_strided_slice %204 {offsets = [0, 128], sizes = [8, 128], strides = [1, 1]} : vector<8x384xf32> to vector<8x128xf32>
    %209 = vector.extract_strided_slice %204 {offsets = [0, 256], sizes = [8, 128], strides = [1, 1]} : vector<8x384xf32> to vector<8x128xf32>
    %210 = arith.mulf %208, %186 : vector<8x128xf32>
    %211 = arith.mulf %207, %206 : vector<8x128xf32>
    %212 = arith.addf %210, %211 : vector<8x128xf32>
    %213 = math.tanh %212 : vector<8x128xf32>
    %214 = arith.mulf %209, %213 : vector<8x128xf32>
    %215 = arith.index_cast %c7_i32 : i32 to index
    %c0_73 = arith.constant 0 : index
    %c0_74 = arith.constant 0 : index
    %216 = vector.load %arg19[%215, %c0_73, %c0_74] : memref<8x8x128xf32, #tpu.memory_space<vmem>>, vector<1x8x128xf32>
    %217 = vector.shape_cast %216 : vector<1x8x128xf32> to vector<8x128xf32>
    %218 = vector.shape_cast %214 : vector<8x128xf32> to vector<1x8x128xf32>
    tpu.vector_store %arg19[%215, %c0_73, %c0_74], %218 {strides = array<i32>} : memref<8x8x128xf32, #tpu.memory_space<vmem>>, vector<1x8x128xf32>,
    %c8_i32 = arith.constant 8 : i32
    %c0_75 = arith.constant 0 : index
    %c0_76 = arith.constant 0 : index
    %c0_77 = arith.constant 0 : index
    %219 = vector.load %arg19[%c0_75, %c0_76, %c0_77] : memref<8x8x128xf32, #tpu.memory_space<vmem>>, vector<8x8x128xf32>
    %220 = vector.shape_cast %219 : vector<8x8x128xf32> to vector<64x128xf32>
    %c0_78 = arith.constant 0 : index
    %c0_79 = arith.constant 0 : index
    %221 = vector.load %arg4[%c0_78, %c0_79] : memref<128x512xf32, #tpu.memory_space<vmem>>, vector<128x512xf32>
    %cst_80 = arith.constant dense<0.000000e+00> : vector<64x512xf32>
    %222 = tpu.matmul %220, %221, %cst_80 {dimension_numbers = #tpu.dot_dimension_numbers<[1], [0], [0], [1], [0, 0, 1, 1], [], []>} : vector<64x128xf32>, vector<128x512xf32>, vector<64x512xf32> -> vector<64x512xf32>
    %c0_81 = arith.constant 0 : index
    %c0_82 = arith.constant 0 : index
    %223 = vector.load %arg6[%c0_81, %c0_82] : memref<1x512xf32, #tpu.memory_space<vmem>>, vector<1x512xf32>
    %224 = vector.broadcast %223 : vector<1x512xf32> to vector<64x512xf32>
    %225 = arith.addf %222, %224 : vector<64x512xf32>
    %226 = vector.shape_cast %225 : vector<64x512xf32> to vector<8x8x512xf32>
    %c0_83 = arith.constant 0 : index
    %c0_84 = arith.constant 0 : index
    %c0_85 = arith.constant 0 : index
    %227 = vector.load %arg18[%c0_83, %c0_84, %c0_85] : memref<8x8x512xf32, #tpu.memory_space<vmem>>, vector<8x8x512xf32>
    tpu.vector_store %arg18[%c0_83, %c0_84, %c0_85], %226 {strides = array<i32>} : memref<8x8x512xf32, #tpu.memory_space<vmem>>, vector<8x8x512xf32>,
    %cst_86 = arith.constant 0.000000e+00 : f32
    %228 = vector.broadcast %cst_86 : f32 to vector<8x128xf32>
    %cst_87 = arith.constant 0.000000e+00 : f32
    %229 = vector.broadcast %cst_87 : f32 to vector<8x128xf32>
    %c0_i32_88 = arith.constant 0 : i32
    %230 = arith.index_cast %c0_i32_88 : i32 to index
    %c0_89 = arith.constant 0 : index
    %c0_90 = arith.constant 0 : index
    %231 = vector.load %arg18[%230, %c0_89, %c0_90] : memref<8x8x512xf32, #tpu.memory_space<vmem>>, vector<1x8x512xf32>
    %232 = vector.shape_cast %231 : vector<1x8x512xf32> to vector<8x512xf32>
    %c0_91 = arith.constant 0 : index
    %c0_92 = arith.constant 0 : index
    %233 = vector.load %arg5[%c0_91, %c0_92] : memref<128x512xf32, #tpu.memory_space<vmem>>, vector<128x512xf32>
    %cst_93 = arith.constant dense<0.000000e+00> : vector<8x512xf32>
    %234 = tpu.matmul %228, %233, %cst_93 {dimension_numbers = #tpu.dot_dimension_numbers<[1], [0], [0], [1], [0, 0, 1, 1], [], []>} : vector<8x128xf32>, vector<128x512xf32>, vector<8x512xf32> -> vector<8x512xf32>
    %235 = arith.addf %232, %234 : vector<8x512xf32>
    %236 = vector.extract_strided_slice %235 {offsets = [0, 0], sizes = [8, 384], strides = [1, 1]} : vector<8x512xf32> to vector<8x384xf32>
    %237 = arith.negf %236 : vector<8x384xf32>
    %238 = math.exp %237 : vector<8x384xf32>
    %cst_94 = arith.constant 1.000000e+00 : f32
    %239 = vector.broadcast %cst_94 : f32 to vector<8x384xf32>
    %240 = arith.addf %239, %238 : vector<8x384xf32>
    %241 = arith.divf %239, %240 : vector<8x384xf32>
    %242 = vector.extract_strided_slice %235 {offsets = [0, 384], sizes = [8, 128], strides = [1, 1]} : vector<8x512xf32> to vector<8x128xf32>
    %243 = math.tanh %242 : vector<8x128xf32>
    %244 = vector.extract_strided_slice %241 {offsets = [0, 0], sizes = [8, 128], strides = [1, 1]} : vector<8x384xf32> to vector<8x128xf32>
    %245 = vector.extract_strided_slice %241 {offsets = [0, 128], sizes = [8, 128], strides = [1, 1]} : vector<8x384xf32> to vector<8x128xf32>
    %246 = vector.extract_strided_slice %241 {offsets = [0, 256], sizes = [8, 128], strides = [1, 1]} : vector<8x384xf32> to vector<8x128xf32>
    %247 = arith.mulf %245, %229 : vector<8x128xf32>
    %248 = arith.mulf %244, %243 : vector<8x128xf32>
    %249 = arith.addf %247, %248 : vector<8x128xf32>
    %250 = math.tanh %249 : vector<8x128xf32>
    %251 = arith.mulf %246, %250 : vector<8x128xf32>
    %252 = arith.index_cast %c0_i32_88 : i32 to index
    %c0_95 = arith.constant 0 : index
    %c0_96 = arith.constant 0 : index
    %253 = vector.load %arg20[%252, %c0_95, %c0_96] : memref<8x8x128xf32, #tpu.memory_space<vmem>>, vector<1x8x128xf32>
    %254 = vector.shape_cast %253 : vector<1x8x128xf32> to vector<8x128xf32>
    %255 = vector.shape_cast %251 : vector<8x128xf32> to vector<1x8x128xf32>
    tpu.vector_store %arg20[%252, %c0_95, %c0_96], %255 {strides = array<i32>} : memref<8x8x128xf32, #tpu.memory_space<vmem>>, vector<1x8x128xf32>,
    %c1_i32_97 = arith.constant 1 : i32
    %256 = arith.index_cast %c1_i32_97 : i32 to index
    %c0_98 = arith.constant 0 : index
    %c0_99 = arith.constant 0 : index
    %257 = vector.load %arg18[%256, %c0_98, %c0_99] : memref<8x8x512xf32, #tpu.memory_space<vmem>>, vector<1x8x512xf32>
    %258 = vector.shape_cast %257 : vector<1x8x512xf32> to vector<8x512xf32>
    %c0_100 = arith.constant 0 : index
    %c0_101 = arith.constant 0 : index
    %259 = vector.load %arg5[%c0_100, %c0_101] : memref<128x512xf32, #tpu.memory_space<vmem>>, vector<128x512xf32>
    %cst_102 = arith.constant dense<0.000000e+00> : vector<8x512xf32>
    %260 = tpu.matmul %251, %259, %cst_102 {dimension_numbers = #tpu.dot_dimension_numbers<[1], [0], [0], [1], [0, 0, 1, 1], [], []>} : vector<8x128xf32>, vector<128x512xf32>, vector<8x512xf32> -> vector<8x512xf32>
    %261 = arith.addf %258, %260 : vector<8x512xf32>
    %262 = vector.extract_strided_slice %261 {offsets = [0, 0], sizes = [8, 384], strides = [1, 1]} : vector<8x512xf32> to vector<8x384xf32>
    %263 = arith.negf %262 : vector<8x384xf32>
    %264 = math.exp %263 : vector<8x384xf32>
    %cst_103 = arith.constant 1.000000e+00 : f32
    %265 = vector.broadcast %cst_103 : f32 to vector<8x384xf32>
    %266 = arith.addf %265, %264 : vector<8x384xf32>
    %267 = arith.divf %265, %266 : vector<8x384xf32>
    %268 = vector.extract_strided_slice %261 {offsets = [0, 384], sizes = [8, 128], strides = [1, 1]} : vector<8x512xf32> to vector<8x128xf32>
    %269 = math.tanh %268 : vector<8x128xf32>
    %270 = vector.extract_strided_slice %267 {offsets = [0, 0], sizes = [8, 128], strides = [1, 1]} : vector<8x384xf32> to vector<8x128xf32>
    %271 = vector.extract_strided_slice %267 {offsets = [0, 128], sizes = [8, 128], strides = [1, 1]} : vector<8x384xf32> to vector<8x128xf32>
    %272 = vector.extract_strided_slice %267 {offsets = [0, 256], sizes = [8, 128], strides = [1, 1]} : vector<8x384xf32> to vector<8x128xf32>
    %273 = arith.mulf %271, %249 : vector<8x128xf32>
    %274 = arith.mulf %270, %269 : vector<8x128xf32>
    %275 = arith.addf %273, %274 : vector<8x128xf32>
    %276 = math.tanh %275 : vector<8x128xf32>
    %277 = arith.mulf %272, %276 : vector<8x128xf32>
    %278 = arith.index_cast %c1_i32_97 : i32 to index
    %c0_104 = arith.constant 0 : index
    %c0_105 = arith.constant 0 : index
    %279 = vector.load %arg20[%278, %c0_104, %c0_105] : memref<8x8x128xf32, #tpu.memory_space<vmem>>, vector<1x8x128xf32>
    %280 = vector.shape_cast %279 : vector<1x8x128xf32> to vector<8x128xf32>
    %281 = vector.shape_cast %277 : vector<8x128xf32> to vector<1x8x128xf32>
    tpu.vector_store %arg20[%278, %c0_104, %c0_105], %281 {strides = array<i32>} : memref<8x8x128xf32, #tpu.memory_space<vmem>>, vector<1x8x128xf32>,
    %c2_i32_106 = arith.constant 2 : i32
    %282 = arith.index_cast %c2_i32_106 : i32 to index
    %c0_107 = arith.constant 0 : index
    %c0_108 = arith.constant 0 : index
    %283 = vector.load %arg18[%282, %c0_107, %c0_108] : memref<8x8x512xf32, #tpu.memory_space<vmem>>, vector<1x8x512xf32>
    %284 = vector.shape_cast %283 : vector<1x8x512xf32> to vector<8x512xf32>
    %c0_109 = arith.constant 0 : index
    %c0_110 = arith.constant 0 : index
    %285 = vector.load %arg5[%c0_109, %c0_110] : memref<128x512xf32, #tpu.memory_space<vmem>>, vector<128x512xf32>
    %cst_111 = arith.constant dense<0.000000e+00> : vector<8x512xf32>
    %286 = tpu.matmul %277, %285, %cst_111 {dimension_numbers = #tpu.dot_dimension_numbers<[1], [0], [0], [1], [0, 0, 1, 1], [], []>} : vector<8x128xf32>, vector<128x512xf32>, vector<8x512xf32> -> vector<8x512xf32>
    %287 = arith.addf %284, %286 : vector<8x512xf32>
    %288 = vector.extract_strided_slice %287 {offsets = [0, 0], sizes = [8, 384], strides = [1, 1]} : vector<8x512xf32> to vector<8x384xf32>
    %289 = arith.negf %288 : vector<8x384xf32>
    %290 = math.exp %289 : vector<8x384xf32>
    %cst_112 = arith.constant 1.000000e+00 : f32
    %291 = vector.broadcast %cst_112 : f32 to vector<8x384xf32>
    %292 = arith.addf %291, %290 : vector<8x384xf32>
    %293 = arith.divf %291, %292 : vector<8x384xf32>
    %294 = vector.extract_strided_slice %287 {offsets = [0, 384], sizes = [8, 128], strides = [1, 1]} : vector<8x512xf32> to vector<8x128xf32>
    %295 = math.tanh %294 : vector<8x128xf32>
    %296 = vector.extract_strided_slice %293 {offsets = [0, 0], sizes = [8, 128], strides = [1, 1]} : vector<8x384xf32> to vector<8x128xf32>
    %297 = vector.extract_strided_slice %293 {offsets = [0, 128], sizes = [8, 128], strides = [1, 1]} : vector<8x384xf32> to vector<8x128xf32>
    %298 = vector.extract_strided_slice %293 {offsets = [0, 256], sizes = [8, 128], strides = [1, 1]} : vector<8x384xf32> to vector<8x128xf32>
    %299 = arith.mulf %297, %275 : vector<8x128xf32>
    %300 = arith.mulf %296, %295 : vector<8x128xf32>
    %301 = arith.addf %299, %300 : vector<8x128xf32>
    %302 = math.tanh %301 : vector<8x128xf32>
    %303 = arith.mulf %298, %302 : vector<8x128xf32>
    %304 = arith.index_cast %c2_i32_106 : i32 to index
    %c0_113 = arith.constant 0 : index
    %c0_114 = arith.constant 0 : index
    %305 = vector.load %arg20[%304, %c0_113, %c0_114] : memref<8x8x128xf32, #tpu.memory_space<vmem>>, vector<1x8x128xf32>
    %306 = vector.shape_cast %305 : vector<1x8x128xf32> to vector<8x128xf32>
    %307 = vector.shape_cast %303 : vector<8x128xf32> to vector<1x8x128xf32>
    tpu.vector_store %arg20[%304, %c0_113, %c0_114], %307 {strides = array<i32>} : memref<8x8x128xf32, #tpu.memory_space<vmem>>, vector<1x8x128xf32>,
    %c3_i32_115 = arith.constant 3 : i32
    %308 = arith.index_cast %c3_i32_115 : i32 to index
    %c0_116 = arith.constant 0 : index
    %c0_117 = arith.constant 0 : index
    %309 = vector.load %arg18[%308, %c0_116, %c0_117] : memref<8x8x512xf32, #tpu.memory_space<vmem>>, vector<1x8x512xf32>
    %310 = vector.shape_cast %309 : vector<1x8x512xf32> to vector<8x512xf32>
    %c0_118 = arith.constant 0 : index
    %c0_119 = arith.constant 0 : index
    %311 = vector.load %arg5[%c0_118, %c0_119] : memref<128x512xf32, #tpu.memory_space<vmem>>, vector<128x512xf32>
    %cst_120 = arith.constant dense<0.000000e+00> : vector<8x512xf32>
    %312 = tpu.matmul %303, %311, %cst_120 {dimension_numbers = #tpu.dot_dimension_numbers<[1], [0], [0], [1], [0, 0, 1, 1], [], []>} : vector<8x128xf32>, vector<128x512xf32>, vector<8x512xf32> -> vector<8x512xf32>
    %313 = arith.addf %310, %312 : vector<8x512xf32>
    %314 = vector.extract_strided_slice %313 {offsets = [0, 0], sizes = [8, 384], strides = [1, 1]} : vector<8x512xf32> to vector<8x384xf32>
    %315 = arith.negf %314 : vector<8x384xf32>
    %316 = math.exp %315 : vector<8x384xf32>
    %cst_121 = arith.constant 1.000000e+00 : f32
    %317 = vector.broadcast %cst_121 : f32 to vector<8x384xf32>
    %318 = arith.addf %317, %316 : vector<8x384xf32>
    %319 = arith.divf %317, %318 : vector<8x384xf32>
    %320 = vector.extract_strided_slice %313 {offsets = [0, 384], sizes = [8, 128], strides = [1, 1]} : vector<8x512xf32> to vector<8x128xf32>
    %321 = math.tanh %320 : vector<8x128xf32>
    %322 = vector.extract_strided_slice %319 {offsets = [0, 0], sizes = [8, 128], strides = [1, 1]} : vector<8x384xf32> to vector<8x128xf32>
    %323 = vector.extract_strided_slice %319 {offsets = [0, 128], sizes = [8, 128], strides = [1, 1]} : vector<8x384xf32> to vector<8x128xf32>
    %324 = vector.extract_strided_slice %319 {offsets = [0, 256], sizes = [8, 128], strides = [1, 1]} : vector<8x384xf32> to vector<8x128xf32>
    %325 = arith.mulf %323, %301 : vector<8x128xf32>
    %326 = arith.mulf %322, %321 : vector<8x128xf32>
    %327 = arith.addf %325, %326 : vector<8x128xf32>
    %328 = math.tanh %327 : vector<8x128xf32>
    %329 = arith.mulf %324, %328 : vector<8x128xf32>
    %330 = arith.index_cast %c3_i32_115 : i32 to index
    %c0_122 = arith.constant 0 : index
    %c0_123 = arith.constant 0 : index
    %331 = vector.load %arg20[%330, %c0_122, %c0_123] : memref<8x8x128xf32, #tpu.memory_space<vmem>>, vector<1x8x128xf32>
    %332 = vector.shape_cast %331 : vector<1x8x128xf32> to vector<8x128xf32>
    %333 = vector.shape_cast %329 : vector<8x128xf32> to vector<1x8x128xf32>
    tpu.vector_store %arg20[%330, %c0_122, %c0_123], %333 {strides = array<i32>} : memref<8x8x128xf32, #tpu.memory_space<vmem>>, vector<1x8x128xf32>,
    %c4_i32_124 = arith.constant 4 : i32
    %334 = arith.index_cast %c4_i32_124 : i32 to index
    %c0_125 = arith.constant 0 : index
    %c0_126 = arith.constant 0 : index
    %335 = vector.load %arg18[%334, %c0_125, %c0_126] : memref<8x8x512xf32, #tpu.memory_space<vmem>>, vector<1x8x512xf32>
    %336 = vector.shape_cast %335 : vector<1x8x512xf32> to vector<8x512xf32>
    %c0_127 = arith.constant 0 : index
    %c0_128 = arith.constant 0 : index
    %337 = vector.load %arg5[%c0_127, %c0_128] : memref<128x512xf32, #tpu.memory_space<vmem>>, vector<128x512xf32>
    %cst_129 = arith.constant dense<0.000000e+00> : vector<8x512xf32>
    %338 = tpu.matmul %329, %337, %cst_129 {dimension_numbers = #tpu.dot_dimension_numbers<[1], [0], [0], [1], [0, 0, 1, 1], [], []>} : vector<8x128xf32>, vector<128x512xf32>, vector<8x512xf32> -> vector<8x512xf32>
    %339 = arith.addf %336, %338 : vector<8x512xf32>
    %340 = vector.extract_strided_slice %339 {offsets = [0, 0], sizes = [8, 384], strides = [1, 1]} : vector<8x512xf32> to vector<8x384xf32>
    %341 = arith.negf %340 : vector<8x384xf32>
    %342 = math.exp %341 : vector<8x384xf32>
    %cst_130 = arith.constant 1.000000e+00 : f32
    %343 = vector.broadcast %cst_130 : f32 to vector<8x384xf32>
    %344 = arith.addf %343, %342 : vector<8x384xf32>
    %345 = arith.divf %343, %344 : vector<8x384xf32>
    %346 = vector.extract_strided_slice %339 {offsets = [0, 384], sizes = [8, 128], strides = [1, 1]} : vector<8x512xf32> to vector<8x128xf32>
    %347 = math.tanh %346 : vector<8x128xf32>
    %348 = vector.extract_strided_slice %345 {offsets = [0, 0], sizes = [8, 128], strides = [1, 1]} : vector<8x384xf32> to vector<8x128xf32>
    %349 = vector.extract_strided_slice %345 {offsets = [0, 128], sizes = [8, 128], strides = [1, 1]} : vector<8x384xf32> to vector<8x128xf32>
    %350 = vector.extract_strided_slice %345 {offsets = [0, 256], sizes = [8, 128], strides = [1, 1]} : vector<8x384xf32> to vector<8x128xf32>
    %351 = arith.mulf %349, %327 : vector<8x128xf32>
    %352 = arith.mulf %348, %347 : vector<8x128xf32>
    %353 = arith.addf %351, %352 : vector<8x128xf32>
    %354 = math.tanh %353 : vector<8x128xf32>
    %355 = arith.mulf %350, %354 : vector<8x128xf32>
    %356 = arith.index_cast %c4_i32_124 : i32 to index
    %c0_131 = arith.constant 0 : index
    %c0_132 = arith.constant 0 : index
    %357 = vector.load %arg20[%356, %c0_131, %c0_132] : memref<8x8x128xf32, #tpu.memory_space<vmem>>, vector<1x8x128xf32>
    %358 = vector.shape_cast %357 : vector<1x8x128xf32> to vector<8x128xf32>
    %359 = vector.shape_cast %355 : vector<8x128xf32> to vector<1x8x128xf32>
    tpu.vector_store %arg20[%356, %c0_131, %c0_132], %359 {strides = array<i32>} : memref<8x8x128xf32, #tpu.memory_space<vmem>>, vector<1x8x128xf32>,
    %c5_i32_133 = arith.constant 5 : i32
    %360 = arith.index_cast %c5_i32_133 : i32 to index
    %c0_134 = arith.constant 0 : index
    %c0_135 = arith.constant 0 : index
    %361 = vector.load %arg18[%360, %c0_134, %c0_135] : memref<8x8x512xf32, #tpu.memory_space<vmem>>, vector<1x8x512xf32>
    %362 = vector.shape_cast %361 : vector<1x8x512xf32> to vector<8x512xf32>
    %c0_136 = arith.constant 0 : index
    %c0_137 = arith.constant 0 : index
    %363 = vector.load %arg5[%c0_136, %c0_137] : memref<128x512xf32, #tpu.memory_space<vmem>>, vector<128x512xf32>
    %cst_138 = arith.constant dense<0.000000e+00> : vector<8x512xf32>
    %364 = tpu.matmul %355, %363, %cst_138 {dimension_numbers = #tpu.dot_dimension_numbers<[1], [0], [0], [1], [0, 0, 1, 1], [], []>} : vector<8x128xf32>, vector<128x512xf32>, vector<8x512xf32> -> vector<8x512xf32>
    %365 = arith.addf %362, %364 : vector<8x512xf32>
    %366 = vector.extract_strided_slice %365 {offsets = [0, 0], sizes = [8, 384], strides = [1, 1]} : vector<8x512xf32> to vector<8x384xf32>
    %367 = arith.negf %366 : vector<8x384xf32>
    %368 = math.exp %367 : vector<8x384xf32>
    %cst_139 = arith.constant 1.000000e+00 : f32
    %369 = vector.broadcast %cst_139 : f32 to vector<8x384xf32>
    %370 = arith.addf %369, %368 : vector<8x384xf32>
    %371 = arith.divf %369, %370 : vector<8x384xf32>
    %372 = vector.extract_strided_slice %365 {offsets = [0, 384], sizes = [8, 128], strides = [1, 1]} : vector<8x512xf32> to vector<8x128xf32>
    %373 = math.tanh %372 : vector<8x128xf32>
    %374 = vector.extract_strided_slice %371 {offsets = [0, 0], sizes = [8, 128], strides = [1, 1]} : vector<8x384xf32> to vector<8x128xf32>
    %375 = vector.extract_strided_slice %371 {offsets = [0, 128], sizes = [8, 128], strides = [1, 1]} : vector<8x384xf32> to vector<8x128xf32>
    %376 = vector.extract_strided_slice %371 {offsets = [0, 256], sizes = [8, 128], strides = [1, 1]} : vector<8x384xf32> to vector<8x128xf32>
    %377 = arith.mulf %375, %353 : vector<8x128xf32>
    %378 = arith.mulf %374, %373 : vector<8x128xf32>
    %379 = arith.addf %377, %378 : vector<8x128xf32>
    %380 = math.tanh %379 : vector<8x128xf32>
    %381 = arith.mulf %376, %380 : vector<8x128xf32>
    %382 = arith.index_cast %c5_i32_133 : i32 to index
    %c0_140 = arith.constant 0 : index
    %c0_141 = arith.constant 0 : index
    %383 = vector.load %arg20[%382, %c0_140, %c0_141] : memref<8x8x128xf32, #tpu.memory_space<vmem>>, vector<1x8x128xf32>
    %384 = vector.shape_cast %383 : vector<1x8x128xf32> to vector<8x128xf32>
    %385 = vector.shape_cast %381 : vector<8x128xf32> to vector<1x8x128xf32>
    tpu.vector_store %arg20[%382, %c0_140, %c0_141], %385 {strides = array<i32>} : memref<8x8x128xf32, #tpu.memory_space<vmem>>, vector<1x8x128xf32>,
    %c6_i32_142 = arith.constant 6 : i32
    %386 = arith.index_cast %c6_i32_142 : i32 to index
    %c0_143 = arith.constant 0 : index
    %c0_144 = arith.constant 0 : index
    %387 = vector.load %arg18[%386, %c0_143, %c0_144] : memref<8x8x512xf32, #tpu.memory_space<vmem>>, vector<1x8x512xf32>
    %388 = vector.shape_cast %387 : vector<1x8x512xf32> to vector<8x512xf32>
    %c0_145 = arith.constant 0 : index
    %c0_146 = arith.constant 0 : index
    %389 = vector.load %arg5[%c0_145, %c0_146] : memref<128x512xf32, #tpu.memory_space<vmem>>, vector<128x512xf32>
    %cst_147 = arith.constant dense<0.000000e+00> : vector<8x512xf32>
    %390 = tpu.matmul %381, %389, %cst_147 {dimension_numbers = #tpu.dot_dimension_numbers<[1], [0], [0], [1], [0, 0, 1, 1], [], []>} : vector<8x128xf32>, vector<128x512xf32>, vector<8x512xf32> -> vector<8x512xf32>
    %391 = arith.addf %388, %390 : vector<8x512xf32>
    %392 = vector.extract_strided_slice %391 {offsets = [0, 0], sizes = [8, 384], strides = [1, 1]} : vector<8x512xf32> to vector<8x384xf32>
    %393 = arith.negf %392 : vector<8x384xf32>
    %394 = math.exp %393 : vector<8x384xf32>
    %cst_148 = arith.constant 1.000000e+00 : f32
    %395 = vector.broadcast %cst_148 : f32 to vector<8x384xf32>
    %396 = arith.addf %395, %394 : vector<8x384xf32>
    %397 = arith.divf %395, %396 : vector<8x384xf32>
    %398 = vector.extract_strided_slice %391 {offsets = [0, 384], sizes = [8, 128], strides = [1, 1]} : vector<8x512xf32> to vector<8x128xf32>
    %399 = math.tanh %398 : vector<8x128xf32>
    %400 = vector.extract_strided_slice %397 {offsets = [0, 0], sizes = [8, 128], strides = [1, 1]} : vector<8x384xf32> to vector<8x128xf32>
    %401 = vector.extract_strided_slice %397 {offsets = [0, 128], sizes = [8, 128], strides = [1, 1]} : vector<8x384xf32> to vector<8x128xf32>
    %402 = vector.extract_strided_slice %397 {offsets = [0, 256], sizes = [8, 128], strides = [1, 1]} : vector<8x384xf32> to vector<8x128xf32>
    %403 = arith.mulf %401, %379 : vector<8x128xf32>
    %404 = arith.mulf %400, %399 : vector<8x128xf32>
    %405 = arith.addf %403, %404 : vector<8x128xf32>
    %406 = math.tanh %405 : vector<8x128xf32>
    %407 = arith.mulf %402, %406 : vector<8x128xf32>
    %408 = arith.index_cast %c6_i32_142 : i32 to index
    %c0_149 = arith.constant 0 : index
    %c0_150 = arith.constant 0 : index
    %409 = vector.load %arg20[%408, %c0_149, %c0_150] : memref<8x8x128xf32, #tpu.memory_space<vmem>>, vector<1x8x128xf32>
    %410 = vector.shape_cast %409 : vector<1x8x128xf32> to vector<8x128xf32>
    %411 = vector.shape_cast %407 : vector<8x128xf32> to vector<1x8x128xf32>
    tpu.vector_store %arg20[%408, %c0_149, %c0_150], %411 {strides = array<i32>} : memref<8x8x128xf32, #tpu.memory_space<vmem>>, vector<1x8x128xf32>,
    %c7_i32_151 = arith.constant 7 : i32
    %412 = arith.index_cast %c7_i32_151 : i32 to index
    %c0_152 = arith.constant 0 : index
    %c0_153 = arith.constant 0 : index
    %413 = vector.load %arg18[%412, %c0_152, %c0_153] : memref<8x8x512xf32, #tpu.memory_space<vmem>>, vector<1x8x512xf32>
    %414 = vector.shape_cast %413 : vector<1x8x512xf32> to vector<8x512xf32>
    %c0_154 = arith.constant 0 : index
    %c0_155 = arith.constant 0 : index
    %415 = vector.load %arg5[%c0_154, %c0_155] : memref<128x512xf32, #tpu.memory_space<vmem>>, vector<128x512xf32>
    %cst_156 = arith.constant dense<0.000000e+00> : vector<8x512xf32>
    %416 = tpu.matmul %407, %415, %cst_156 {dimension_numbers = #tpu.dot_dimension_numbers<[1], [0], [0], [1], [0, 0, 1, 1], [], []>} : vector<8x128xf32>, vector<128x512xf32>, vector<8x512xf32> -> vector<8x512xf32>
    %417 = arith.addf %414, %416 : vector<8x512xf32>
    %418 = vector.extract_strided_slice %417 {offsets = [0, 0], sizes = [8, 384], strides = [1, 1]} : vector<8x512xf32> to vector<8x384xf32>
    %419 = arith.negf %418 : vector<8x384xf32>
    %420 = math.exp %419 : vector<8x384xf32>
    %cst_157 = arith.constant 1.000000e+00 : f32
    %421 = vector.broadcast %cst_157 : f32 to vector<8x384xf32>
    %422 = arith.addf %421, %420 : vector<8x384xf32>
    %423 = arith.divf %421, %422 : vector<8x384xf32>
    %424 = vector.extract_strided_slice %417 {offsets = [0, 384], sizes = [8, 128], strides = [1, 1]} : vector<8x512xf32> to vector<8x128xf32>
    %425 = math.tanh %424 : vector<8x128xf32>
    %426 = vector.extract_strided_slice %423 {offsets = [0, 0], sizes = [8, 128], strides = [1, 1]} : vector<8x384xf32> to vector<8x128xf32>
    %427 = vector.extract_strided_slice %423 {offsets = [0, 128], sizes = [8, 128], strides = [1, 1]} : vector<8x384xf32> to vector<8x128xf32>
    %428 = vector.extract_strided_slice %423 {offsets = [0, 256], sizes = [8, 128], strides = [1, 1]} : vector<8x384xf32> to vector<8x128xf32>
    %429 = arith.mulf %427, %405 : vector<8x128xf32>
    %430 = arith.mulf %426, %425 : vector<8x128xf32>
    %431 = arith.addf %429, %430 : vector<8x128xf32>
    %432 = math.tanh %431 : vector<8x128xf32>
    %433 = arith.mulf %428, %432 : vector<8x128xf32>
    %434 = arith.index_cast %c7_i32_151 : i32 to index
    %c0_158 = arith.constant 0 : index
    %c0_159 = arith.constant 0 : index
    %435 = vector.load %arg20[%434, %c0_158, %c0_159] : memref<8x8x128xf32, #tpu.memory_space<vmem>>, vector<1x8x128xf32>
    %436 = vector.shape_cast %435 : vector<1x8x128xf32> to vector<8x128xf32>
    %437 = vector.shape_cast %433 : vector<8x128xf32> to vector<1x8x128xf32>
    tpu.vector_store %arg20[%434, %c0_158, %c0_159], %437 {strides = array<i32>} : memref<8x8x128xf32, #tpu.memory_space<vmem>>, vector<1x8x128xf32>,
    %c8_i32_160 = arith.constant 8 : i32
    %c0_161 = arith.constant 0 : index
    %c0_162 = arith.constant 0 : index
    %c0_163 = arith.constant 0 : index
    %438 = vector.load %arg20[%c0_161, %c0_162, %c0_163] : memref<8x8x128xf32, #tpu.memory_space<vmem>>, vector<8x8x128xf32>
    %c0_164 = arith.constant 0 : index
    %c0_165 = arith.constant 0 : index
    %439 = vector.load %arg7[%c0_164, %c0_165] : memref<1x128xf32, #tpu.memory_space<vmem>>, vector<1x128xf32>
    %440 = vector.shape_cast %439 : vector<1x128xf32> to vector<1x1x128xf32>
    %441 = vector.broadcast %440 : vector<1x1x128xf32> to vector<8x8x128xf32>
    %442 = arith.mulf %438, %441 : vector<8x8x128xf32>
    %cst_166 = arith.constant dense<0.000000e+00> : vector<8x8xf32>
    %443 = vector.multi_reduction <add>, %442, %cst_166 [2] : vector<8x8x128xf32> to vector<8x8xf32>
    %444 = vector.shape_cast %443 : vector<8x8xf32> to vector<8x8x1xf32>
    %c0_167 = arith.constant 0 : index
    %c0_168 = arith.constant 0 : index
    %445 = vector.load %arg8[%c0_167, %c0_168] : memref<1x1xf32, #tpu.memory_space<vmem>>, vector<1x1xf32>
    %446 = vector.shape_cast %445 : vector<1x1xf32> to vector<1x1x1xf32>
    %447 = vector.broadcast %446 : vector<1x1x1xf32> to vector<8x8x1xf32>
    %448 = arith.addf %444, %447 : vector<8x8x1xf32>
    %cst_169 = arith.constant dense<0xFF800000> : vector<8x1xf32>
    %449 = vector.multi_reduction <maximumf>, %448, %cst_169 [0] : vector<8x8x1xf32> to vector<8x1xf32>
    %450 = vector.shape_cast %449 : vector<8x1xf32> to vector<1x8x1xf32>
    %451 = vector.broadcast %450 : vector<1x8x1xf32> to vector<8x8x1xf32>
    %452 = arith.subf %448, %451 : vector<8x8x1xf32>
    %453 = math.exp %452 : vector<8x8x1xf32>
    %cst_170 = arith.constant dense<0.000000e+00> : vector<8x1xf32>
    %454 = vector.multi_reduction <add>, %453, %cst_170 [0] : vector<8x8x1xf32> to vector<8x1xf32>
    %455 = vector.shape_cast %454 : vector<8x1xf32> to vector<1x8x1xf32>
    %456 = vector.broadcast %455 : vector<1x8x1xf32> to vector<8x8x1xf32>
    %457 = arith.divf %453, %456 : vector<8x8x1xf32>
    %458 = vector.shape_cast %457 : vector<8x8x1xf32> to vector<8x8x1xf32>
    %459 = vector.broadcast %458 : vector<8x8x1xf32> to vector<8x8x128xf32>
    %460 = arith.mulf %459, %438 : vector<8x8x128xf32>
    %cst_171 = arith.constant dense<0.000000e+00> : vector<8x128xf32>
    %461 = vector.multi_reduction <add>, %460, %cst_171 [0] : vector<8x8x128xf32> to vector<8x128xf32>
    %c0_172 = arith.constant 0 : index
    %c0_173 = arith.constant 0 : index
    %462 = vector.load %arg9[%c0_172, %c0_173] : memref<128x128xf32, #tpu.memory_space<vmem>>, vector<128x128xf32>
    %cst_174 = arith.constant dense<0.000000e+00> : vector<8x128xf32>
    %463 = tpu.matmul %461, %462, %cst_174 {dimension_numbers = #tpu.dot_dimension_numbers<[1], [0], [0], [1], [0, 0, 1, 1], [], []>} : vector<8x128xf32>, vector<128x128xf32>, vector<8x128xf32> -> vector<8x128xf32>
    %c0_175 = arith.constant 0 : index
    %c0_176 = arith.constant 0 : index
    %464 = vector.load %arg10[%c0_175, %c0_176] : memref<1x128xf32, #tpu.memory_space<vmem>>, vector<1x128xf32>
    %465 = vector.broadcast %464 : vector<1x128xf32> to vector<8x128xf32>
    %466 = arith.addf %463, %465 : vector<8x128xf32>
    %cst_177 = arith.constant 0.000000e+00 : f32
    %467 = vector.broadcast %cst_177 : f32 to vector<8x128xf32>
    %468 = arith.maximumf %466, %467 : vector<8x128xf32>
    %c0_178 = arith.constant 0 : index
    %c0_179 = arith.constant 0 : index
    %469 = vector.load %arg11[%c0_178, %c0_179] : memref<128x128xf32, #tpu.memory_space<vmem>>, vector<128x128xf32>
    %cst_180 = arith.constant dense<0.000000e+00> : vector<8x128xf32>
    %470 = tpu.matmul %468, %469, %cst_180 {dimension_numbers = #tpu.dot_dimension_numbers<[1], [0], [0], [1], [0, 0, 1, 1], [], []>} : vector<8x128xf32>, vector<128x128xf32>, vector<8x128xf32> -> vector<8x128xf32>
    %c0_181 = arith.constant 0 : index
    %c0_182 = arith.constant 0 : index
    %471 = vector.load %arg12[%c0_181, %c0_182] : memref<1x128xf32, #tpu.memory_space<vmem>>, vector<1x128xf32>
    %472 = vector.broadcast %471 : vector<1x128xf32> to vector<8x128xf32>
    %473 = arith.addf %470, %472 : vector<8x128xf32>
    %cst_183 = arith.constant 0.000000e+00 : f32
    %474 = vector.broadcast %cst_183 : f32 to vector<8x128xf32>
    %475 = arith.maximumf %473, %474 : vector<8x128xf32>
    %c0_184 = arith.constant 0 : index
    %c0_185 = arith.constant 0 : index
    %476 = vector.load %arg13[%c0_184, %c0_185] : memref<128x128xf32, #tpu.memory_space<vmem>>, vector<128x128xf32>
    %cst_186 = arith.constant dense<0.000000e+00> : vector<8x128xf32>
    %477 = tpu.matmul %475, %476, %cst_186 {dimension_numbers = #tpu.dot_dimension_numbers<[1], [0], [0], [1], [0, 0, 1, 1], [], []>} : vector<8x128xf32>, vector<128x128xf32>, vector<8x128xf32> -> vector<8x128xf32>
    %c0_187 = arith.constant 0 : index
    %c0_188 = arith.constant 0 : index
    %478 = vector.load %arg14[%c0_187, %c0_188] : memref<1x128xf32, #tpu.memory_space<vmem>>, vector<1x128xf32>
    %479 = vector.broadcast %478 : vector<1x128xf32> to vector<8x128xf32>
    %480 = arith.addf %477, %479 : vector<8x128xf32>
    %cst_189 = arith.constant 0.000000e+00 : f32
    %481 = vector.broadcast %cst_189 : f32 to vector<8x128xf32>
    %482 = arith.maximumf %480, %481 : vector<8x128xf32>
    %c0_190 = arith.constant 0 : index
    %c0_191 = arith.constant 0 : index
    %483 = vector.load %arg15[%c0_190, %c0_191] : memref<128x128xf32, #tpu.memory_space<vmem>>, vector<128x128xf32>
    %cst_192 = arith.constant dense<0.000000e+00> : vector<8x128xf32>
    %484 = tpu.matmul %482, %483, %cst_192 {dimension_numbers = #tpu.dot_dimension_numbers<[1], [0], [0], [1], [0, 0, 1, 1], [], []>} : vector<8x128xf32>, vector<128x128xf32>, vector<8x128xf32> -> vector<8x128xf32>
    %c0_193 = arith.constant 0 : index
    %c0_194 = arith.constant 0 : index
    %485 = vector.load %arg16[%c0_193, %c0_194] : memref<1x128xf32, #tpu.memory_space<vmem>>, vector<1x128xf32>
    %486 = vector.broadcast %485 : vector<1x128xf32> to vector<8x128xf32>
    %487 = arith.addf %484, %486 : vector<8x128xf32>
    %488 = arith.negf %487 : vector<8x128xf32>
    %489 = math.exp %488 : vector<8x128xf32>
    %cst_195 = arith.constant 1.000000e+00 : f32
    %490 = vector.broadcast %cst_195 : f32 to vector<8x128xf32>
    %491 = arith.addf %490, %489 : vector<8x128xf32>
    %492 = arith.divf %490, %491 : vector<8x128xf32>
    %c0_196 = arith.constant 0 : index
    %c0_197 = arith.constant 0 : index
    %493 = vector.load %arg17[%c0_196, %c0_197] : memref<8x128xf32, #tpu.memory_space<vmem>>, vector<8x128xf32>
    tpu.vector_store %arg17[%c0_196, %c0_197], %492 {strides = array<i32>} : memref<8x128xf32, #tpu.memory_space<vmem>>, vector<8x128xf32>,
    return
  }
}

</mosaic_0001>

<bundles_post_ra>
// kernel: tpu_custom_call.1
= control target key start
LH: loop header
LB: loop body
LE: loop exit
PB: predicated region body
PF: predicated region fallthrough
CT: control target
= control target key end

     0   :  { %s8856_s0 = inlined_call_operand.hbm [shape: f32[8,8,16], index: 0, kind: input, shape index: {}]   ;;  %s8857_s1 = inlined_call_operand.hbm [shape: f32[16,512], index: 1, kind: input, shape index: {}]   ;;  %s8858_s2 = inlined_call_operand.hbm [shape: f32[128,512], index: 2, kind: input, shape index: {}]   ;;  %s8859_s3 = inlined_call_operand.vmem [shape: f32[1,512], index: 3, kind: input, shape index: {}]   ;;  %s8860_s4 = inlined_call_operand.hbm [shape: f32[128,512], index: 4, kind: input, shape index: {}]   ;;  %s8861_s5 = inlined_call_operand.hbm [shape: f32[128,512], index: 5, kind: input, shape index: {}]   ;;  %s8862_s6 = inlined_call_operand.vmem [shape: f32[1,512], index: 6, kind: input, shape index: {}]   ;;  %s8863_s7 = inlined_call_operand.vmem [shape: f32[1,128], index: 7, kind: input, shape index: {}]   ;;  %s8864_s8 = inlined_call_operand.<no memory space> [shape: f32[1,1], index: 8, kind: input, shape index: {}]   ;;  %s8865_s9 = inlined_call_operand.hbm [shape: f32[128,128], index: 9, kind: input, shape index: {}]   ;;  %s8866_s10 = inlined_call_operand.vmem [shape: f32[1,128], index: 10, kind: input, shape index: {}]   ;;  %s8867_s11 = inlined_call_operand.hbm [shape: f32[128,128], index: 11, kind: input, shape index: {}]   ;;  %s8868_s12 = inlined_call_operand.vmem [shape: f32[1,128], index: 12, kind: input, shape index: {}]   ;;  %s8869_s13 = inlined_call_operand.hbm [shape: f32[128,128], index: 13, kind: input, shape index: {}]   ;;  %s8870_s14 = inlined_call_operand.vmem [shape: f32[1,128], index: 14, kind: input, shape index: {}]   ;;  %s8871_s15 = inlined_call_operand.hbm [shape: f32[128,128], index: 15, kind: input, shape index: {}]   ;;  %s8872_s16 = inlined_call_operand.vmem [shape: f32[1,128], index: 16, kind: input, shape index: {}]   ;;  %s8873_s17 = inlined_call_operand.hbm [shape: f32[8,128], index: 17, kind: output, shape index: {}]  }
   0x1   :  { %8878 = sst [smem:[#allocation28_spill]] %s8856_s0  ;;  %v22_v0 = vstv %s8864_s8 }
   0x2   :  { %8879 = sst [smem:[#allocation29_spill]] %s8857_s1  ;;  %23 = vst [vmem:[#allocation5] sm:$0x1] %v22_v0 }
   0x3   :  { %24 = vsyncpa [#allocation7], 0 }
   0x4   :  { %25 = vsyncpa [#allocation10], 0 }
   0x5   :  { %26 = vsyncpa [#allocation13], 0 }
   0x6   :  { %27 = vsyncpa [#allocation16], 0 }
   0x7   :  { %28 = vsyncpa [#allocation19], 0 }
   0x8   :  { %29 = vsyncpa [#allocation8], 0  ;;  %s7403_s26 = smov [#allocation9]   ;;  %s8880_s0 = sld [smem:[#allocation29_spill]] }
   0x9   :  { %s47_s27 = sshll.u32 %s7403_s26, 4  ;;  %s48_s27 = int_to_ptr.vmem [resolvable:$true] %s47_s27 }
   0xe   :  { %s7171_s30 = scalar_lea.hbm %s8880_s0, 1024 }
   0xf   :  { %p7172_p0 = scmp.ne.s32.totalorder %s8880_s0, %s7171_s30  ;;  %p7175_p1 = scmp.lt.u32.totalorder %s7171_s30, %s8880_s0 }
  0x11   :  { %p7177_p2 = pnand %p7175_p1, %p7172_p0 }
  0x13   :  { %7180 = shalt.err (!%p7177_p2)
}
  0x14   :  { %s7181_s20 = scalar_lea.vmem %s48_s27, 1024  ;;  %p7186_p4 = scmp.lt.s32.totalorder %s48_s27, %s48_s27 }
  0x15   :  { %p7182_p3 = scmp.ne.s32.totalorder %s48_s27, %s7181_s20  ;;  %p7187_p5 = scmp.lt.s32.totalorder %s7181_s20, %s7181_s20 }
  0x17   :  { %p7188_p6 = por %p7187_p5, %p7186_p4 }
  0x19   :  { %p7189_p7 = pnand %p7188_p6, %p7182_p3 }
  0x1b   :  { %7192 = shalt.err (!%p7189_p7)
}
  0x1c   :  { %s8876_s21 = smov 512   ;;  %s7405_s22 = smov 32  }
  0x1d   :  { %53 = dma.hbm_to_vmem [thread:$0]  %s8880_s0, 1024, %s48_s27, [#allocation10], %s8876_s21, %s8876_s21, %s7405_s22  }
  0x1e   :  { %s7406_s25 = smov [#allocation12]   ;;  %s7193_s30 = scalar_lea.hbm %s8860_s4, 8192 }
  0x1f   :  { %s73_s26 = sshll.u32 %s7406_s25, 4  ;;  %p7194_p8 = scmp.ne.s32.totalorder %s8860_s4, %s7193_s30  ;;  %s74_s26 = int_to_ptr.vmem [resolvable:$true] %s73_s26 }
  0x20   :  { %p7197_p9 = scmp.lt.u32.totalorder %s7193_s30, %s8860_s4 }
  0x22   :  { %p7199_p10 = pnand %p7197_p9, %p7194_p8 }
  0x24   :  { %7202 = shalt.err (!%p7199_p10)
}
  0x25   :  { %s7203_s20 = scalar_lea.vmem %s74_s26, 8192  ;;  %p7208_p12 = scmp.lt.s32.totalorder %s74_s26, %s74_s26 }
  0x26   :  { %p7204_p11 = scmp.ne.s32.totalorder %s74_s26, %s7203_s20  ;;  %p7209_p13 = scmp.lt.s32.totalorder %s7203_s20, %s7203_s20 }
  0x28   :  { %p7210_p0 = por %p7209_p13, %p7208_p12 }
  0x2a   :  { %p7211_p1 = pnand %p7210_p0, %p7204_p11 }
  0x2c   :  { %7214 = shalt.err (!%p7211_p1)
}
  0x2d   :  { %79 = dma.hbm_to_vmem [thread:$0]  %s8860_s4, 8192, %s74_s26, [#allocation13], %s8876_s21, %s8876_s21, %s7405_s22  }
  0x2e   :  { %s7407_s23 = smov [#allocation15]   ;;  %s7408_s25 = smov [#allocation18]  }
  0x2f   :  { %s103_s24 = sshll.u32 %s7407_s23, 4  ;;  %s131_s28 = sshll.u32 %s7408_s25, 4  ;;  %s104_s24 = int_to_ptr.vmem [resolvable:$true] %s103_s24  ;;  %s7544_s28 = int_to_ptr.vmem [resolvable:$true] %s131_s28 }
  0x30   :  { %s7215_s18 = scalar_lea.hbm %s8865_s9, 2048 }
  0x31   :  { %p7216_p2 = scmp.ne.s32.totalorder %s8865_s9, %s7215_s18  ;;  %p7219_p3 = scmp.lt.u32.totalorder %s7215_s18, %s8865_s9 }
  0x33   :  { %p7221_p4 = pnand %p7219_p3, %p7216_p2 }
  0x35   :  { %7224 = shalt.err (!%p7221_p4)
}
  0x36   :  { %s7225_s4 = scalar_lea.vmem %s104_s24, 2048  ;;  %p7230_p6 = scmp.lt.s32.totalorder %s104_s24, %s104_s24 }
  0x37   :  { %p7226_p5 = scmp.ne.s32.totalorder %s104_s24, %s7225_s4  ;;  %p7231_p7 = scmp.lt.s32.totalorder %s7225_s4, %s7225_s4 }
  0x39   :  { %p7232_p8 = por %p7231_p7, %p7230_p6 }
  0x3b   :  { %p7233_p9 = pnand %p7232_p8, %p7226_p5 }
  0x3d   :  { %7236 = shalt.err (!%p7233_p9)
}
  0x3e   :  { %s7409_s26 = smov 128   ;;  %s7410_s27 = smov 8  }
  0x3f   :  { %109 = dma.hbm_to_vmem [thread:$0]  %s8865_s9, 2048, %s104_s24, [#allocation16], %s7409_s26, %s7409_s26, %s7410_s27  }
  0x40   :  { %s7237_s30 = scalar_lea.hbm %s8869_s13, 2048 }
  0x41   :  { %p7238_p10 = scmp.ne.s32.totalorder %s8869_s13, %s7237_s30  ;;  %p7241_p11 = scmp.lt.u32.totalorder %s7237_s30, %s8869_s13 }
  0x43   :  { %p7243_p12 = pnand %p7241_p11, %p7238_p10 }
  0x45   :  { %7246 = shalt.err (!%p7243_p12)
}
  0x46   :  { %s7247_s20 = scalar_lea.vmem %s7544_s28, 2048  ;;  %p7252_p0 = scmp.lt.s32.totalorder %s7544_s28, %s7544_s28 }
  0x47   :  { %p7248_p13 = scmp.ne.s32.totalorder %s7544_s28, %s7247_s20  ;;  %p7253_p1 = scmp.lt.s32.totalorder %s7247_s20, %s7247_s20 }
  0x49   :  { %p7254_p2 = por %p7253_p1, %p7252_p0 }
  0x4b   :  { %p7255_p3 = pnand %p7254_p2, %p7248_p13 }
  0x4d   :  { %7258 = shalt.err (!%p7255_p3)
}
  0x4e   :  { %137 = dma.hbm_to_vmem [thread:$0]  %s8869_s13, 2048, %s7544_s28, [#allocation19], %s7409_s26, %s7409_s26, %s7410_s27  }
  0x4f   :  { %s7411_s4 = smov [#allocation6]   ;;  %s7412_s23 = smov [#allocation11]  }
  0x50   :  { %s35_s0 = sshll.u32 %s7411_s4, 4  ;;  %s59_s25 = sshll.u32 %s7412_s23, 4  ;;  %s36_s0 = int_to_ptr.vmem [resolvable:$true] %s35_s0  ;;  %s7581_s25 = int_to_ptr.vmem [resolvable:$true] %s59_s25 }
  0x51   :  { %s8881_s18 = sld [smem:[#allocation28_spill]] }
  0x57   :  { %s7259_s19 = scalar_lea.hbm %s8881_s18, 1024 }
  0x58   :  { %p7260_p4 = scmp.ne.s32.totalorder %s8881_s18, %s7259_s19  ;;  %p7263_p5 = scmp.lt.u32.totalorder %s7259_s19, %s8881_s18 }
  0x5a   :  { %p7265_p6 = pnand %p7263_p5, %p7260_p4 }
  0x5c   :  { %7268 = shalt.err (!%p7265_p6)
}
  0x5d   :  { %s7269_s13 = scalar_lea.vmem %s36_s0, 1024  ;;  %p7274_p8 = scmp.lt.s32.totalorder %s36_s0, %s36_s0 }
  0x5e   :  { %p7270_p7 = scmp.ne.s32.totalorder %s36_s0, %s7269_s13  ;;  %p7275_p9 = scmp.lt.s32.totalorder %s7269_s13, %s7269_s13 }
  0x60   :  { %p7276_p10 = por %p7275_p9, %p7274_p8 }
  0x62   :  { %p7277_p11 = pnand %p7276_p10, %p7270_p7 }
  0x64   :  { %7280 = shalt.err (!%p7277_p11)
}
  0x65   :  { %41 = dma.hbm_to_vmem [thread:$0]  %s8881_s18, 1024, %s36_s0, [#allocation7], %s7409_s26, %s7409_s26, %s7410_s27  }
  0x66   :  { %s7281_s21 = scalar_lea.hbm %s8858_s2, 8192 }
  0x67   :  { %p7282_p12 = scmp.ne.s32.totalorder %s8858_s2, %s7281_s21  ;;  %p7285_p13 = scmp.lt.u32.totalorder %s7281_s21, %s8858_s2 }
  0x69   :  { %p7287_p0 = pnand %p7285_p13, %p7282_p12 }
  0x6b   :  { %7290 = shalt.err (!%p7287_p0)
}
  0x6c   :  { %s7291_s1 = scalar_lea.vmem %s7581_s25, 8192  ;;  %p7296_p2 = scmp.lt.s32.totalorder %s7581_s25, %s7581_s25 }
  0x6d   :  { %p7292_p1 = scmp.ne.s32.totalorder %s7581_s25, %s7291_s1  ;;  %p7297_p3 = scmp.lt.s32.totalorder %s7291_s1, %s7291_s1 }
  0x6f   :  { %p7298_p4 = por %p7297_p3, %p7296_p2 }
  0x71   :  { %p7299_p5 = pnand %p7298_p4, %p7292_p1 }
  0x73   :  { %7302 = shalt.err (!%p7299_p5)
}
  0x74   :  { %s8882_s0 = smov 512   ;;  %s7413_s20 = smov [#allocation14]  }
  0x75   :  { %65 = dma.hbm_to_vmem [thread:$0]  %s8858_s2, 8192, %s7581_s25, [#allocation10], %s8882_s0, %s8882_s0, %s7405_s22  }
  0x76   :  { %s85_s13 = sshll.u32 %s7413_s20, 4  ;;  %s7414_s28 = smov [#allocation17]   ;;  %s86_s13 = int_to_ptr.vmem [resolvable:$true] %s85_s13 }
  0x77   :  { %s117_s9 = sshll.u32 %s7414_s28, 4  ;;  %s7303_s21 = scalar_lea.hbm %s8861_s5, 8192  ;;  %s7618_s9 = int_to_ptr.vmem [resolvable:$true] %s117_s9 }
  0x78   :  { %p7304_p6 = scmp.ne.s32.totalorder %s8861_s5, %s7303_s21  ;;  %p7307_p7 = scmp.lt.u32.totalorder %s7303_s21, %s8861_s5 }
  0x7a   :  { %p7309_p8 = pnand %p7307_p7, %p7304_p6 }
  0x7c   :  { %7312 = shalt.err (!%p7309_p8)
}
  0x7d   :  { %s7313_s2 = scalar_lea.vmem %s86_s13, 8192  ;;  %p7318_p10 = scmp.lt.s32.totalorder %s86_s13, %s86_s13 }
  0x7e   :  { %p7314_p9 = scmp.ne.s32.totalorder %s86_s13, %s7313_s2  ;;  %p7319_p11 = scmp.lt.s32.totalorder %s7313_s2, %s7313_s2 }
  0x80   :  { %p7320_p12 = por %p7319_p11, %p7318_p10 }
  0x82   :  { %p7321_p13 = pnand %p7320_p12, %p7314_p9 }
  0x84   :  { %7324 = shalt.err (!%p7321_p13)
}
  0x85   :  { %91 = dma.hbm_to_vmem [thread:$0]  %s8861_s5, 8192, %s86_s13, [#allocation13], %s8882_s0, %s8882_s0, %s7405_s22  }
  0x86   :  { %s7325_s20 = scalar_lea.hbm %s8867_s11, 2048 }
  0x87   :  { %p7326_p0 = scmp.ne.s32.totalorder %s8867_s11, %s7325_s20  ;;  %p7329_p1 = scmp.lt.u32.totalorder %s7325_s20, %s8867_s11 }
  0x89   :  { %p7331_p2 = pnand %p7329_p1, %p7326_p0 }
  0x8b   :  { %7334 = shalt.err (!%p7331_p2)
}
  0x8c   :  { %s7335_s23 = scalar_lea.vmem %s7618_s9, 2048  ;;  %p7340_p4 = scmp.lt.s32.totalorder %s7618_s9, %s7618_s9 }
  0x8d   :  { %p7336_p3 = scmp.ne.s32.totalorder %s7618_s9, %s7335_s23  ;;  %p7341_p5 = scmp.lt.s32.totalorder %s7335_s23, %s7335_s23 }
  0x8f   :  { %p7342_p6 = por %p7341_p5, %p7340_p4 }
  0x91   :  { %p7343_p7 = pnand %p7342_p6, %p7336_p3 }
  0x93   :  { %7346 = shalt.err (!%p7343_p7)
}
  0x94   :  { %123 = dma.hbm_to_vmem [thread:$0]  %s8867_s11, 2048, %s7618_s9, [#allocation16], %s7409_s26, %s7409_s26, %s7410_s27  }
  0x95   :  { %s7415_s0 = smov [#allocation20]   ;;  %s7347_s19 = scalar_lea.hbm %s8871_s15, 2048 }
  0x96   :  { %s145_s13 = sshll.u32 %s7415_s0, 4  ;;  %p7348_p8 = scmp.ne.s32.totalorder %s8871_s15, %s7347_s19  ;;  %s146_s13 = int_to_ptr.vmem [resolvable:$true] %s145_s13 }
  0x97   :  { %p7351_p9 = scmp.lt.u32.totalorder %s7347_s19, %s8871_s15 }
  0x99   :  { %p7353_p10 = pnand %p7351_p9, %p7348_p8 }
  0x9b   :  { %7356 = shalt.err (!%p7353_p10)
}
  0x9c   :  { %s7357_s8 = scalar_lea.vmem %s146_s13, 2048  ;;  %p7362_p12 = scmp.lt.s32.totalorder %s146_s13, %s146_s13 }
  0x9d   :  { %p7358_p11 = scmp.ne.s32.totalorder %s146_s13, %s7357_s8  ;;  %p7363_p13 = scmp.lt.s32.totalorder %s7357_s8, %s7357_s8 }
  0x9f   :  { %p7364_p0 = por %p7363_p13, %p7362_p12 }
  0xa1   :  { %p7365_p1 = pnand %p7364_p0, %p7358_p11 }
  0xa3   :  { %7368 = shalt.err (!%p7365_p1)
}
  0xa4   :  { %151 = dma.hbm_to_vmem [thread:$0]  %s8871_s15, 2048, %s146_s13, [#allocation19], %s7409_s26, %s7409_s26, %s7410_s27  }
  0xa5   :  { %7391 = dma.done.wait [#allocation7], 1024  }
  0xa6   :  { %7392 = vsyncadd [#allocation7], 4294966272 }
  0xa7   :  { %7393 = dma.done.wait [#allocation10], 9216  }
  0xa8   :  { %7394 = vsyncadd [#allocation10], 4294958080 }
  0xa9   :  { %7395 = dma.done.wait [#allocation13], 16384  }
  0xaa   :  { %7396 = vsyncadd [#allocation13], 4294950912 }
  0xab   :  { %7397 = dma.done.wait [#allocation16], 4096  }
  0xac   :  { %7398 = vsyncadd [#allocation16], 4294963200 }
  0xad   :  { %7399 = dma.done.wait [#allocation19], 4096  }
  0xae   :  { %7400 = vsyncadd [#allocation19], 4294963200  ;;  %v7416_v1 = vmov 0.0   ;;  %v190_v2 = vld [vmem:[#allocation9 + $0x8] sm:$0xff]  ;;  %v192_v4 = vld [vmem:[#allocation9 + $0x18] sm:$0xff]  ;;  %vm219_vm0 = vcmask 130048  }
  0xaf   :  { %308 = vmatprep.mubr.f32.mxu0 %v7416_v1  ;;  %421 = vmatprep.mubr.f32.mxu1 %v7416_v1  ;;  %v194_v3 = vld [vmem:[#allocation9 + $0x28] sm:$0xff]  ;;  %v196_v6 = vld [vmem:[#allocation9 + $0x38] sm:$0xff]  ;;  %v189_v7 = vld [vmem:[#allocation9] sm:$0xff]  ;;  %vm4753_vm1 = vcmask 7168   ;;  %vm7419_vm2 = vmmov 0   ;;  %s7420_s0 = smov [#allocation21]  }
  0xb0   :  { %v5552_v5 = vpack.c.bf16 %v194_v3, %v190_v2  ;;  %v193_v8 = vld [vmem:[#allocation9 + $0x20] sm:$0xff]  ;;  %v5556_v9 = vpack.c.bf16 %v196_v6, %v192_v4  ;;  %v191_v11 = vld [vmem:[#allocation9 + $0x10] sm:$0xff]  ;;  %v507_v15 = vld [vmem:[#allocation11 + $0x8] sm:$0xff]  ;;  %s5260_s13 = sshll.u32 %s7420_s0, 4  ;;  %s5261_s13 = int_to_ptr.vmem [resolvable:$true] %s5260_s13 }
  0xb1   :  { %v5554_v10 = vpack.c.bf16 %v193_v8, %v189_v7  ;;  %v195_v12 = vld [vmem:[#allocation9 + $0x30] sm:$0xff]  ;;  %v181_v13 = vld [vmem:[#allocation6] sm:$0xff]  ;;  %v511_v16 = vld [vmem:[#allocation11 + $0x28] sm:$0xff]  ;;  %p7374_p3 = scmp.lt.s32.totalorder %s5261_s13, %s5261_s13 }
  0xb2   :  { %5553 = vmatprep.subr.bf16.mxu0 %v5552_v5  ;;  %v5558_v14 = vpack.c.bf16 %v195_v12, %v191_v11  ;;  %v509_v17 = vld [vmem:[#allocation11 + $0x18] sm:$0xff]  ;;  %5557 = vmatprep.subr.bf16.mxu1 %v5556_v9  ;;  %v7672_v18 = vpack.c.bf16 %v511_v16, %v507_v15  ;;  %v506_v20 = vld [vmem:[#allocation11] sm:$0xff]  ;;  %v508_v24 = vld [vmem:[#allocation11 + $0x10] sm:$0xff] }
  0xb3   :  { %5555 = vmatpush1.bf16.msra.mxu0 %v5554_v10  ;;  %v513_v19 = vld [vmem:[#allocation11 + $0x38] sm:$0xff]  ;;  %v510_v21 = vld [vmem:[#allocation11 + $0x20] sm:$0xff]  ;;  %v512_v25 = vld [vmem:[#allocation11 + $0x30] sm:$0xff] }
  0xb4   :  { %5559 = vmatpush1.bf16.msra.mxu1 %v5558_v14  ;;  %v7674_v22 = vpack.c.bf16 %v513_v19, %v509_v17  ;;  %v7676_v23 = vpack.c.bf16 %v510_v21, %v506_v20  ;;  %5561 = vmatprep.subr.bf16.mxu0 %v7672_v18  ;;  %v7679_v26 = vpack.c.bf16 %v512_v25, %v508_v24  ;;  %v515_v27 = vld [vmem:[#allocation11 + $0x48] sm:$0xff]  ;;  %v517_v29 = vld [vmem:[#allocation11 + $0x58] sm:$0xff]  ;;  %v514_v32 = vld [vmem:[#allocation11 + $0x40] sm:$0xff] }
  0xb5   :  { %v519_v28 = vld [vmem:[#allocation11 + $0x68] sm:$0xff]  ;;  %v521_v31 = vld [vmem:[#allocation11 + $0x78] sm:$0xff]  ;;  %v518_v33 = vld [vmem:[#allocation11 + $0x60] sm:$0xff] }
  0xb6   :  { %5273 = vmatmul.mubr.msk.f32.vlgmr.msra.gmra.mrb[0].mxu0 %vm219_vm0, %v181_v13  ;;  %5593 = vmatprep.subr.bf16.mxu1 %v7674_v22  ;;  %v7683_v30 = vpack.c.bf16 %v519_v28, %v515_v27  ;;  %v182_v34 = vld [vmem:[#allocation6 + $0x8] sm:$0xff]  ;;  %v7687_v35 = vpack.c.bf16 %v521_v31, %v517_v29  ;;  %v7689_v36 = vpack.c.bf16 %v518_v33, %v514_v32  ;;  %v516_v37 = vld [vmem:[#allocation11 + $0x50] sm:$0xff]  ;;  %v525_v42 = vld [vmem:[#allocation11 + $0x98] sm:$0xff] }
  0xb7   :  { %5281 = vmatmul.mubr.msk.f32.vlgmr.msra.gmra.mrb[0].mxu1 %vm219_vm0, %v181_v13  ;;  %5563 = vmatpush1.bf16.msra.mxu0 %v7676_v23  ;;  %v520_v38 = vld [vmem:[#allocation11 + $0x70] sm:$0xff]  ;;  %v523_v40 = vld [vmem:[#allocation11 + $0x88] sm:$0xff]  ;;  %v529_v44 = vld [vmem:[#allocation11 + $0xb8] sm:$0xff] }
  0xb8   :  { %5595 = vmatpush1.bf16.msra.mxu1 %v7679_v26  ;;  %314 = vmatprep.mubr.f32.mxu0 %v7416_v1  ;;  %v7693_v39 = vpack.c.bf16 %v520_v38, %v516_v37  ;;  %v527_v41 = vld [vmem:[#allocation11 + $0xa8] sm:$0xff]  ;;  %v522_v45 = vld [vmem:[#allocation11 + $0x80] sm:$0xff]  ;;  %v183_v47 = vld [vmem:[#allocation6 + $0x10] sm:$0xff]  ;;  %v7701_v48 = vpack.c.bf16 %v529_v44, %v525_v42 }
  0xb9   :  { %427 = vmatprep.mubr.f32.mxu1 %v7416_v1  ;;  %5565 = vmatprep.subr.bf16.mxu0 %v7683_v30  ;;  %v7697_v43 = vpack.c.bf16 %v527_v41, %v523_v40  ;;  %v526_v46 = vld [vmem:[#allocation11 + $0xa0] sm:$0xff]  ;;  %v524_v49 = vld [vmem:[#allocation11 + $0x90] sm:$0xff]  ;;  %v531_v52 = vld [vmem:[#allocation11 + $0xc8] sm:$0xff] }
  0xba   :  { %5274 = vmatmul.mubr.msk.f32.gmra.mrb[2].mxu0 %vm219_vm0, %v182_v34  ;;  %5597 = vmatprep.subr.bf16.mxu1 %v7687_v35  ;;  %v528_v50 = vld [vmem:[#allocation11 + $0xb0] sm:$0xff]  ;;  %v7705_v51 = vpack.c.bf16 %v526_v46, %v522_v45  ;;  %v535_v53 = vld [vmem:[#allocation11 + $0xe8] sm:$0xff]  ;;  %v533_v54 = vld [vmem:[#allocation11 + $0xd8] sm:$0xff] }
  0xbb   :  { %5282 = vmatmul.mubr.msk.f32.gmra.mrb[2].mxu1 %vm219_vm0, %v182_v34  ;;  %5567 = vmatpush1.bf16.msra.mxu0 %v7689_v36  ;;  %v7709_v55 = vpack.c.bf16 %v528_v50, %v524_v49  ;;  %v537_v56 = vld [vmem:[#allocation11 + $0xf8] sm:$0xff]  ;;  %v530_v57 = vld [vmem:[#allocation11 + $0xc0] sm:$0xff]  ;;  %v7713_v59 = vpack.c.bf16 %v535_v53, %v531_v52  ;;  %v532_v60 = vld [vmem:[#allocation11 + $0xd0] sm:$0xff] }
  0xbc   :  { %5599 = vmatpush1.bf16.msra.mxu1 %v7693_v39  ;;  %320 = vmatprep.mubr.f32.mxu0 %v7416_v1  ;;  %v534_v58 = vld [vmem:[#allocation11 + $0xe0] sm:$0xff]  ;;  %v536_v61 = vld [vmem:[#allocation11 + $0xf0] sm:$0xff]  ;;  %v7717_v62 = vpack.c.bf16 %v537_v56, %v533_v54  ;;  %v539_v63 = vld [vmem:[#allocation11 + $0x108] sm:$0xff] }
  0xbd   :  { %433 = vmatprep.mubr.f32.mxu1 %v7416_v1  ;;  %5569 = vmatprep.subr.bf16.mxu0 %v7697_v43  ;;  %v543_v0 = vld [vmem:[#allocation11 + $0x128] sm:$0xff]  ;;  %v184_v2 = vld [vmem:[#allocation6 + $0x18] sm:$0xff]  ;;  %v7721_v3 = vpack.c.bf16 %v534_v58, %v530_v57  ;;  %v7725_v6 = vpack.c.bf16 %v536_v61, %v532_v60  ;;  %v538_v7 = vld [vmem:[#allocation11 + $0x100] sm:$0xff] }
  0xbe   :  { %5275 = vmatmul.mubr.msk.f32.gmra.mrb[4].mxu0 %vm219_vm0, %v183_v47  ;;  %5601 = vmatprep.subr.bf16.mxu1 %v7701_v48  ;;  %v541_v4 = vld [vmem:[#allocation11 + $0x118] sm:$0xff]  ;;  %v542_v8 = vld [vmem:[#allocation11 + $0x120] sm:$0xff]  ;;  %v7729_v9 = vpack.c.bf16 %v543_v0, %v539_v63  ;;  %v540_v10 = vld [vmem:[#allocation11 + $0x110] sm:$0xff] }
  0xbf   :  { %5283 = vmatmul.mubr.msk.f32.gmra.mrb[4].mxu1 %vm219_vm0, %v183_v47  ;;  %5571 = vmatpush1.bf16.msra.mxu0 %v7705_v51  ;;  %v545_v5 = vld [vmem:[#allocation11 + $0x138] sm:$0xff]  ;;  %v544_v11 = vld [vmem:[#allocation11 + $0x130] sm:$0xff]  ;;  %v547_v13 = vld [vmem:[#allocation11 + $0x148] sm:$0xff]  ;;  %v7737_v16 = vpack.c.bf16 %v542_v8, %v538_v7  ;;  %v199_v8 = vlaneseq }
  0xc0   :  { %5603 = vmatpush1.bf16.msra.mxu1 %v7709_v55  ;;  %326 = vmatprep.mubr.f32.mxu0 %v7416_v1  ;;  %v7733_v12 = vpack.c.bf16 %v545_v5, %v541_v4  ;;  %v551_v14 = vld [vmem:[#allocation11 + $0x168] sm:$0xff]  ;;  %v185_v15 = vld [vmem:[#allocation6 + $0x20] sm:$0xff]  ;;  %v549_v17 = vld [vmem:[#allocation11 + $0x158] sm:$0xff]  ;;  %v7741_v20 = vpack.c.bf16 %v544_v11, %v540_v10 }
  0xc1   :  { %439 = vmatprep.mubr.f32.mxu1 %v7416_v1  ;;  %5573 = vmatprep.subr.bf16.mxu0 %v7713_v59  ;;  %v553_v19 = vld [vmem:[#allocation11 + $0x178] sm:$0xff]  ;;  %v546_v21 = vld [vmem:[#allocation11 + $0x140] sm:$0xff]  ;;  %v7745_v25 = vpack.c.bf16 %v551_v14, %v547_v13  ;;  %v548_v27 = vld [vmem:[#allocation11 + $0x150] sm:$0xff]  ;;  %v7838_v10 = vshrl.u32 %v199_v8, 7 }
  0xc2   :  { %5276 = vmatmul.mubr.msk.f32.gmra.mrb[6].mxu0 %vm219_vm0, %v184_v2  ;;  %5605 = vmatprep.subr.bf16.mxu1 %v7717_v62  ;;  %v550_v24 = vld [vmem:[#allocation11 + $0x160] sm:$0xff]  ;;  %v552_v28 = vld [vmem:[#allocation11 + $0x170] sm:$0xff]  ;;  %v7749_v29 = vpack.c.bf16 %v553_v19, %v549_v17  ;;  %v555_v31 = vld [vmem:[#allocation11 + $0x188] sm:$0xff] }
  0xc3   :  { %5284 = vmatmul.mubr.msk.f32.gmra.mrb[6].mxu1 %vm219_vm0, %v184_v2  ;;  %5575 = vmatpush1.bf16.msra.mxu0 %v7721_v3  ;;  %v559_v32 = vld [vmem:[#allocation11 + $0x1a8] sm:$0xff]  ;;  %v7753_v34 = vpack.c.bf16 %v550_v24, %v546_v21  ;;  %v557_v37 = vld [vmem:[#allocation11 + $0x198] sm:$0xff]  ;;  %v7757_v40 = vpack.c.bf16 %v552_v28, %v548_v27  ;;  %v554_v41 = vld [vmem:[#allocation11 + $0x180] sm:$0xff]  ;;  %v201_v11 = vsub.s32 0, %v7838_v10  ;;  %v205_v14 = vsub.s32 1, %v7838_v10 }
  0xc4   :  { %5607 = vmatpush1.bf16.msra.mxu1 %v7725_v6  ;;  %332 = vmatprep.mubr.f32.mxu0 %v7416_v1  ;;  %v186_v33 = vld [vmem:[#allocation6 + $0x28] sm:$0xff]  ;;  %v561_v38 = vld [vmem:[#allocation11 + $0x1b8] sm:$0xff]  ;;  %v558_v42 = vld [vmem:[#allocation11 + $0x1a0] sm:$0xff]  ;;  %v7761_v44 = vpack.c.bf16 %v559_v32, %v555_v31  ;;  %v209_v17 = vsub.s32 2, %v7838_v10 }
  0xc5   :  { %445 = vmatprep.mubr.f32.mxu1 %v7416_v1  ;;  %5577 = vmatprep.subr.bf16.mxu0 %v7729_v9  ;;  %v556_v45 = vld [vmem:[#allocation11 + $0x190] sm:$0xff]  ;;  %v7765_v47 = vpack.c.bf16 %v561_v38, %v557_v37  ;;  %v563_v49 = vld [vmem:[#allocation11 + $0x1c8] sm:$0xff]  ;;  %v7769_v53 = vpack.c.bf16 %v558_v42, %v554_v41  ;;  %v565_v54 = vld [vmem:[#allocation11 + $0x1d8] sm:$0xff]  ;;  %v213_v37 = vsub.s32 3, %v7838_v10 }
  0xc6   :  { %5277 = vmatmul.mubr.msk.f32.gmra.mrb[8].mxu0 %vm219_vm0, %v185_v15  ;;  %5609 = vmatprep.subr.bf16.mxu1 %v7733_v12  ;;  %v560_v46 = vld [vmem:[#allocation11 + $0x1b0] sm:$0xff]  ;;  %v567_v50 = vld [vmem:[#allocation11 + $0x1e8] sm:$0xff]  ;;  %v569_v56 = vld [vmem:[#allocation11 + $0x1f8] sm:$0xff] }
  0xc7   :  { %5285 = vmatmul.mubr.msk.f32.gmra.mrb[8].mxu1 %vm219_vm0, %v185_v15  ;;  %5579 = vmatpush1.bf16.msra.mxu0 %v7737_v16  ;;  %v187_v52 = vld [vmem:[#allocation6 + $0x30] sm:$0xff]  ;;  %v7773_v57 = vpack.c.bf16 %v560_v46, %v556_v45  ;;  %v562_v58 = vld [vmem:[#allocation11 + $0x1c0] sm:$0xff]  ;;  %v7777_v61 = vpack.c.bf16 %v567_v50, %v563_v49  ;;  %v7781_v2 = vpack.c.bf16 %v569_v56, %v565_v54  ;;  %v188_v4 = vld [vmem:[#allocation6 + $0x38] sm:$0xff] }
  0xc8   :  { %5611 = vmatpush1.bf16.msra.mxu1 %v7741_v20  ;;  %338 = vmatprep.mubr.f32.mxu0 %v7416_v1  ;;  %v566_v60 = vld [vmem:[#allocation11 + $0x1e0] sm:$0xff]  ;;  %v564_v63 = vld [vmem:[#allocation11 + $0x1d0] sm:$0xff] }
  0xc9   :  { %451 = vmatprep.mubr.f32.mxu1 %v7416_v1  ;;  %5581 = vmatprep.subr.bf16.mxu0 %v7745_v25  ;;  %v568_v0 = vld [vmem:[#allocation11 + $0x1f0] sm:$0xff]  ;;  %v7785_v5 = vpack.c.bf16 %v566_v60, %v562_v58  ;;  %v197_v13 = vld [vmem:[%s8859_s3] sm:$0xf] }
  0xca   :  { %5278 = vmatmul.mubr.msk.f32.gmra.mrb[10].mxu0 %vm219_vm0, %v186_v33  ;;  %5613 = vmatprep.subr.bf16.mxu1 %v7749_v29  ;;  %v7789_v7 = vpack.c.bf16 %v568_v0, %v564_v63  ;;  %v7847_v15 = vrot.slane %v197_v13, %v201_v11  ;;  %v7858_v32 = vrot.slane %v197_v13, %v209_v17 }
  0xcb   :  { %5286 = vmatmul.mubr.msk.f32.gmra.mrb[10].mxu1 %vm219_vm0, %v186_v33  ;;  %5583 = vmatpush1.bf16.msra.mxu0 %v7753_v34  ;;  %v7864_v41 = vrot.slane %v197_v13, %v213_v37 }
  0xcc   :  { %5615 = vmatpush1.bf16.msra.mxu1 %v7757_v40  ;;  %344 = vmatprep.mubr.f32.mxu0 %v7416_v1 }
  0xcd   :  { %457 = vmatprep.mubr.f32.mxu1 %v7416_v1  ;;  %5585 = vmatprep.subr.bf16.mxu0 %v7761_v44 }
  0xce   :  { %5279 = vmatmul.mubr.msk.f32.gmra.mrb[12].mxu0 %vm219_vm0, %v187_v52  ;;  %5617 = vmatprep.subr.bf16.mxu1 %v7765_v47 }
  0xcf   :  { %5287 = vmatmul.mubr.msk.f32.gmra.mrb[12].mxu1 %vm219_vm0, %v187_v52  ;;  %5587 = vmatpush1.bf16.msra.mxu0 %v7769_v53 }
  0xd0   :  { %5619 = vmatpush1.bf16.msra.mxu1 %v7773_v57  ;;  %350 = vmatprep.mubr.f32.mxu0 %v7416_v1 }
  0xd1   :  { %463 = vmatprep.mubr.f32.mxu1 %v7416_v1  ;;  %5589 = vmatprep.subr.bf16.mxu0 %v7777_v61 }
  0xd2   :  { %5280 = vmatmul.mubr.msk.f32.gmra.mrb[14].mxu0 %vm219_vm0, %v188_v4  ;;  %5621 = vmatprep.subr.bf16.mxu1 %v7781_v2 }
  0xd3   :  { %5288 = vmatmul.mubr.msk.f32.gmra.mrb[14].mxu1 %vm219_vm0, %v188_v4  ;;  %5591 = vmatpush1.bf16.msra.mxu0 %v7785_v5 }
  0xd4   :  { %5623 = vmatpush1.bf16.msra.mxu1 %v7789_v7  ;;  %634 = vmatprep.mubr.f32.mxu0 %v7416_v1 }
  0xd5   :  { %705 = vmatprep.mubr.f32.mxu1 %v7416_v1  ;;  %5625 = vmatprep.subr.bf16.mxu0 %v7672_v18 }
  0xd6   :  { %635 = vmatmul.mubr.f32.vlgmr.msra.gmra.mrb[0].mxu0 %v7416_v1  ;;  %5657 = vmatprep.subr.bf16.mxu1 %v7674_v22 }
  0xd7   :  { %706 = vmatmul.mubr.f32.vlgmr.msra.gmra.mrb[0].mxu1 %v7416_v1  ;;  %5627 = vmatpush1.bf16.msra.mxu0 %v7676_v23 }
  0xd8   :  { %5659 = vmatpush1.bf16.msra.mxu1 %v7679_v26  ;;  %5629 = vmatprep.subr.bf16.mxu0 %v7683_v30 }
  0xd9   :  { %5661 = vmatprep.subr.bf16.mxu1 %v7687_v35  ;;  %874 = vmatprep.mubr.f32.mxu0 %v7416_v1 }
  0xda   :  { %945 = vmatprep.mubr.f32.mxu1 %v7416_v1 }
  0xdb   :  { %5631 = vmatpush1.bf16.msra.mxu0 %v7689_v36 }
  0xdc   :  { %5663 = vmatpush1.bf16.msra.mxu1 %v7693_v39  ;;  %5633 = vmatprep.subr.bf16.mxu0 %v7697_v43 }
  0xdd   :  { %5665 = vmatprep.subr.bf16.mxu1 %v7701_v48 }
  0xdf   :  { %5635 = vmatpush1.bf16.msra.mxu0 %v7705_v51 }
  0xe0   :  { %5667 = vmatpush1.bf16.msra.mxu1 %v7709_v55  ;;  %5637 = vmatprep.subr.bf16.mxu0 %v7713_v59 }
  0xe1   :  { %5669 = vmatprep.subr.bf16.mxu1 %v7717_v62 }
  0xe3   :  { %5639 = vmatpush1.bf16.msra.mxu0 %v7721_v3 }
  0xe4   :  { %5671 = vmatpush1.bf16.msra.mxu1 %v7725_v6  ;;  %5641 = vmatprep.subr.bf16.mxu0 %v7729_v9 }
  0xe5   :  { %5673 = vmatprep.subr.bf16.mxu1 %v7733_v12 }
  0xe7   :  { %5643 = vmatpush1.bf16.msra.mxu0 %v7737_v16 }
  0xe8   :  { %5675 = vmatpush1.bf16.msra.mxu1 %v7741_v20  ;;  %5645 = vmatprep.subr.bf16.mxu0 %v7745_v25 }
  0xe9   :  { %5677 = vmatprep.subr.bf16.mxu1 %v7749_v29 }
  0xeb   :  { %5647 = vmatpush1.bf16.msra.mxu0 %v7753_v34 }
  0xec   :  { %5679 = vmatpush1.bf16.msra.mxu1 %v7757_v40  ;;  %5649 = vmatprep.subr.bf16.mxu0 %v7761_v44 }
  0xed   :  { %5681 = vmatprep.subr.bf16.mxu1 %v7765_v47 }
  0xef   :  { %5651 = vmatpush1.bf16.msra.mxu0 %v7769_v53 }
  0xf0   :  { %5683 = vmatpush1.bf16.msra.mxu1 %v7773_v57  ;;  %5653 = vmatprep.subr.bf16.mxu0 %v7777_v61 }
  0xf1   :  { %5685 = vmatprep.subr.bf16.mxu1 %v7781_v2 }
  0xf3   :  { %5655 = vmatpush1.bf16.msra.mxu0 %v7785_v5 }
  0xf4   :  { %5687 = vmatpush1.bf16.msra.mxu1 %v7789_v7  ;;  %5689 = vmatprep.subr.bf16.mxu0 %v7672_v18  ;;  %v7851_v18 = vrot.slane %v197_v13, %v205_v14 }
  0xf5   :  { %5721 = vmatprep.subr.bf16.mxu1 %v7674_v22 }
 0x1a9   :  { %v636_v22 = vpop.f32.mrb[0].mxu0 }
 0x1aa   :  { %v6744_v19 = vadd.f32 %v636_v22, %v7847_v15  ;;  %v707_v21 = vpop.f32.mrb[0].mxu1  ;;  %v638_v24 = vpop.f32.mrb[1].mxu0 }
 0x1ab   :  { %v6745_v27 = vadd.f32 %v638_v24, %v7851_v18  ;;  %v709_v28 = vpop.f32.mrb[1].mxu1  ;;  %v6760_v38 = vadd.f32 %v707_v21, %v7858_v32 }
 0x1ac   :  { %v5289_v31 = vmul.f32 -1.442695, %v6744_v19  ;;  %v6761_v45 = vadd.f32 %v709_v28, %v7864_v41 }
 0x1ad   :  { %v5290_v33 = vmul.f32 -1.442695, %v6745_v27  ;;  %v5291_v42 = vmul.f32 -1.442695, %v6760_v38 }
 0x1ae   :  { %6892 = vpow2.f32 %v5289_v31 }
 0x1af   :  { %6894 = vpow2.f32 %v5290_v33 }
 0x1b0   :  { %6896 = vpow2.f32 %v5291_v42 }
 0x1b1   :  { %6898 = vtanh.f32 %v6761_v45 }
 0x1b8   :  { %v6893_v46 = vpop.eup %6892 }
 0x1b9   :  { %v725_v49 = vadd.f32 1.0, %v6893_v46  ;;  %v6895_v50 = vpop.eup %6894 }
 0x1ba   :  { %v726_v52 = vadd.f32 1.0, %v6895_v50  ;;  %v6897_v54 = vpop.eup %6896 }
 0x1bb   :  { %6900 = vrcp.f32 %v725_v49  ;;  %v6899_v56 = vpop.eup %6898  ;;  %v727_v0 = vadd.f32 1.0, %v6897_v54 }
 0x1bc   :  { %6902 = vrcp.f32 %v726_v52 }
 0x1bd   :  { %6904 = vrcp.f32 %v727_v0 }
 0x1c5   :  { %v6901_v58 = vpop.eup %6900 }
 0x1c6   :  { %v736_v60 = vmul.f32 %v6901_v58, %v6899_v56  ;;  %v6903_v63 = vpop.eup %6902 }
 0x1c7   :  { %v735_v4 = vmul.f32 0.0, %v6903_v63  ;;  %v6905_v13 = vpop.eup %6904 }
 0x1c9   :  { %v7867_v8 = vadd.f32 %v736_v60, %v735_v4 }
 0x1cb   :  { %6906 = vtanh.f32 %v7867_v8 }
 0x1d5   :  { %v6907_v22 = vpop.eup %6906 }
 0x1d6   :  { %v7870_v19 = vmul.f32 %v6907_v22, %v6905_v13  ;;  %v1229_v13 = vld [vmem:[#allocation11 + $0x8] sm:$0xff] }
 0x1d7   :  { %v1233_v22 = vld [vmem:[#allocation11 + $0x28] sm:$0xff] }
 0x1d8   :  { %875 = vmatmul.mubr.f32.vlgmr.msra.gmra.mrb[2].mxu0 %v7870_v19  ;;  %946 = vmatmul.mubr.f32.vlgmr.msra.gmra.mrb[2].mxu1 %v7870_v19 }
 0x1d9   :  { %5691 = vmatpush1.bf16.msra.mxu0 %v7676_v23  ;;  %5723 = vmatpush1.bf16.msra.mxu1 %v7679_v26 }
 0x1da   :  { %5693 = vmatprep.subr.bf16.mxu0 %v7683_v30  ;;  %5725 = vmatprep.subr.bf16.mxu1 %v7687_v35 }
 0x1db   :  { %1115 = vmatprep.mubr.f32.mxu0 %v7416_v1  ;;  %1186 = vmatprep.mubr.f32.mxu1 %v7416_v1 }
 0x1dd   :  { %5695 = vmatpush1.bf16.msra.mxu0 %v7689_v36  ;;  %5727 = vmatpush1.bf16.msra.mxu1 %v7693_v39 }
 0x1de   :  { %5697 = vmatprep.subr.bf16.mxu0 %v7697_v43  ;;  %5729 = vmatprep.subr.bf16.mxu1 %v7701_v48 }
 0x1e1   :  { %5699 = vmatpush1.bf16.msra.mxu0 %v7705_v51  ;;  %5731 = vmatpush1.bf16.msra.mxu1 %v7709_v55 }
 0x1e2   :  { %5701 = vmatprep.subr.bf16.mxu0 %v7713_v59  ;;  %5733 = vmatprep.subr.bf16.mxu1 %v7717_v62 }
 0x1e5   :  { %5703 = vmatpush1.bf16.msra.mxu0 %v7721_v3  ;;  %5735 = vmatpush1.bf16.msra.mxu1 %v7725_v6 }
 0x1e6   :  { %5705 = vmatprep.subr.bf16.mxu0 %v7729_v9  ;;  %5737 = vmatprep.subr.bf16.mxu1 %v7733_v12 }
 0x1e9   :  { %5707 = vmatpush1.bf16.msra.mxu0 %v7737_v16  ;;  %5739 = vmatpush1.bf16.msra.mxu1 %v7741_v20 }
 0x1ea   :  { %5709 = vmatprep.subr.bf16.mxu0 %v7745_v25  ;;  %5741 = vmatprep.subr.bf16.mxu1 %v7749_v29 }
 0x1ed   :  { %5711 = vmatpush1.bf16.msra.mxu0 %v7753_v34  ;;  %5743 = vmatpush1.bf16.msra.mxu1 %v7757_v40 }
 0x1ee   :  { %5713 = vmatprep.subr.bf16.mxu0 %v7761_v44  ;;  %5745 = vmatprep.subr.bf16.mxu1 %v7765_v47 }
 0x1f1   :  { %5715 = vmatpush1.bf16.msra.mxu0 %v7769_v53  ;;  %5747 = vmatpush1.bf16.msra.mxu1 %v7773_v57 }
 0x1f2   :  { %5717 = vmatprep.subr.bf16.mxu0 %v7777_v61  ;;  %5749 = vmatprep.subr.bf16.mxu1 %v7781_v2 }
 0x1f5   :  { %5719 = vmatpush1.bf16.msra.mxu0 %v7785_v5  ;;  %5751 = vmatpush1.bf16.msra.mxu1 %v7789_v7 }
 0x2ab   :  { %v876_v23 = vpop.f32.mrb[2].mxu0  ;;  %v947_v26 = vpop.f32.mrb[2].mxu1 }
 0x2ac   :  { %v6746_v30 = vadd.f32 %v876_v23, %v7847_v15  ;;  %v878_v35 = vpop.f32.mrb[3].mxu0  ;;  %v949_v36 = vpop.f32.mrb[3].mxu1  ;;  %v6762_v27 = vadd.f32 %v947_v26, %v7858_v32  ;;  %v7920_v23 = vpack.c.bf16 %v1233_v22, %v1229_v13  ;;  %v1235_v26 = vld [vmem:[#allocation11 + $0x38] sm:$0xff] }
 0x2ad   :  { %v6747_v39 = vadd.f32 %v878_v35, %v7851_v18  ;;  %v6763_v28 = vadd.f32 %v949_v36, %v7864_v41  ;;  %v1232_v35 = vld [vmem:[#allocation11 + $0x20] sm:$0xff]  ;;  %v1488_v13 = vld [vmem:[#allocation11 + $0x98] sm:$0xff] }
 0x2ae   :  { %v5292_v21 = vmul.f32 -1.442695, %v6746_v30  ;;  %v5294_v31 = vmul.f32 -1.442695, %v6762_v27  ;;  %v1228_v30 = vld [vmem:[#allocation11] sm:$0xff]  ;;  %5753 = vmatprep.subr.bf16.mxu0 %v7920_v23 }
 0x2af   :  { %v5293_v24 = vmul.f32 -1.442695, %v6747_v39  ;;  %v7924_v39 = vpack.c.bf16 %v1232_v35, %v1228_v30  ;;  %v1489_v30 = vld [vmem:[#allocation11 + $0xa0] sm:$0xff] }
 0x2b0   :  { %6908 = vpow2.f32 %v5292_v21  ;;  %v1230_v21 = vld [vmem:[#allocation11 + $0x10] sm:$0xff] }
 0x2b1   :  { %6910 = vpow2.f32 %v5293_v24  ;;  %v1234_v24 = vld [vmem:[#allocation11 + $0x30] sm:$0xff] }
 0x2b2   :  { %6912 = vtanh.f32 %v6763_v28  ;;  %v7927_v27 = vpack.c.bf16 %v1234_v24, %v1230_v21  ;;  %v1237_v28 = vld [vmem:[#allocation11 + $0x48] sm:$0xff]  ;;  %v1487_v24 = vld [vmem:[#allocation11 + $0x90] sm:$0xff] }
 0x2b3   :  { %6914 = vpow2.f32 %v5294_v31  ;;  %v1241_v31 = vld [vmem:[#allocation11 + $0x68] sm:$0xff] }
 0x2ba   :  { %v6909_v33 = vpop.eup %6908 }
 0x2bb   :  { %v965_v38 = vadd.f32 1.0, %v6909_v33  ;;  %v6911_v42 = vpop.eup %6910  ;;  %v1239_v33 = vld [vmem:[#allocation11 + $0x58] sm:$0xff] }
 0x2bc   :  { %v966_v45 = vadd.f32 1.0, %v6911_v42  ;;  %v6913_v46 = vpop.eup %6912  ;;  %v1243_v42 = vld [vmem:[#allocation11 + $0x78] sm:$0xff] }
 0x2bd   :  { %6916 = vrcp.f32 %v965_v38  ;;  %v6915_v49 = vpop.eup %6914  ;;  %v7932_v38 = vpack.c.bf16 %v1241_v31, %v1237_v28  ;;  %v1491_v28 = vld [vmem:[#allocation11 + $0xb0] sm:$0xff] }
 0x2be   :  { %6918 = vrcp.f32 %v966_v45  ;;  %v967_v56 = vadd.f32 1.0, %v6915_v49  ;;  %v1236_v45 = vld [vmem:[#allocation11 + $0x40] sm:$0xff]  ;;  %v7934_v49 = vpack.c.bf16 %v1243_v42, %v1239_v33  ;;  %v7997_v31 = vpack.c.bf16 %v1491_v28, %v1487_v24  ;;  %v1494_v33 = vld [vmem:[#allocation11 + $0xc8] sm:$0xff] }
 0x2bf   :  { %v1498_v42 = vld [vmem:[#allocation11 + $0xe8] sm:$0xff] }
 0x2c0   :  { %6920 = vrcp.f32 %v967_v56  ;;  %v1522_v28 = vld [vmem:[#allocation11 + $0x1a8] sm:$0xff] }
 0x2c7   :  { %v6917_v50 = vpop.eup %6916 }
 0x2c8   :  { %v976_v52 = vmul.f32 %v6917_v50, %v6913_v46  ;;  %v6919_v54 = vpop.eup %6918  ;;  %v1240_v46 = vld [vmem:[#allocation11 + $0x60] sm:$0xff] }
 0x2c9   :  { %v975_v58 = vmul.f32 %v6919_v54, %v7867_v8  ;;  %v1231_v8 = vld [vmem:[#allocation11 + $0x18] sm:$0xff]  ;;  %v7936_v50 = vpack.c.bf16 %v1240_v46, %v1236_v45  ;;  %v1242_v54 = vld [vmem:[#allocation11 + $0x70] sm:$0xff]  ;;  %v8002_v46 = vpack.c.bf16 %v1498_v42, %v1494_v33 }
 0x2ca   :  { %v6921_v63 = vpop.eup %6920  ;;  %v7922_v36 = vpack.c.bf16 %v1235_v26, %v1231_v8  ;;  %v1492_v8 = vld [vmem:[#allocation11 + $0xb8] sm:$0xff]  ;;  %v1485_v26 = vld [vmem:[#allocation11 + $0x80] sm:$0xff] }
 0x2cb   :  { %v7911_v60 = vadd.f32 %v976_v52, %v975_v58  ;;  %v1238_v52 = vld [vmem:[#allocation11 + $0x50] sm:$0xff]  ;;  %v7992_v35 = vpack.c.bf16 %v1492_v8, %v1488_v13  ;;  %v7994_v21 = vpack.c.bf16 %v1489_v30, %v1485_v26  ;;  %v1496_v45 = vld [vmem:[#allocation11 + $0xd8] sm:$0xff]  ;;  %v1518_v30 = vld [vmem:[#allocation11 + $0x188] sm:$0xff] }
 0x2cc   :  { %5785 = vmatprep.subr.bf16.mxu1 %v7922_v36  ;;  %v7939_v56 = vpack.c.bf16 %v1242_v54, %v1238_v52  ;;  %v1500_v52 = vld [vmem:[#allocation11 + $0xf8] sm:$0xff]  ;;  %v1493_v54 = vld [vmem:[#allocation11 + $0xc0] sm:$0xff]  ;;  %v1511_v8 = vld [vmem:[#allocation11 + $0x150] sm:$0xff] }
 0x2cd   :  { %6922 = vtanh.f32 %v7911_v60  ;;  %v1515_v26 = vld [vmem:[#allocation11 + $0x170] sm:$0xff]  ;;  %v1520_v33 = vld [vmem:[#allocation11 + $0x198] sm:$0xff] }
 0x2ce   :  { %v8033_v24 = vpack.c.bf16 %v1515_v26, %v1511_v8  ;;  %v1524_v42 = vld [vmem:[#allocation11 + $0x1b8] sm:$0xff] }
 0x2d7   :  { %v6923_v0 = vpop.eup %6922 }
 0x2d8   :  { %v7914_v4 = vmul.f32 %v6923_v0, %v6921_v63  ;;  %v1490_v0 = vld [vmem:[#allocation11 + $0xa8] sm:$0xff] }
 0x2da   :  { %1116 = vmatmul.mubr.f32.vlgmr.msra.gmra.mrb[4].mxu0 %v7914_v4  ;;  %1187 = vmatmul.mubr.f32.vlgmr.msra.gmra.mrb[4].mxu1 %v7914_v4 }
 0x2db   :  { %1356 = vmatprep.mubr.f32.mxu0 %v7416_v1  ;;  %1427 = vmatprep.mubr.f32.mxu1 %v7416_v1 }
 0x2dc   :  { %5755 = vmatpush1.bf16.msra.mxu0 %v7924_v39  ;;  %5787 = vmatpush1.bf16.msra.mxu1 %v7927_v27 }
 0x2dd   :  { %5757 = vmatprep.subr.bf16.mxu0 %v7932_v38  ;;  %5789 = vmatprep.subr.bf16.mxu1 %v7934_v49 }
 0x2e0   :  { %5759 = vmatpush1.bf16.msra.mxu0 %v7936_v50  ;;  %5791 = vmatpush1.bf16.msra.mxu1 %v7939_v56 }
 0x2e1   :  { %5761 = vmatprep.subr.bf16.mxu0 %v7697_v43  ;;  %5793 = vmatprep.subr.bf16.mxu1 %v7701_v48 }
 0x2e4   :  { %5763 = vmatpush1.bf16.msra.mxu0 %v7705_v51  ;;  %5795 = vmatpush1.bf16.msra.mxu1 %v7709_v55 }
 0x2e5   :  { %5765 = vmatprep.subr.bf16.mxu0 %v7713_v59  ;;  %5797 = vmatprep.subr.bf16.mxu1 %v7717_v62 }
 0x2e8   :  { %5767 = vmatpush1.bf16.msra.mxu0 %v7721_v3  ;;  %5799 = vmatpush1.bf16.msra.mxu1 %v7725_v6 }
 0x2e9   :  { %5769 = vmatprep.subr.bf16.mxu0 %v7729_v9  ;;  %5801 = vmatprep.subr.bf16.mxu1 %v7733_v12 }
 0x2ec   :  { %5771 = vmatpush1.bf16.msra.mxu0 %v7737_v16  ;;  %5803 = vmatpush1.bf16.msra.mxu1 %v7741_v20 }
 0x2ed   :  { %5773 = vmatprep.subr.bf16.mxu0 %v7745_v25  ;;  %5805 = vmatprep.subr.bf16.mxu1 %v7749_v29 }
 0x2f0   :  { %5775 = vmatpush1.bf16.msra.mxu0 %v7753_v34  ;;  %5807 = vmatpush1.bf16.msra.mxu1 %v7757_v40 }
 0x2f1   :  { %5777 = vmatprep.subr.bf16.mxu0 %v7761_v44  ;;  %5809 = vmatprep.subr.bf16.mxu1 %v7765_v47 }
 0x2f4   :  { %5779 = vmatpush1.bf16.msra.mxu0 %v7769_v53  ;;  %5811 = vmatpush1.bf16.msra.mxu1 %v7773_v57 }
 0x2f5   :  { %5781 = vmatprep.subr.bf16.mxu0 %v7777_v61  ;;  %5813 = vmatprep.subr.bf16.mxu1 %v7781_v2 }
 0x2f8   :  { %5783 = vmatpush1.bf16.msra.mxu0 %v7785_v5  ;;  %5815 = vmatpush1.bf16.msra.mxu1 %v7789_v7 }
 0x2f9   :  { %5817 = vmatprep.subr.bf16.mxu0 %v7920_v23  ;;  %5849 = vmatprep.subr.bf16.mxu1 %v7922_v36 }
 0x3ad   :  { %v1117_v43 = vpop.f32.mrb[4].mxu0  ;;  %v1188_v48 = vpop.f32.mrb[4].mxu1 }
 0x3ae   :  { %v6748_v51 = vadd.f32 %v1117_v43, %v7847_v15  ;;  %v1119_v55 = vpop.f32.mrb[5].mxu0  ;;  %v1190_v59 = vpop.f32.mrb[5].mxu1  ;;  %v6764_v9 = vadd.f32 %v1188_v48, %v7858_v32  ;;  %v1497_v43 = vld [vmem:[#allocation11 + $0xe0] sm:$0xff]  ;;  %v8004_v48 = vpack.c.bf16 %v1500_v52, %v1496_v45  ;;  %v8037_v45 = vpack.c.bf16 %v1522_v28, %v1518_v30 }
 0x3af   :  { %v6749_v62 = vadd.f32 %v1119_v55, %v7851_v18  ;;  %v6765_v12 = vadd.f32 %v1190_v59, %v7864_v41  ;;  %v1495_v55 = vld [vmem:[#allocation11 + $0xd0] sm:$0xff]  ;;  %v8039_v52 = vpack.c.bf16 %v1524_v42, %v1520_v33 }
 0x3b0   :  { %v5295_v3 = vmul.f32 -1.442695, %v6748_v51  ;;  %v5297_v16 = vmul.f32 -1.442695, %v6764_v9  ;;  %v8006_v51 = vpack.c.bf16 %v1497_v43, %v1493_v54  ;;  %v1499_v59 = vld [vmem:[#allocation11 + $0xf0] sm:$0xff]  ;;  %v1504_v9 = vld [vmem:[#allocation11 + $0x118] sm:$0xff] }
 0x3b1   :  { %v5296_v6 = vmul.f32 -1.442695, %v6749_v62  ;;  %v8009_v62 = vpack.c.bf16 %v1499_v59, %v1495_v55  ;;  %v1517_v54 = vld [vmem:[#allocation11 + $0x180] sm:$0xff]  ;;  %v1519_v55 = vld [vmem:[#allocation11 + $0x190] sm:$0xff] }
 0x3b2   :  { %6924 = vpow2.f32 %v5295_v3  ;;  %v1502_v3 = vld [vmem:[#allocation11 + $0x108] sm:$0xff]  ;;  %v1521_v43 = vld [vmem:[#allocation11 + $0x1a0] sm:$0xff] }
 0x3b3   :  { %6926 = vpow2.f32 %v5296_v6  ;;  %v1506_v6 = vld [vmem:[#allocation11 + $0x128] sm:$0xff]  ;;  %v8042_v59 = vpack.c.bf16 %v1521_v43, %v1517_v54 }
 0x3b4   :  { %6928 = vtanh.f32 %v6765_v12  ;;  %v8014_v12 = vpack.c.bf16 %v1506_v6, %v1502_v3  ;;  %v1523_v3 = vld [vmem:[#allocation11 + $0x1b0] sm:$0xff]  ;;  %v1526_v6 = vld [vmem:[#allocation11 + $0x1c8] sm:$0xff] }
 0x3b5   :  { %6930 = vpow2.f32 %v5297_v16  ;;  %v1508_v16 = vld [vmem:[#allocation11 + $0x138] sm:$0xff] }
 0x3bc   :  { %v6925_v20 = vpop.eup %6924 }
 0x3bd   :  { %v1206_v25 = vadd.f32 1.0, %v6925_v20  ;;  %v6927_v29 = vpop.eup %6926  ;;  %v1501_v20 = vld [vmem:[#allocation11 + $0x100] sm:$0xff] }
 0x3be   :  { %v1207_v34 = vadd.f32 1.0, %v6927_v29  ;;  %v6929_v40 = vpop.eup %6928  ;;  %v8016_v29 = vpack.c.bf16 %v1508_v16, %v1504_v9  ;;  %v1530_v9 = vld [vmem:[#allocation11 + $0x1e8] sm:$0xff]  ;;  %v8046_v16 = vpack.c.bf16 %v1523_v3, %v1519_v55 }
 0x3bf   :  { %6932 = vrcp.f32 %v1206_v25  ;;  %v6931_v44 = vpop.eup %6930  ;;  %v1505_v25 = vld [vmem:[#allocation11 + $0x120] sm:$0xff] }
 0x3c0   :  { %6934 = vrcp.f32 %v1207_v34  ;;  %v1208_v61 = vadd.f32 1.0, %v6931_v44  ;;  %v8018_v34 = vpack.c.bf16 %v1505_v25, %v1501_v20  ;;  %v1507_v44 = vld [vmem:[#allocation11 + $0x130] sm:$0xff]  ;;  %v8048_v20 = vpack.c.bf16 %v1530_v9, %v1526_v6  ;;  %v1528_v25 = vld [vmem:[#allocation11 + $0x1d8] sm:$0xff] }
 0x3c2   :  { %6936 = vrcp.f32 %v1208_v61  ;;  %v1512_v61 = vld [vmem:[#allocation11 + $0x158] sm:$0xff] }
 0x3c9   :  { %v6933_v47 = vpop.eup %6932 }
 0x3ca   :  { %v1217_v53 = vmul.f32 %v6933_v47, %v6929_v40  ;;  %v6935_v57 = vpop.eup %6934  ;;  %v1503_v40 = vld [vmem:[#allocation11 + $0x110] sm:$0xff] }
 0x3cb   :  { %v1216_v2 = vmul.f32 %v6935_v57, %v7911_v60  ;;  %v1486_v60 = vld [vmem:[#allocation11 + $0x88] sm:$0xff]  ;;  %v8021_v47 = vpack.c.bf16 %v1507_v44, %v1503_v40  ;;  %v1532_v40 = vld [vmem:[#allocation11 + $0x1f8] sm:$0xff]  ;;  %v1525_v44 = vld [vmem:[#allocation11 + $0x1c0] sm:$0xff] }
 0x3cc   :  { %v6937_v7 = vpop.eup %6936  ;;  %v7990_v22 = vpack.c.bf16 %v1490_v0, %v1486_v60  ;;  %v1514_v57 = vld [vmem:[#allocation11 + $0x168] sm:$0xff]  ;;  %v1513_v60 = vld [vmem:[#allocation11 + $0x160] sm:$0xff] }
 0x3cd   :  { %v7975_v5 = vadd.f32 %v1217_v53, %v1216_v2  ;;  %v1510_v53 = vld [vmem:[#allocation11 + $0x148] sm:$0xff] }
 0x3ce   :  { %v8026_v2 = vpack.c.bf16 %v1514_v57, %v1510_v53  ;;  %v8050_v53 = vpack.c.bf16 %v1532_v40, %v1528_v25  ;;  %v1529_v57 = vld [vmem:[#allocation11 + $0x1e0] sm:$0xff] }
 0x3cf   :  { %6938 = vtanh.f32 %v7975_v5 }
 0x3d9   :  { %v6939_v58 = vpop.eup %6938 }
 0x3da   :  { %v7978_v63 = vmul.f32 %v6939_v58, %v6937_v7  ;;  %v1516_v7 = vld [vmem:[#allocation11 + $0x178] sm:$0xff]  ;;  %v1509_v58 = vld [vmem:[#allocation11 + $0x140] sm:$0xff] }
 0x3db   :  { %v8028_v0 = vpack.c.bf16 %v1516_v7, %v1512_v61  ;;  %v8030_v13 = vpack.c.bf16 %v1513_v60, %v1509_v58  ;;  %v1527_v61 = vld [vmem:[#allocation11 + $0x1d0] sm:$0xff]  ;;  %v8053_v58 = vpack.c.bf16 %v1529_v57, %v1525_v44 }
 0x3dc   :  { %1357 = vmatmul.mubr.f32.vlgmr.msra.gmra.mrb[6].mxu0 %v7978_v63  ;;  %1428 = vmatmul.mubr.f32.vlgmr.msra.gmra.mrb[6].mxu1 %v7978_v63  ;;  %v1531_v7 = vld [vmem:[#allocation11 + $0x1f0] sm:$0xff] }
 0x3dd   :  { %5819 = vmatpush1.bf16.msra.mxu0 %v7924_v39  ;;  %5851 = vmatpush1.bf16.msra.mxu1 %v7927_v27  ;;  %v8057_v60 = vpack.c.bf16 %v1531_v7, %v1527_v61 }
 0x3de   :  { %5821 = vmatprep.subr.bf16.mxu0 %v7932_v38  ;;  %5853 = vmatprep.subr.bf16.mxu1 %v7934_v49 }
 0x3df   :  { %1597 = vmatprep.mubr.f32.mxu0 %v7416_v1  ;;  %1668 = vmatprep.mubr.f32.mxu1 %v7416_v1 }
 0x3e1   :  { %5823 = vmatpush1.bf16.msra.mxu0 %v7936_v50  ;;  %5855 = vmatpush1.bf16.msra.mxu1 %v7939_v56 }
 0x3e2   :  { %5825 = vmatprep.subr.bf16.mxu0 %v7990_v22  ;;  %5857 = vmatprep.subr.bf16.mxu1 %v7992_v35 }
 0x3e5   :  { %5827 = vmatpush1.bf16.msra.mxu0 %v7994_v21  ;;  %5859 = vmatpush1.bf16.msra.mxu1 %v7997_v31 }
 0x3e6   :  { %5829 = vmatprep.subr.bf16.mxu0 %v8002_v46  ;;  %5861 = vmatprep.subr.bf16.mxu1 %v8004_v48 }
 0x3e9   :  { %5831 = vmatpush1.bf16.msra.mxu0 %v8006_v51  ;;  %5863 = vmatpush1.bf16.msra.mxu1 %v8009_v62 }
 0x3ea   :  { %5833 = vmatprep.subr.bf16.mxu0 %v8014_v12  ;;  %5865 = vmatprep.subr.bf16.mxu1 %v8016_v29 }
 0x3ed   :  { %5835 = vmatpush1.bf16.msra.mxu0 %v8018_v34  ;;  %5867 = vmatpush1.bf16.msra.mxu1 %v8021_v47 }
 0x3ee   :  { %5837 = vmatprep.subr.bf16.mxu0 %v8026_v2  ;;  %5869 = vmatprep.subr.bf16.mxu1 %v8028_v0 }
 0x3f1   :  { %5839 = vmatpush1.bf16.msra.mxu0 %v8030_v13  ;;  %5871 = vmatpush1.bf16.msra.mxu1 %v8033_v24 }
 0x3f2   :  { %5841 = vmatprep.subr.bf16.mxu0 %v8037_v45  ;;  %5873 = vmatprep.subr.bf16.mxu1 %v8039_v52 }
 0x3f5   :  { %5843 = vmatpush1.bf16.msra.mxu0 %v8042_v59  ;;  %5875 = vmatpush1.bf16.msra.mxu1 %v8046_v16 }
 0x3f6   :  { %5845 = vmatprep.subr.bf16.mxu0 %v8048_v20  ;;  %5877 = vmatprep.subr.bf16.mxu1 %v8050_v53 }
 0x3f9   :  { %5847 = vmatpush1.bf16.msra.mxu0 %v8053_v58  ;;  %5879 = vmatpush1.bf16.msra.mxu1 %v8057_v60 }
 0x3fa   :  { %5881 = vmatprep.subr.bf16.mxu0 %v7920_v23  ;;  %5913 = vmatprep.subr.bf16.mxu1 %v7922_v36 }
 0x4af   :  { %v1358_v8 = vpop.f32.mrb[6].mxu0  ;;  %v1429_v26 = vpop.f32.mrb[6].mxu1 }
 0x4b0   :  { %v6750_v30 = vadd.f32 %v1358_v8, %v7847_v15  ;;  %v1360_v28 = vpop.f32.mrb[7].mxu0  ;;  %v1431_v33 = vpop.f32.mrb[7].mxu1  ;;  %v6766_v55 = vadd.f32 %v1429_v26, %v7858_v32 }
 0x4b1   :  { %v6751_v42 = vadd.f32 %v1360_v28, %v7851_v18  ;;  %v6767_v3 = vadd.f32 %v1431_v33, %v7864_v41 }
 0x4b2   :  { %v5298_v54 = vmul.f32 -1.442695, %v6750_v30  ;;  %v5300_v6 = vmul.f32 -1.442695, %v6766_v55 }
 0x4b3   :  { %v5299_v43 = vmul.f32 -1.442695, %v6751_v42 }
 0x4b4   :  { %6940 = vpow2.f32 %v5298_v54 }
 0x4b5   :  { %6942 = vpow2.f32 %v5299_v43 }
 0x4b6   :  { %6944 = vtanh.f32 %v6767_v3 }
 0x4b7   :  { %6946 = vpow2.f32 %v5300_v6 }
 0x4be   :  { %v6941_v9 = vpop.eup %6940 }
 0x4bf   :  { %v1447_v25 = vadd.f32 1.0, %v6941_v9  ;;  %v6943_v40 = vpop.eup %6942 }
 0x4c0   :  { %v1448_v44 = vadd.f32 1.0, %v6943_v40  ;;  %v6945_v57 = vpop.eup %6944 }
 0x4c1   :  { %6948 = vrcp.f32 %v1447_v25  ;;  %v6947_v61 = vpop.eup %6946 }
 0x4c2   :  { %6950 = vrcp.f32 %v1448_v44  ;;  %v1449_v28 = vadd.f32 1.0, %v6947_v61 }
 0x4c4   :  { %6952 = vrcp.f32 %v1449_v28 }
 0x4cb   :  { %v6949_v7 = vpop.eup %6948 }
 0x4cc   :  { %v1458_v8 = vmul.f32 %v6949_v7, %v6945_v57  ;;  %v6951_v30 = vpop.eup %6950 }
 0x4cd   :  { %v1457_v42 = vmul.f32 %v6951_v30, %v7975_v5 }
 0x4ce   :  { %v6953_v33 = vpop.eup %6952 }
 0x4cf   :  { %v8069_v26 = vadd.f32 %v1458_v8, %v1457_v42 }
 0x4d1   :  { %6954 = vtanh.f32 %v8069_v26 }
 0x4db   :  { %v6955_v54 = vpop.eup %6954 }
 0x4dc   :  { %v8072_v43 = vmul.f32 %v6955_v54, %v6953_v33 }
 0x4de   :  { %1598 = vmatmul.mubr.f32.vlgmr.msra.gmra.mrb[8].mxu0 %v8072_v43  ;;  %1669 = vmatmul.mubr.f32.vlgmr.msra.gmra.mrb[8].mxu1 %v8072_v43 }
 0x4df   :  { %5883 = vmatpush1.bf16.msra.mxu0 %v7924_v39  ;;  %5915 = vmatpush1.bf16.msra.mxu1 %v7927_v27 }
 0x4e0   :  { %5885 = vmatprep.subr.bf16.mxu0 %v7932_v38  ;;  %5917 = vmatprep.subr.bf16.mxu1 %v7934_v49 }
 0x4e1   :  { %1838 = vmatprep.mubr.f32.mxu0 %v7416_v1  ;;  %1909 = vmatprep.mubr.f32.mxu1 %v7416_v1 }
 0x4e3   :  { %5887 = vmatpush1.bf16.msra.mxu0 %v7936_v50  ;;  %5919 = vmatpush1.bf16.msra.mxu1 %v7939_v56 }
 0x4e4   :  { %5889 = vmatprep.subr.bf16.mxu0 %v7990_v22  ;;  %5921 = vmatprep.subr.bf16.mxu1 %v7992_v35 }
 0x4e7   :  { %5891 = vmatpush1.bf16.msra.mxu0 %v7994_v21  ;;  %5923 = vmatpush1.bf16.msra.mxu1 %v7997_v31 }
 0x4e8   :  { %5893 = vmatprep.subr.bf16.mxu0 %v8002_v46  ;;  %5925 = vmatprep.subr.bf16.mxu1 %v8004_v48 }
 0x4eb   :  { %5895 = vmatpush1.bf16.msra.mxu0 %v8006_v51  ;;  %5927 = vmatpush1.bf16.msra.mxu1 %v8009_v62 }
 0x4ec   :  { %5897 = vmatprep.subr.bf16.mxu0 %v8014_v12  ;;  %5929 = vmatprep.subr.bf16.mxu1 %v8016_v29 }
 0x4ef   :  { %5899 = vmatpush1.bf16.msra.mxu0 %v8018_v34  ;;  %5931 = vmatpush1.bf16.msra.mxu1 %v8021_v47 }
 0x4f0   :  { %5901 = vmatprep.subr.bf16.mxu0 %v8026_v2  ;;  %5933 = vmatprep.subr.bf16.mxu1 %v8028_v0 }
 0x4f3   :  { %5903 = vmatpush1.bf16.msra.mxu0 %v8030_v13  ;;  %5935 = vmatpush1.bf16.msra.mxu1 %v8033_v24 }
 0x4f4   :  { %5905 = vmatprep.subr.bf16.mxu0 %v8037_v45  ;;  %5937 = vmatprep.subr.bf16.mxu1 %v8039_v52 }
 0x4f7   :  { %5907 = vmatpush1.bf16.msra.mxu0 %v8042_v59  ;;  %5939 = vmatpush1.bf16.msra.mxu1 %v8046_v16 }
 0x4f8   :  { %5909 = vmatprep.subr.bf16.mxu0 %v8048_v20  ;;  %5941 = vmatprep.subr.bf16.mxu1 %v8050_v53 }
 0x4fb   :  { %5911 = vmatpush1.bf16.msra.mxu0 %v8053_v58  ;;  %5943 = vmatpush1.bf16.msra.mxu1 %v8057_v60 }
 0x4fc   :  { %5945 = vmatprep.subr.bf16.mxu0 %v7920_v23  ;;  %5977 = vmatprep.subr.bf16.mxu1 %v7922_v36 }
 0x5b1   :  { %v1599_v5 = vpop.f32.mrb[8].mxu0  ;;  %v1670_v55 = vpop.f32.mrb[8].mxu1 }
 0x5b2   :  { %v6752_v3 = vadd.f32 %v1599_v5, %v7847_v15  ;;  %v1601_v6 = vpop.f32.mrb[9].mxu0  ;;  %v1672_v9 = vpop.f32.mrb[9].mxu1  ;;  %v6768_v57 = vadd.f32 %v1670_v55, %v7858_v32 }
 0x5b3   :  { %v6753_v25 = vadd.f32 %v1601_v6, %v7851_v18  ;;  %v6769_v61 = vadd.f32 %v1672_v9, %v7864_v41 }
 0x5b4   :  { %v5301_v40 = vmul.f32 -1.442695, %v6752_v3  ;;  %v5303_v7 = vmul.f32 -1.442695, %v6768_v57 }
 0x5b5   :  { %v5302_v44 = vmul.f32 -1.442695, %v6753_v25 }
 0x5b6   :  { %6956 = vpow2.f32 %v5301_v40 }
 0x5b7   :  { %6958 = vpow2.f32 %v5302_v44 }
 0x5b8   :  { %6960 = vtanh.f32 %v6769_v61 }
 0x5b9   :  { %6962 = vpow2.f32 %v5303_v7 }
 0x5c0   :  { %v6957_v23 = vpop.eup %6956 }
 0x5c1   :  { %v1688_v8 = vadd.f32 1.0, %v6957_v23  ;;  %v6959_v36 = vpop.eup %6958 }
 0x5c2   :  { %v1689_v30 = vadd.f32 1.0, %v6959_v36  ;;  %v6961_v28 = vpop.eup %6960 }
 0x5c3   :  { %6964 = vrcp.f32 %v1688_v8  ;;  %v6963_v42 = vpop.eup %6962 }
 0x5c4   :  { %6966 = vrcp.f32 %v1689_v30  ;;  %v1690_v3 = vadd.f32 1.0, %v6963_v42 }
 0x5c6   :  { %6968 = vrcp.f32 %v1690_v3 }
 0x5cd   :  { %v6965_v33 = vpop.eup %6964 }
 0x5ce   :  { %v1699_v54 = vmul.f32 %v6965_v33, %v6961_v28  ;;  %v6967_v5 = vpop.eup %6966 }
 0x5cf   :  { %v1698_v6 = vmul.f32 %v6967_v5, %v8069_v26 }
 0x5d0   :  { %v6969_v9 = vpop.eup %6968 }
 0x5d1   :  { %v8115_v55 = vadd.f32 %v1699_v54, %v1698_v6 }
 0x5d3   :  { %6970 = vtanh.f32 %v8115_v55 }
 0x5dd   :  { %v6971_v25 = vpop.eup %6970 }
 0x5de   :  { %v8118_v40 = vmul.f32 %v6971_v25, %v6969_v9 }
 0x5e0   :  { %1839 = vmatmul.mubr.f32.vlgmr.msra.gmra.mrb[10].mxu0 %v8118_v40  ;;  %1910 = vmatmul.mubr.f32.vlgmr.msra.gmra.mrb[10].mxu1 %v8118_v40 }
 0x5e1   :  { %5947 = vmatpush1.bf16.msra.mxu0 %v7924_v39  ;;  %5979 = vmatpush1.bf16.msra.mxu1 %v7927_v27 }
 0x5e2   :  { %5949 = vmatprep.subr.bf16.mxu0 %v7932_v38  ;;  %5981 = vmatprep.subr.bf16.mxu1 %v7934_v49 }
 0x5e3   :  { %2079 = vmatprep.mubr.f32.mxu0 %v7416_v1  ;;  %2150 = vmatprep.mubr.f32.mxu1 %v7416_v1 }
 0x5e5   :  { %5951 = vmatpush1.bf16.msra.mxu0 %v7936_v50  ;;  %5983 = vmatpush1.bf16.msra.mxu1 %v7939_v56 }
 0x5e6   :  { %5953 = vmatprep.subr.bf16.mxu0 %v7990_v22  ;;  %5985 = vmatprep.subr.bf16.mxu1 %v7992_v35 }
 0x5e9   :  { %5955 = vmatpush1.bf16.msra.mxu0 %v7994_v21  ;;  %5987 = vmatpush1.bf16.msra.mxu1 %v7997_v31 }
 0x5ea   :  { %5957 = vmatprep.subr.bf16.mxu0 %v8002_v46  ;;  %5989 = vmatprep.subr.bf16.mxu1 %v8004_v48 }
 0x5ed   :  { %5959 = vmatpush1.bf16.msra.mxu0 %v8006_v51  ;;  %5991 = vmatpush1.bf16.msra.mxu1 %v8009_v62 }
 0x5ee   :  { %5961 = vmatprep.subr.bf16.mxu0 %v8014_v12  ;;  %5993 = vmatprep.subr.bf16.mxu1 %v8016_v29 }
 0x5f1   :  { %5963 = vmatpush1.bf16.msra.mxu0 %v8018_v34  ;;  %5995 = vmatpush1.bf16.msra.mxu1 %v8021_v47 }
 0x5f2   :  { %5965 = vmatprep.subr.bf16.mxu0 %v8026_v2  ;;  %5997 = vmatprep.subr.bf16.mxu1 %v8028_v0 }
 0x5f5   :  { %5967 = vmatpush1.bf16.msra.mxu0 %v8030_v13  ;;  %5999 = vmatpush1.bf16.msra.mxu1 %v8033_v24 }
 0x5f6   :  { %5969 = vmatprep.subr.bf16.mxu0 %v8037_v45  ;;  %6001 = vmatprep.subr.bf16.mxu1 %v8039_v52 }
 0x5f9   :  { %5971 = vmatpush1.bf16.msra.mxu0 %v8042_v59  ;;  %6003 = vmatpush1.bf16.msra.mxu1 %v8046_v16 }
 0x5fa   :  { %5973 = vmatprep.subr.bf16.mxu0 %v8048_v20  ;;  %6005 = vmatprep.subr.bf16.mxu1 %v8050_v53 }
 0x5fd   :  { %5975 = vmatpush1.bf16.msra.mxu0 %v8053_v58  ;;  %6007 = vmatpush1.bf16.msra.mxu1 %v8057_v60 }
 0x6b3   :  { %v1840_v39 = vpop.f32.mrb[10].mxu0  ;;  %v1911_v27 = vpop.f32.mrb[10].mxu1 }
 0x6b4   :  { %v6754_v38 = vadd.f32 %v1840_v39, %v7847_v15  ;;  %v1842_v49 = vpop.f32.mrb[11].mxu0  ;;  %v1913_v50 = vpop.f32.mrb[11].mxu1  ;;  %v6770_v57 = vadd.f32 %v1911_v27, %v7858_v32 }
 0x6b5   :  { %v6755_v56 = vadd.f32 %v1842_v49, %v7851_v18  ;;  %v6771_v61 = vadd.f32 %v1913_v50, %v7864_v41  ;;  %v2197_v49 = vld [vmem:[#allocation11 + $0x28] sm:$0xff] }
 0x6b6   :  { %v5304_v26 = vmul.f32 -1.442695, %v6754_v38  ;;  %v5306_v7 = vmul.f32 -1.442695, %v6770_v57  ;;  %v2193_v38 = vld [vmem:[#allocation11 + $0x8] sm:$0xff] }
 0x6b7   :  { %v5305_v44 = vmul.f32 -1.442695, %v6755_v56  ;;  %v6008_v50 = vpack.c.bf16 %v2197_v49, %v2193_v38  ;;  %v2199_v56 = vld [vmem:[#allocation11 + $0x38] sm:$0xff] }
 0x6b8   :  { %6972 = vpow2.f32 %v5304_v26  ;;  %v2192_v26 = vld [vmem:[#allocation11] sm:$0xff] }
 0x6b9   :  { %6974 = vpow2.f32 %v5305_v44  ;;  %v2196_v44 = vld [vmem:[#allocation11 + $0x20] sm:$0xff]  ;;  %6009 = vmatprep.subr.bf16.mxu0 %v6008_v50 }
 0x6ba   :  { %6976 = vtanh.f32 %v6771_v61  ;;  %v6010_v61 = vpack.c.bf16 %v2196_v44, %v2192_v26  ;;  %v2436_v44 = vld [vmem:[#allocation12] sm:$0xff] }
 0x6bb   :  { %6978 = vpow2.f32 %v5306_v7  ;;  %v2194_v7 = vld [vmem:[#allocation11 + $0x10] sm:$0xff] }
 0x6c2   :  { %v6973_v23 = vpop.eup %6972 }
 0x6c3   :  { %v1929_v8 = vadd.f32 1.0, %v6973_v23  ;;  %v6975_v36 = vpop.eup %6974  ;;  %v2198_v23 = vld [vmem:[#allocation11 + $0x30] sm:$0xff] }
 0x6c4   :  { %v1930_v30 = vadd.f32 1.0, %v6975_v36  ;;  %v6977_v28 = vpop.eup %6976  ;;  %v2201_v36 = vld [vmem:[#allocation11 + $0x48] sm:$0xff] }
 0x6c5   :  { %6980 = vrcp.f32 %v1929_v8  ;;  %v6979_v42 = vpop.eup %6978  ;;  %v6042_v8 = vpack.c.bf16 %v2198_v23, %v2194_v7  ;;  %v2442_v7 = vld [vmem:[#allocation12 + $0x30] sm:$0xff]  ;;  %v2445_v23 = vld [vmem:[#allocation12 + $0x48] sm:$0xff] }
 0x6c6   :  { %6982 = vrcp.f32 %v1930_v30  ;;  %v1931_v3 = vadd.f32 1.0, %v6979_v42  ;;  %v2205_v30 = vld [vmem:[#allocation11 + $0x68] sm:$0xff] }
 0x6c7   :  { %v6012_v42 = vpack.c.bf16 %v2205_v30, %v2201_v36  ;;  %v2447_v36 = vld [vmem:[#allocation12 + $0x58] sm:$0xff] }
 0x6c8   :  { %6984 = vrcp.f32 %v1931_v3  ;;  %v2451_v30 = vld [vmem:[#allocation12 + $0x78] sm:$0xff] }
 0x6cf   :  { %v6981_v33 = vpop.eup %6980 }
 0x6d0   :  { %v1940_v54 = vmul.f32 %v6981_v33, %v6977_v28  ;;  %v6983_v5 = vpop.eup %6982  ;;  %v2203_v28 = vld [vmem:[#allocation11 + $0x58] sm:$0xff] }
 0x6d1   :  { %v1939_v6 = vmul.f32 %v6983_v5, %v8115_v55  ;;  %v2195_v55 = vld [vmem:[#allocation11 + $0x18] sm:$0xff]  ;;  %v2204_v5 = vld [vmem:[#allocation11 + $0x60] sm:$0xff] }
 0x6d2   :  { %v6985_v25 = vpop.eup %6984  ;;  %v6040_v57 = vpack.c.bf16 %v2199_v56, %v2195_v55  ;;  %v2207_v33 = vld [vmem:[#allocation11 + $0x78] sm:$0xff] }
 0x6d3   :  { %v8159_v9 = vadd.f32 %v1940_v54, %v1939_v6  ;;  %v2200_v54 = vld [vmem:[#allocation11 + $0x40] sm:$0xff]  ;;  %v6044_v3 = vpack.c.bf16 %v2207_v33, %v2203_v28 }
 0x6d4   :  { %6041 = vmatprep.subr.bf16.mxu1 %v6040_v57  ;;  %v6014_v6 = vpack.c.bf16 %v2204_v5, %v2200_v54  ;;  %v2440_v57 = vld [vmem:[#allocation12 + $0x20] sm:$0xff] }
 0x6d5   :  { %6986 = vtanh.f32 %v8159_v9  ;;  %v6074_v33 = vpack.c.bf16 %v2440_v57, %v2436_v44  ;;  %v2444_v5 = vld [vmem:[#allocation12 + $0x40] sm:$0xff] }
 0x6df   :  { %v6987_v39 = vpop.eup %6986 }
 0x6e0   :  { %v8162_v27 = vmul.f32 %v6987_v39, %v6985_v25  ;;  %v2202_v25 = vld [vmem:[#allocation11 + $0x50] sm:$0xff] }
 0x6e1   :  { %v2206_v39 = vld [vmem:[#allocation11 + $0x70] sm:$0xff] }
 0x6e2   :  { %2080 = vmatmul.mubr.f32.vlgmr.msra.gmra.mrb[12].mxu0 %v8162_v27  ;;  %2151 = vmatmul.mubr.f32.vlgmr.msra.gmra.mrb[12].mxu1 %v8162_v27  ;;  %v6046_v38 = vpack.c.bf16 %v2206_v39, %v2202_v25  ;;  %v6108_v25 = vpack.c.bf16 %v2451_v30, %v2447_v36  ;;  %v2446_v39 = vld [vmem:[#allocation12 + $0x50] sm:$0xff] }
 0x6e3   :  { %2320 = vmatprep.mubr.f32.mxu0 %v7416_v1  ;;  %2391 = vmatprep.mubr.f32.mxu1 %v7416_v1  ;;  %v2470_v36 = vld [vmem:[#allocation12 + $0x110] sm:$0xff] }
 0x6e4   :  { %6011 = vmatpush1.bf16.msra.mxu0 %v6010_v61  ;;  %6043 = vmatpush1.bf16.msra.mxu1 %v6042_v8  ;;  %v2438_v61 = vld [vmem:[#allocation12 + $0x10] sm:$0xff]  ;;  %v2449_v8 = vld [vmem:[#allocation12 + $0x68] sm:$0xff] }
 0x6e5   :  { %6013 = vmatprep.subr.bf16.mxu0 %v6012_v42  ;;  %6045 = vmatprep.subr.bf16.mxu1 %v6044_v3  ;;  %v6106_v54 = vpack.c.bf16 %v2442_v7, %v2438_v61  ;;  %v2448_v3 = vld [vmem:[#allocation12 + $0x60] sm:$0xff]  ;;  %v2474_v30 = vld [vmem:[#allocation12 + $0x130] sm:$0xff] }
 0x6e6   :  { %v2468_v61 = vld [vmem:[#allocation12 + $0x100] sm:$0xff] }
 0x6e7   :  { %v2472_v7 = vld [vmem:[#allocation12 + $0x120] sm:$0xff] }
 0x6e8   :  { %6015 = vmatpush1.bf16.msra.mxu0 %v6014_v6  ;;  %6047 = vmatpush1.bf16.msra.mxu1 %v6046_v38  ;;  %v6076_v6 = vpack.c.bf16 %v2449_v8, %v2445_v23  ;;  %v2450_v38 = vld [vmem:[#allocation12 + $0x70] sm:$0xff] }
 0x6e9   :  { %6017 = vmatprep.subr.bf16.mxu0 %v7990_v22  ;;  %6049 = vmatprep.subr.bf16.mxu1 %v7992_v35  ;;  %v2437_v22 = vld [vmem:[#allocation12 + $0x8] sm:$0xff] }
 0x6ea   :  { %v2441_v35 = vld [vmem:[#allocation12 + $0x28] sm:$0xff] }
 0x6ec   :  { %6019 = vmatpush1.bf16.msra.mxu0 %v7994_v21  ;;  %6051 = vmatpush1.bf16.msra.mxu1 %v7997_v31  ;;  %v2439_v21 = vld [vmem:[#allocation12 + $0x18] sm:$0xff] }
 0x6ed   :  { %6021 = vmatprep.subr.bf16.mxu0 %v8002_v46  ;;  %6053 = vmatprep.subr.bf16.mxu1 %v8004_v48  ;;  %v2443_v31 = vld [vmem:[#allocation12 + $0x38] sm:$0xff]  ;;  %v6072_v46 = vpack.c.bf16 %v2441_v35, %v2437_v22  ;;  %v2453_v22 = vld [vmem:[#allocation12 + $0x88] sm:$0xff] }
 0x6ee   :  { %v6104_v48 = vpack.c.bf16 %v2443_v31, %v2439_v21  ;;  %v2457_v35 = vld [vmem:[#allocation12 + $0xa8] sm:$0xff]  ;;  %v2455_v21 = vld [vmem:[#allocation12 + $0x98] sm:$0xff] }
 0x6ef   :  { %v2459_v31 = vld [vmem:[#allocation12 + $0xb8] sm:$0xff] }
 0x6f0   :  { %6023 = vmatpush1.bf16.msra.mxu0 %v8006_v51  ;;  %6055 = vmatpush1.bf16.msra.mxu1 %v8009_v62 }
 0x6f1   :  { %6025 = vmatprep.subr.bf16.mxu0 %v8014_v12  ;;  %6057 = vmatprep.subr.bf16.mxu1 %v8016_v29 }
 0x6f4   :  { %6027 = vmatpush1.bf16.msra.mxu0 %v8018_v34  ;;  %6059 = vmatpush1.bf16.msra.mxu1 %v8021_v47 }
 0x6f5   :  { %6029 = vmatprep.subr.bf16.mxu0 %v8026_v2  ;;  %6061 = vmatprep.subr.bf16.mxu1 %v8028_v0 }
 0x6f8   :  { %6031 = vmatpush1.bf16.msra.mxu0 %v8030_v13  ;;  %6063 = vmatpush1.bf16.msra.mxu1 %v8033_v24 }
 0x6f9   :  { %6033 = vmatprep.subr.bf16.mxu0 %v8037_v45  ;;  %6065 = vmatprep.subr.bf16.mxu1 %v8039_v52 }
 0x6fc   :  { %6035 = vmatpush1.bf16.msra.mxu0 %v8042_v59  ;;  %6067 = vmatpush1.bf16.msra.mxu1 %v8046_v16 }
 0x6fd   :  { %6037 = vmatprep.subr.bf16.mxu0 %v8048_v20  ;;  %6069 = vmatprep.subr.bf16.mxu1 %v8050_v53 }
 0x700   :  { %6039 = vmatpush1.bf16.msra.mxu0 %v8053_v58  ;;  %6071 = vmatpush1.bf16.msra.mxu1 %v8057_v60 }
 0x701   :  { %6073 = vmatprep.subr.bf16.mxu0 %v6072_v46  ;;  %6105 = vmatprep.subr.bf16.mxu1 %v6104_v48  ;;  %v6078_v46 = vpack.c.bf16 %v2448_v3, %v2444_v5  ;;  %v6110_v48 = vpack.c.bf16 %v2450_v38, %v2446_v39  ;;  %v6090_v5 = vpack.c.bf16 %v2472_v7, %v2468_v61  ;;  %v2786_v7 = vld [vmem:[#allocation14 + $0x10] sm:$0xff] }
 0x702   :  { %v6122_v3 = vpack.c.bf16 %v2474_v30, %v2470_v36  ;;  %v2797_v36 = vld [vmem:[#allocation14 + $0x68] sm:$0xff]  ;;  %v2795_v30 = vld [vmem:[#allocation14 + $0x58] sm:$0xff] }
 0x7b5   :  { %v2081_v51 = vpop.f32.mrb[12].mxu0  ;;  %v2152_v62 = vpop.f32.mrb[12].mxu1 }
 0x7b6   :  { %v6756_v12 = vadd.f32 %v2081_v51, %v7847_v15  ;;  %v2083_v29 = vpop.f32.mrb[13].mxu0  ;;  %v2154_v34 = vpop.f32.mrb[13].mxu1  ;;  %v6772_v13 = vadd.f32 %v2152_v62, %v7858_v32  ;;  %v2452_v51 = vld [vmem:[#allocation12 + $0x80] sm:$0xff] }
 0x7b7   :  { %v6757_v47 = vadd.f32 %v2083_v29, %v7851_v18  ;;  %v6773_v24 = vadd.f32 %v2154_v34, %v7864_v41  ;;  %v2456_v62 = vld [vmem:[#allocation12 + $0xa0] sm:$0xff]  ;;  %v6112_v29 = vpack.c.bf16 %v2459_v31, %v2455_v21  ;;  %v2454_v34 = vld [vmem:[#allocation12 + $0x90] sm:$0xff]  ;;  %v2485_v21 = vld [vmem:[#allocation12 + $0x188] sm:$0xff] }
 0x7b8   :  { %v5307_v2 = vmul.f32 -1.442695, %v6756_v12  ;;  %v5309_v45 = vmul.f32 -1.442695, %v6772_v13  ;;  %v6080_v12 = vpack.c.bf16 %v2457_v35, %v2453_v22  ;;  %v2463_v13 = vld [vmem:[#allocation12 + $0xd8] sm:$0xff]  ;;  %v2478_v22 = vld [vmem:[#allocation12 + $0x150] sm:$0xff] }
 0x7b9   :  { %v5308_v0 = vmul.f32 -1.442695, %v6757_v47  ;;  %v2458_v47 = vld [vmem:[#allocation12 + $0xb0] sm:$0xff]  ;;  %v2489_v31 = vld [vmem:[#allocation12 + $0x1a8] sm:$0xff] }
 0x7ba   :  { %6988 = vpow2.f32 %v5307_v2  ;;  %v2461_v2 = vld [vmem:[#allocation12 + $0xc8] sm:$0xff]  ;;  %v2482_v35 = vld [vmem:[#allocation12 + $0x170] sm:$0xff] }
 0x7bb   :  { %6990 = vpow2.f32 %v5308_v0  ;;  %v2465_v0 = vld [vmem:[#allocation12 + $0xe8] sm:$0xff] }
 0x7bc   :  { %6992 = vtanh.f32 %v6773_v24  ;;  %v2467_v24 = vld [vmem:[#allocation12 + $0xf8] sm:$0xff] }
 0x7bd   :  { %6994 = vpow2.f32 %v5309_v45  ;;  %v6082_v45 = vpack.c.bf16 %v2456_v62, %v2452_v51  ;;  %v6126_v62 = vpack.c.bf16 %v2482_v35, %v2478_v22  ;;  %v2805_v22 = vld [vmem:[#allocation14 + $0xa8] sm:$0xff]  ;;  %v2803_v35 = vld [vmem:[#allocation14 + $0x98] sm:$0xff] }
 0x7c4   :  { %v6989_v52 = vpop.eup %6988 }
 0x7c5   :  { %v2170_v59 = vadd.f32 1.0, %v6989_v52  ;;  %v6991_v16 = vpop.eup %6990  ;;  %v6114_v52 = vpack.c.bf16 %v2458_v47, %v2454_v34  ;;  %v6096_v34 = vpack.c.bf16 %v2489_v31, %v2485_v21  ;;  %v2807_v31 = vld [vmem:[#allocation14 + $0xb8] sm:$0xff] }
 0x7c6   :  { %v2171_v20 = vadd.f32 1.0, %v6991_v16  ;;  %v6993_v53 = vpop.eup %6992  ;;  %v2464_v16 = vld [vmem:[#allocation12 + $0xe0] sm:$0xff] }
 0x7c7   :  { %6996 = vrcp.f32 %v2170_v59  ;;  %v6995_v58 = vpop.eup %6994  ;;  %v2460_v59 = vld [vmem:[#allocation12 + $0xc0] sm:$0xff] }
 0x7c8   :  { %6998 = vrcp.f32 %v2171_v20  ;;  %v2172_v50 = vadd.f32 1.0, %v6995_v58  ;;  %v6084_v20 = vpack.c.bf16 %v2465_v0, %v2461_v2  ;;  %v2462_v58 = vld [vmem:[#allocation12 + $0xd0] sm:$0xff]  ;;  %v6086_v44 = vpack.c.bf16 %v2464_v16, %v2460_v59 }
 0x7c9   :  { %v2486_v2 = vld [vmem:[#allocation12 + $0x190] sm:$0xff] }
 0x7ca   :  { %7000 = vrcp.f32 %v2172_v50  ;;  %v2471_v50 = vld [vmem:[#allocation12 + $0x118] sm:$0xff]  ;;  %v2490_v0 = vld [vmem:[#allocation12 + $0x1b0] sm:$0xff] }
 0x7cb   :  { %v6130_v16 = vpack.c.bf16 %v2490_v0, %v2486_v2  ;;  %v2813_v2 = vld [vmem:[#allocation14 + $0xe8] sm:$0xff]  ;;  %v2811_v0 = vld [vmem:[#allocation14 + $0xd8] sm:$0xff] }
 0x7d1   :  { %v6997_v60 = vpop.eup %6996 }
 0x7d2   :  { %v2181_v49 = vmul.f32 %v6997_v60, %v6993_v53  ;;  %v6999_v55 = vpop.eup %6998  ;;  %v6116_v53 = vpack.c.bf16 %v2467_v24, %v2463_v13  ;;  %v2466_v60 = vld [vmem:[#allocation12 + $0xf0] sm:$0xff]  ;;  %v2493_v13 = vld [vmem:[#allocation12 + $0x1c8] sm:$0xff] }
 0x7d3   :  { %v2180_v56 = vmul.f32 %v6999_v55, %v8159_v9  ;;  %v2473_v55 = vld [vmem:[#allocation12 + $0x128] sm:$0xff]  ;;  %v6118_v57 = vpack.c.bf16 %v2466_v60, %v2462_v58  ;;  %v2496_v60 = vld [vmem:[#allocation12 + $0x1e0] sm:$0xff] }
 0x7d4   :  { %v7001_v28 = vpop.eup %7000  ;;  %v2497_v24 = vld [vmem:[#allocation12 + $0x1e8] sm:$0xff] }
 0x7d5   :  { %v8197_v26 = vadd.f32 %v2181_v49, %v2180_v56  ;;  %v2469_v49 = vld [vmem:[#allocation12 + $0x108] sm:$0xff]  ;;  %v2475_v56 = vld [vmem:[#allocation12 + $0x138] sm:$0xff] }
 0x7d6   :  { %v6088_v23 = vpack.c.bf16 %v2473_v55, %v2469_v49  ;;  %v6120_v8 = vpack.c.bf16 %v2475_v56, %v2471_v50  ;;  %v2494_v49 = vld [vmem:[#allocation12 + $0x1d0] sm:$0xff] }
 0x7d7   :  { %7002 = vtanh.f32 %v8197_v26  ;;  %v2498_v55 = vld [vmem:[#allocation12 + $0x1f0] sm:$0xff] }
 0x7d8   :  { %v6134_v56 = vpack.c.bf16 %v2498_v55, %v2494_v49  ;;  %v2821_v49 = vld [vmem:[#allocation14 + $0x128] sm:$0xff]  ;;  %v2819_v55 = vld [vmem:[#allocation14 + $0x118] sm:$0xff] }
 0x7e1   :  { %v7003_v42 = vpop.eup %7002 }
 0x7e2   :  { %v8200_v9 = vmul.f32 %v7003_v42, %v7001_v28  ;;  %v2477_v28 = vld [vmem:[#allocation12 + $0x148] sm:$0xff] }
 0x7e3   :  { %v2481_v42 = vld [vmem:[#allocation12 + $0x168] sm:$0xff] }
 0x7e4   :  { %2321 = vmatmul.mubr.f32.vlgmr.msra.gmra.mrb[14].mxu0 %v8200_v9  ;;  %2392 = vmatmul.mubr.f32.vlgmr.msra.gmra.mrb[14].mxu1 %v8200_v9  ;;  %v6092_v39 = vpack.c.bf16 %v2481_v42, %v2477_v28  ;;  %v2799_v42 = vld [vmem:[#allocation14 + $0x78] sm:$0xff] }
 0x7e5   :  { %6075 = vmatpush1.bf16.msra.mxu0 %v6074_v33  ;;  %6107 = vmatpush1.bf16.msra.mxu1 %v6106_v54  ;;  %v2479_v33 = vld [vmem:[#allocation12 + $0x158] sm:$0xff] }
 0x7e6   :  { %6077 = vmatprep.subr.bf16.mxu0 %v6076_v6  ;;  %6109 = vmatprep.subr.bf16.mxu1 %v6108_v25  ;;  %v2483_v54 = vld [vmem:[#allocation12 + $0x178] sm:$0xff]  ;;  %v2476_v6 = vld [vmem:[#allocation12 + $0x140] sm:$0xff] }
 0x7e7   :  { %2586 = vmatprep.mubr.f32.mxu0 %v7416_v1  ;;  %2699 = vmatprep.mubr.f32.mxu1 %v7416_v1  ;;  %v2480_v25 = vld [vmem:[#allocation12 + $0x160] sm:$0xff]  ;;  %v6124_v38 = vpack.c.bf16 %v2483_v54, %v2479_v33 }
 0x7e8   :  { %v6094_v51 = vpack.c.bf16 %v2480_v25, %v2476_v6  ;;  %v2792_v33 = vld [vmem:[#allocation14 + $0x40] sm:$0xff]  ;;  %v2794_v6 = vld [vmem:[#allocation14 + $0x50] sm:$0xff] }
 0x7e9   :  { %6079 = vmatpush1.bf16.msra.mxu0 %v6078_v46  ;;  %6111 = vmatpush1.bf16.msra.mxu1 %v6110_v48  ;;  %v2487_v46 = vld [vmem:[#allocation12 + $0x198] sm:$0xff]  ;;  %v2796_v54 = vld [vmem:[#allocation14 + $0x60] sm:$0xff]  ;;  %v2798_v25 = vld [vmem:[#allocation14 + $0x70] sm:$0xff] }
 0x7ea   :  { %6081 = vmatprep.subr.bf16.mxu0 %v6080_v12  ;;  %6113 = vmatprep.subr.bf16.mxu1 %v6112_v29  ;;  %v2491_v48 = vld [vmem:[#allocation12 + $0x1b8] sm:$0xff]  ;;  %v2484_v12 = vld [vmem:[#allocation12 + $0x180] sm:$0xff] }
 0x7eb   :  { %v2488_v29 = vld [vmem:[#allocation12 + $0x1a0] sm:$0xff]  ;;  %v6128_v47 = vpack.c.bf16 %v2491_v48, %v2487_v46 }
 0x7ec   :  { %v6098_v59 = vpack.c.bf16 %v2488_v29, %v2484_v12  ;;  %v2800_v46 = vld [vmem:[#allocation14 + $0x80] sm:$0xff]  ;;  %v2802_v12 = vld [vmem:[#allocation14 + $0x90] sm:$0xff] }
 0x7ed   :  { %6083 = vmatpush1.bf16.msra.mxu0 %v6082_v45  ;;  %6115 = vmatpush1.bf16.msra.mxu1 %v6114_v52  ;;  %v2495_v45 = vld [vmem:[#allocation12 + $0x1d8] sm:$0xff]  ;;  %v2804_v48 = vld [vmem:[#allocation14 + $0xa0] sm:$0xff]  ;;  %v2806_v29 = vld [vmem:[#allocation14 + $0xb0] sm:$0xff] }
 0x7ee   :  { %6085 = vmatprep.subr.bf16.mxu0 %v6084_v20  ;;  %6117 = vmatprep.subr.bf16.mxu1 %v6116_v53  ;;  %v2499_v52 = vld [vmem:[#allocation12 + $0x1f8] sm:$0xff]  ;;  %v2492_v20 = vld [vmem:[#allocation12 + $0x1c0] sm:$0xff]  ;;  %v6100_v53 = vpack.c.bf16 %v2497_v24, %v2493_v13 }
 0x7ef   :  { %v6132_v58 = vpack.c.bf16 %v2499_v52, %v2495_v45  ;;  %v6102_v50 = vpack.c.bf16 %v2496_v60, %v2492_v20  ;;  %v2815_v24 = vld [vmem:[#allocation14 + $0xf8] sm:$0xff]  ;;  %v2808_v45 = vld [vmem:[#allocation14 + $0xc0] sm:$0xff]  ;;  %v2810_v20 = vld [vmem:[#allocation14 + $0xd0] sm:$0xff] }
 0x7f0   :  { %v2812_v52 = vld [vmem:[#allocation14 + $0xe0] sm:$0xff]  ;;  %v2817_v60 = vld [vmem:[#allocation14 + $0x108] sm:$0xff] }
 0x7f1   :  { %6087 = vmatpush1.bf16.msra.mxu0 %v6086_v44  ;;  %6119 = vmatpush1.bf16.msra.mxu1 %v6118_v57  ;;  %v2784_v44 = vld [vmem:[#allocation14] sm:$0xff] }
 0x7f2   :  { %6089 = vmatprep.subr.bf16.mxu0 %v6088_v23  ;;  %6121 = vmatprep.subr.bf16.mxu1 %v6120_v8  ;;  %v2790_v23 = vld [vmem:[#allocation14 + $0x30] sm:$0xff]  ;;  %v2793_v8 = vld [vmem:[#allocation14 + $0x48] sm:$0xff] }
 0x7f3   :  { %v8246_v28 = vpack.c.bf16 %v2797_v36, %v2793_v8  ;;  %v2829_v8 = vld [vmem:[#allocation14 + $0x168] sm:$0xff]  ;;  %v2827_v36 = vld [vmem:[#allocation14 + $0x158] sm:$0xff] }
 0x7f5   :  { %6091 = vmatpush1.bf16.msra.mxu0 %v6090_v5  ;;  %6123 = vmatpush1.bf16.msra.mxu1 %v6122_v3  ;;  %v8248_v5 = vpack.c.bf16 %v2799_v42, %v2795_v30  ;;  %v8250_v3 = vpack.c.bf16 %v2796_v54, %v2792_v33  ;;  %v2831_v30 = vld [vmem:[#allocation14 + $0x178] sm:$0xff]  ;;  %v2824_v54 = vld [vmem:[#allocation14 + $0x140] sm:$0xff] }
 0x7f6   :  { %6093 = vmatprep.subr.bf16.mxu0 %v6092_v39  ;;  %6125 = vmatprep.subr.bf16.mxu1 %v6124_v38  ;;  %v8253_v39 = vpack.c.bf16 %v2798_v25, %v2794_v6  ;;  %v2801_v38 = vld [vmem:[#allocation14 + $0x88] sm:$0xff]  ;;  %v8295_v33 = vpack.c.bf16 %v2831_v30, %v2827_v36  ;;  %v2828_v6 = vld [vmem:[#allocation14 + $0x160] sm:$0xff]  ;;  %v2826_v25 = vld [vmem:[#allocation14 + $0x150] sm:$0xff] }
 0x7f7   :  { %v8258_v21 = vpack.c.bf16 %v2805_v22, %v2801_v38  ;;  %v8298_v38 = vpack.c.bf16 %v2828_v6, %v2824_v54  ;;  %v2830_v22 = vld [vmem:[#allocation14 + $0x170] sm:$0xff] }
 0x7f9   :  { %6095 = vmatpush1.bf16.msra.mxu0 %v6094_v51  ;;  %6127 = vmatpush1.bf16.msra.mxu1 %v6126_v62  ;;  %v8260_v51 = vpack.c.bf16 %v2807_v31, %v2803_v35  ;;  %v8262_v62 = vpack.c.bf16 %v2804_v48, %v2800_v46  ;;  %v2833_v35 = vld [vmem:[#allocation14 + $0x188] sm:$0xff]  ;;  %v8302_v46 = vpack.c.bf16 %v2830_v22, %v2826_v25 }
 0x7fa   :  { %6097 = vmatprep.subr.bf16.mxu0 %v6096_v34  ;;  %6129 = vmatprep.subr.bf16.mxu1 %v6128_v47  ;;  %v8265_v34 = vpack.c.bf16 %v2806_v29, %v2802_v12  ;;  %v2809_v47 = vld [vmem:[#allocation14 + $0xc8] sm:$0xff]  ;;  %v2835_v12 = vld [vmem:[#allocation14 + $0x198] sm:$0xff] }
 0x7fb   :  { %v8270_v13 = vpack.c.bf16 %v2813_v2, %v2809_v47  ;;  %v2837_v31 = vld [vmem:[#allocation14 + $0x1a8] sm:$0xff]  ;;  %v2839_v29 = vld [vmem:[#allocation14 + $0x1b8] sm:$0xff]  ;;  %v2832_v47 = vld [vmem:[#allocation14 + $0x180] sm:$0xff] }
 0x7fc   :  { %v8304_v48 = vpack.c.bf16 %v2837_v31, %v2833_v35  ;;  %v8306_v2 = vpack.c.bf16 %v2839_v29, %v2835_v12 }
 0x7fd   :  { %6099 = vmatpush1.bf16.msra.mxu0 %v6098_v59  ;;  %6131 = vmatpush1.bf16.msra.mxu1 %v6130_v16  ;;  %v8272_v59 = vpack.c.bf16 %v2815_v24, %v2811_v0  ;;  %v8274_v16 = vpack.c.bf16 %v2812_v52, %v2808_v45  ;;  %v2836_v0 = vld [vmem:[#allocation14 + $0x1a0] sm:$0xff]  ;;  %v2834_v24 = vld [vmem:[#allocation14 + $0x190] sm:$0xff] }
 0x7fe   :  { %6101 = vmatprep.subr.bf16.mxu0 %v6100_v53  ;;  %6133 = vmatprep.subr.bf16.mxu1 %v6132_v58  ;;  %v2814_v53 = vld [vmem:[#allocation14 + $0xf0] sm:$0xff]  ;;  %v8309_v52 = vpack.c.bf16 %v2836_v0, %v2832_v47 }
 0x7ff   :  { %v8277_v58 = vpack.c.bf16 %v2814_v53, %v2810_v20  ;;  %v2838_v45 = vld [vmem:[#allocation14 + $0x1b0] sm:$0xff]  ;;  %v2841_v53 = vld [vmem:[#allocation14 + $0x1c8] sm:$0xff] }
 0x800   :  { %v8313_v20 = vpack.c.bf16 %v2838_v45, %v2834_v24 }
 0x801   :  { %6103 = vmatpush1.bf16.msra.mxu0 %v6102_v50  ;;  %6135 = vmatpush1.bf16.msra.mxu1 %v6134_v56  ;;  %v8282_v50 = vpack.c.bf16 %v2821_v49, %v2817_v60  ;;  %v2823_v56 = vld [vmem:[#allocation14 + $0x138] sm:$0xff]  ;;  %v2845_v60 = vld [vmem:[#allocation14 + $0x1e8] sm:$0xff] }
 0x802   :  { %v2843_v49 = vld [vmem:[#allocation14 + $0x1d8] sm:$0xff] }
 0x804   :  { %2587 = vmatmul.mubr.f32.vlgmr.msra.gmra.mrb[16].mxu0 %v7870_v19  ;;  %2700 = vmatmul.mubr.f32.vlgmr.msra.gmra.mrb[16].mxu1 %v7870_v19  ;;  %v2785_v19 = vld [vmem:[#allocation14 + $0x8] sm:$0xff] }
 0x805   :  { %2592 = vmatprep.mubr.f32.mxu0 %v7416_v1  ;;  %2705 = vmatprep.mubr.f32.mxu1 %v7416_v1 }
 0x808   :  { %2593 = vmatmul.mubr.f32.gmra.mrb[18].mxu0 %v7914_v4  ;;  %2706 = vmatmul.mubr.f32.gmra.mrb[18].mxu1 %v7914_v4  ;;  %v2789_v4 = vld [vmem:[#allocation14 + $0x28] sm:$0xff] }
 0x809   :  { %2598 = vmatprep.mubr.f32.mxu0 %v7416_v1  ;;  %2711 = vmatprep.mubr.f32.mxu1 %v7416_v1 }
 0x80c   :  { %2599 = vmatmul.mubr.f32.gmra.mrb[20].mxu0 %v7978_v63  ;;  %2712 = vmatmul.mubr.f32.gmra.mrb[20].mxu1 %v7978_v63  ;;  %v2787_v63 = vld [vmem:[#allocation14 + $0x18] sm:$0xff] }
 0x80d   :  { %2604 = vmatprep.mubr.f32.mxu0 %v7416_v1  ;;  %2717 = vmatprep.mubr.f32.mxu1 %v7416_v1 }
 0x810   :  { %2605 = vmatmul.mubr.f32.gmra.mrb[22].mxu0 %v8072_v43  ;;  %2718 = vmatmul.mubr.f32.gmra.mrb[22].mxu1 %v8072_v43  ;;  %v8234_v43 = vpack.c.bf16 %v2789_v4, %v2785_v19  ;;  %v2816_v19 = vld [vmem:[#allocation14 + $0x100] sm:$0xff] }
 0x811   :  { %2610 = vmatprep.mubr.f32.mxu0 %v7416_v1  ;;  %2723 = vmatprep.mubr.f32.mxu1 %v7416_v1  ;;  %v2820_v4 = vld [vmem:[#allocation14 + $0x120] sm:$0xff] }
 0x812   :  { %6137 = vmatprep.subr.bf16.mxu0 %v8234_v43 }
 0x814   :  { %2611 = vmatmul.mubr.f32.gmra.mrb[24].mxu0 %v8118_v40  ;;  %2724 = vmatmul.mubr.f32.gmra.mrb[24].mxu1 %v8118_v40  ;;  %v2791_v40 = vld [vmem:[#allocation14 + $0x38] sm:$0xff] }
 0x815   :  { %2616 = vmatprep.mubr.f32.mxu0 %v7416_v1  ;;  %2729 = vmatprep.mubr.f32.mxu1 %v7416_v1  ;;  %v8236_v57 = vpack.c.bf16 %v2791_v40, %v2787_v63  ;;  %v8284_v63 = vpack.c.bf16 %v2823_v56, %v2819_v55  ;;  %v8286_v40 = vpack.c.bf16 %v2820_v4, %v2816_v19  ;;  %v2847_v56 = vld [vmem:[#allocation14 + $0x1f8] sm:$0xff]  ;;  %v2840_v19 = vld [vmem:[#allocation14 + $0x1c0] sm:$0xff] }
 0x816   :  { %v8318_v55 = vpack.c.bf16 %v2845_v60, %v2841_v53  ;;  %v2844_v4 = vld [vmem:[#allocation14 + $0x1e0] sm:$0xff] }
 0x817   :  { %6169 = vmatprep.subr.bf16.mxu1 %v8236_v57 }
 0x818   :  { %2617 = vmatmul.mubr.f32.gmra.mrb[26].mxu0 %v8162_v27  ;;  %2730 = vmatmul.mubr.f32.gmra.mrb[26].mxu1 %v8162_v27  ;;  %v2788_v27 = vld [vmem:[#allocation14 + $0x20] sm:$0xff] }
 0x819   :  { %2622 = vmatprep.mubr.f32.mxu0 %v7416_v1  ;;  %2735 = vmatprep.mubr.f32.mxu1 %v7416_v1  ;;  %v8238_v61 = vpack.c.bf16 %v2788_v27, %v2784_v44  ;;  %v2818_v44 = vld [vmem:[#allocation14 + $0x110] sm:$0xff] }
 0x81a   :  { %v2822_v27 = vld [vmem:[#allocation14 + $0x130] sm:$0xff] }
 0x81b   :  { %6139 = vmatpush1.bf16.msra.mxu0 %v8238_v61 }
 0x81c   :  { %2623 = vmatmul.mubr.f32.gmra.mrb[28].mxu0 %v8200_v9  ;;  %2736 = vmatmul.mubr.f32.gmra.mrb[28].mxu1 %v8200_v9  ;;  %v8241_v9 = vpack.c.bf16 %v2790_v23, %v2786_v7  ;;  %v2825_v7 = vld [vmem:[#allocation14 + $0x148] sm:$0xff]  ;;  %v8289_v23 = vpack.c.bf16 %v2822_v27, %v2818_v44  ;;  %v8320_v44 = vpack.c.bf16 %v2847_v56, %v2843_v49 }
 0x81d   :  { %2628 = vmatprep.mubr.f32.mxu0 %v7416_v1  ;;  %2741 = vmatprep.mubr.f32.mxu1 %v7416_v1  ;;  %v8293_v42 = vpack.c.bf16 %v2829_v8, %v2825_v7  ;;  %v8322_v27 = vpack.c.bf16 %v2844_v4, %v2840_v19  ;;  %v2842_v7 = vld [vmem:[#allocation14 + $0x1d0] sm:$0xff] }
 0x81e   :  { %6171 = vmatpush1.bf16.msra.mxu1 %v8241_v9  ;;  %6141 = vmatprep.subr.bf16.mxu0 %v8246_v28  ;;  %v2846_v8 = vld [vmem:[#allocation14 + $0x1f0] sm:$0xff] }
 0x81f   :  { %6173 = vmatprep.subr.bf16.mxu1 %v8248_v5  ;;  %6143 = vmatpush1.bf16.msra.mxu0 %v8250_v3  ;;  %v8325_v36 = vpack.c.bf16 %v2846_v8, %v2842_v7 }
 0x820   :  { %6145 = vmatprep.subr.bf16.mxu0 %v8258_v21 }
 0x822   :  { %6175 = vmatpush1.bf16.msra.mxu1 %v8253_v39 }
 0x823   :  { %6177 = vmatprep.subr.bf16.mxu1 %v8260_v51  ;;  %6147 = vmatpush1.bf16.msra.mxu0 %v8262_v62 }
 0x824   :  { %6149 = vmatprep.subr.bf16.mxu0 %v8270_v13 }
 0x826   :  { %6179 = vmatpush1.bf16.msra.mxu1 %v8265_v34 }
 0x827   :  { %6181 = vmatprep.subr.bf16.mxu1 %v8272_v59  ;;  %6151 = vmatpush1.bf16.msra.mxu0 %v8274_v16 }
 0x828   :  { %6153 = vmatprep.subr.bf16.mxu0 %v8282_v50 }
 0x82a   :  { %6183 = vmatpush1.bf16.msra.mxu1 %v8277_v58 }
 0x82b   :  { %6185 = vmatprep.subr.bf16.mxu1 %v8284_v63  ;;  %6155 = vmatpush1.bf16.msra.mxu0 %v8286_v40 }
 0x82c   :  { %6157 = vmatprep.subr.bf16.mxu0 %v8293_v42 }
 0x82e   :  { %6187 = vmatpush1.bf16.msra.mxu1 %v8289_v23 }
 0x82f   :  { %6189 = vmatprep.subr.bf16.mxu1 %v8295_v33  ;;  %6159 = vmatpush1.bf16.msra.mxu0 %v8298_v38 }
 0x830   :  { %6161 = vmatprep.subr.bf16.mxu0 %v8304_v48 }
 0x832   :  { %6191 = vmatpush1.bf16.msra.mxu1 %v8302_v46 }
 0x833   :  { %6193 = vmatprep.subr.bf16.mxu1 %v8306_v2  ;;  %6163 = vmatpush1.bf16.msra.mxu0 %v8309_v52 }
 0x834   :  { %6165 = vmatprep.subr.bf16.mxu0 %v8318_v55 }
 0x836   :  { %6195 = vmatpush1.bf16.msra.mxu1 %v8313_v20 }
 0x837   :  { %6197 = vmatprep.subr.bf16.mxu1 %v8320_v44  ;;  %6167 = vmatpush1.bf16.msra.mxu0 %v8322_v27 }
 0x838   :  { %6201 = vmatprep.subr.bf16.mxu0 %v8234_v43 }
 0x83a   :  { %6199 = vmatpush1.bf16.msra.mxu1 %v8325_v36 }
 0x83b   :  { %6233 = vmatprep.subr.bf16.mxu1 %v8236_v57 }
 0x8b7   :  { %v2322_v30 = vpop.f32.mrb[14].mxu0  ;;  %v2393_v54 = vpop.f32.mrb[14].mxu1 }
 0x8b8   :  { %v6758_v6 = vadd.f32 %v2322_v30, %v7847_v15  ;;  %v2324_v25 = vpop.f32.mrb[15].mxu0  ;;  %v2395_v22 = vpop.f32.mrb[15].mxu1  ;;  %v6774_v29 = vadd.f32 %v2393_v54, %v7858_v32 }
 0x8b9   :  { %v6759_v35 = vadd.f32 %v2324_v25, %v7851_v18  ;;  %v6775_v47 = vadd.f32 %v2395_v22, %v7864_v41 }
 0x8ba   :  { %v5310_v31 = vmul.f32 -1.442695, %v6758_v6  ;;  %v5312_v0 = vmul.f32 -1.442695, %v6774_v29 }
 0x8bb   :  { %v5311_v12 = vmul.f32 -1.442695, %v6759_v35 }
 0x8bc   :  { %7004 = vpow2.f32 %v5310_v31 }
 0x8bd   :  { %7006 = vpow2.f32 %v5311_v12 }
 0x8be   :  { %7008 = vtanh.f32 %v6775_v47 }
 0x8bf   :  { %7010 = vpow2.f32 %v5312_v0 }
 0x8c6   :  { %v7005_v24 = vpop.eup %7004 }
 0x8c7   :  { %v2411_v45 = vadd.f32 1.0, %v7005_v24  ;;  %v7007_v53 = vpop.eup %7006 }
 0x8c8   :  { %v2412_v15 = vadd.f32 1.0, %v7007_v53  ;;  %v7009_v60 = vpop.eup %7008 }
 0x8c9   :  { %7012 = vrcp.f32 %v2411_v45  ;;  %v7011_v49 = vpop.eup %7010 }
 0x8ca   :  { %7014 = vrcp.f32 %v2412_v15  ;;  %v2413_v4 = vadd.f32 1.0, %v7011_v49 }
 0x8cc   :  { %7016 = vrcp.f32 %v2413_v4 }
 0x8d3   :  { %v7013_v18 = vpop.eup %7012 }
 0x8d4   :  { %v2422_v56 = vmul.f32 %v7013_v18, %v7009_v60  ;;  %v7015_v19 = vpop.eup %7014 }
 0x8d5   :  { %v2421_v7 = vmul.f32 %v7015_v19, %v8197_v26  ;;  %v2500_v26 = vld [vmem:[%s8862_s6] sm:$0xf] }
 0x8d6   :  { %v7017_v41 = vpop.eup %7016  ;;  %v8380_v54 = vrot.slane %v2500_v26, %v201_v11  ;;  %v8384_v6 = vrot.slane %v2500_v26, %v205_v14  ;;  %v8390_v24 = vrot.slane %v2500_v26, %v209_v17  ;;  %v8394_v11 = vrot.slane %v2500_v26, %v213_v37 }
 0x8d7   :  { %v2423_v32 = vadd.f32 %v2422_v56, %v2421_v7 }
 0x8d9   :  { %7018 = vtanh.f32 %v2423_v32 }
 0x8e3   :  { %v7019_v8 = vpop.eup %7018 }
 0x8e4   :  { %v2425_v30 = vmul.f32 %v7019_v8, %v7017_v41 }
 0x8e6   :  { %2629 = vmatmul.mubr.f32.gmra.mrb[30].mxu0 %v2425_v30  ;;  %2742 = vmatmul.mubr.f32.gmra.mrb[30].mxu1 %v2425_v30  ;;  %v8404_v30 = vld [vmem:[%s8863_s7] ss:$0 sm:$0xff] }
 0x8e7   :  { %2912 = vmatprep.mubr.f32.mxu0 %v7416_v1  ;;  %2983 = vmatprep.mubr.f32.mxu1 %v7416_v1 }
 0x8ea   :  { %2913 = vmatmul.mubr.f32.vlgmr.msra.gmra.mrb[16].mxu0 %v7416_v1  ;;  %2984 = vmatmul.mubr.f32.vlgmr.msra.gmra.mrb[16].mxu1 %v7416_v1 }
 0x8eb   :  { %6203 = vmatpush1.bf16.msra.mxu0 %v8238_v61  ;;  %6235 = vmatpush1.bf16.msra.mxu1 %v8241_v9 }
 0x8ec   :  { %6205 = vmatprep.subr.bf16.mxu0 %v8246_v28  ;;  %6237 = vmatprep.subr.bf16.mxu1 %v8248_v5 }
 0x8ed   :  { %3151 = vmatprep.mubr.f32.mxu0 %v7416_v1  ;;  %3222 = vmatprep.mubr.f32.mxu1 %v7416_v1 }
 0x8ef   :  { %6207 = vmatpush1.bf16.msra.mxu0 %v8250_v3  ;;  %6239 = vmatpush1.bf16.msra.mxu1 %v8253_v39 }
 0x8f0   :  { %6209 = vmatprep.subr.bf16.mxu0 %v8258_v21  ;;  %6241 = vmatprep.subr.bf16.mxu1 %v8260_v51 }
 0x8f3   :  { %6211 = vmatpush1.bf16.msra.mxu0 %v8262_v62  ;;  %6243 = vmatpush1.bf16.msra.mxu1 %v8265_v34 }
 0x8f4   :  { %6213 = vmatprep.subr.bf16.mxu0 %v8270_v13  ;;  %6245 = vmatprep.subr.bf16.mxu1 %v8272_v59 }
 0x8f7   :  { %6215 = vmatpush1.bf16.msra.mxu0 %v8274_v16  ;;  %6247 = vmatpush1.bf16.msra.mxu1 %v8277_v58 }
 0x8f8   :  { %6217 = vmatprep.subr.bf16.mxu0 %v8282_v50  ;;  %6249 = vmatprep.subr.bf16.mxu1 %v8284_v63 }
 0x8fb   :  { %6219 = vmatpush1.bf16.msra.mxu0 %v8286_v40  ;;  %6251 = vmatpush1.bf16.msra.mxu1 %v8289_v23 }
 0x8fc   :  { %6221 = vmatprep.subr.bf16.mxu0 %v8293_v42  ;;  %6253 = vmatprep.subr.bf16.mxu1 %v8295_v33 }
 0x8ff   :  { %6223 = vmatpush1.bf16.msra.mxu0 %v8298_v38  ;;  %6255 = vmatpush1.bf16.msra.mxu1 %v8302_v46 }
 0x900   :  { %6225 = vmatprep.subr.bf16.mxu0 %v8304_v48  ;;  %6257 = vmatprep.subr.bf16.mxu1 %v8306_v2 }
 0x903   :  { %6227 = vmatpush1.bf16.msra.mxu0 %v8309_v52  ;;  %6259 = vmatpush1.bf16.msra.mxu1 %v8313_v20 }
 0x904   :  { %6229 = vmatprep.subr.bf16.mxu0 %v8318_v55  ;;  %6261 = vmatprep.subr.bf16.mxu1 %v8320_v44 }
 0x907   :  { %6231 = vmatpush1.bf16.msra.mxu0 %v8322_v27  ;;  %6263 = vmatpush1.bf16.msra.mxu1 %v8325_v36 }
 0x908   :  { %6265 = vmatprep.subr.bf16.mxu0 %v8234_v43  ;;  %6297 = vmatprep.subr.bf16.mxu1 %v8236_v57 }
 0x9bd   :  { %v2914_v25 = vpop.f32.mrb[16].mxu0  ;;  %v2985_v22 = vpop.f32.mrb[16].mxu1 }
 0x9be   :  { %v6776_v35 = vadd.f32 %v2914_v25, %v8380_v54  ;;  %v2916_v31 = vpop.f32.mrb[17].mxu0  ;;  %v2987_v12 = vpop.f32.mrb[17].mxu1  ;;  %v6792_v14 = vadd.f32 %v2985_v22, %v8390_v24 }
 0x9bf   :  { %v6777_v29 = vadd.f32 %v2916_v31, %v8384_v6  ;;  %v6793_v45 = vadd.f32 %v2987_v12, %v8394_v11 }
 0x9c0   :  { %v5313_v47 = vmul.f32 -1.442695, %v6776_v35  ;;  %v5315_v53 = vmul.f32 -1.442695, %v6792_v14 }
 0x9c1   :  { %v5314_v0 = vmul.f32 -1.442695, %v6777_v29 }
 0x9c2   :  { %7020 = vpow2.f32 %v5313_v47 }
 0x9c3   :  { %7022 = vpow2.f32 %v5314_v0 }
 0x9c4   :  { %7024 = vtanh.f32 %v6793_v45 }
 0x9c5   :  { %7026 = vpow2.f32 %v5315_v53 }
 0x9cc   :  { %v7021_v15 = vpop.eup %7020 }
 0x9cd   :  { %v3003_v60 = vadd.f32 1.0, %v7021_v15  ;;  %v7023_v49 = vpop.eup %7022 }
 0x9ce   :  { %v3004_v18 = vadd.f32 1.0, %v7023_v49  ;;  %v7025_v17 = vpop.eup %7024 }
 0x9cf   :  { %7028 = vrcp.f32 %v3003_v60  ;;  %v7027_v56 = vpop.eup %7026 }
 0x9d0   :  { %7030 = vrcp.f32 %v3004_v18  ;;  %v3005_v37 = vadd.f32 1.0, %v7027_v56 }
 0x9d2   :  { %7032 = vrcp.f32 %v3005_v37 }
 0x9d9   :  { %v7029_v19 = vpop.eup %7028 }
 0x9da   :  { %v3014_v4 = vmul.f32 %v7029_v19, %v7025_v17  ;;  %v7031_v10 = vpop.eup %7030 }
 0x9db   :  { %v3013_v7 = vmul.f32 0.0, %v7031_v10 }
 0x9dc   :  { %v7033_v41 = vpop.eup %7032 }
 0x9dd   :  { %v8398_v32 = vadd.f32 %v3014_v4, %v3013_v7 }
 0x9df   :  { %7034 = vtanh.f32 %v8398_v32 }
 0x9e9   :  { %v7035_v8 = vpop.eup %7034 }
 0x9ea   :  { %v8406_v26 = vmul.f32 %v7035_v8, %v7033_v41 }
 0x9ec   :  { %3152 = vmatmul.mubr.f32.vlgmr.msra.gmra.mrb[18].mxu0 %v8406_v26  ;;  %3223 = vmatmul.mubr.f32.vlgmr.msra.gmra.mrb[18].mxu1 %v8406_v26  ;;  %v4714_v25 = vmul.f32 %v8404_v30, %v8406_v26 }
 0x9ed   :  { %6267 = vmatpush1.bf16.msra.mxu0 %v8238_v61  ;;  %6299 = vmatpush1.bf16.msra.mxu1 %v8241_v9 }
 0x9ee   :  { %4722 = vadd.xlane.f32.xlu0 %v4714_v25  ;;  %6269 = vmatprep.subr.bf16.mxu0 %v8246_v28 }
 0x9ef   :  { %6301 = vmatprep.subr.bf16.mxu1 %v8248_v5  ;;  %3391 = vmatprep.mubr.f32.mxu0 %v7416_v1 }
 0x9f0   :  { %3462 = vmatprep.mubr.f32.mxu1 %v7416_v1 }
 0x9f1   :  { %6271 = vmatpush1.bf16.msra.mxu0 %v8250_v3  ;;  %6303 = vmatpush1.bf16.msra.mxu1 %v8253_v39 }
 0x9f2   :  { %6273 = vmatprep.subr.bf16.mxu0 %v8258_v21  ;;  %6305 = vmatprep.subr.bf16.mxu1 %v8260_v51 }
 0x9f5   :  { %6275 = vmatpush1.bf16.msra.mxu0 %v8262_v62  ;;  %6307 = vmatpush1.bf16.msra.mxu1 %v8265_v34 }
 0x9f6   :  { %6277 = vmatprep.subr.bf16.mxu0 %v8270_v13  ;;  %6309 = vmatprep.subr.bf16.mxu1 %v8272_v59 }
 0x9f9   :  { %6279 = vmatpush1.bf16.msra.mxu0 %v8274_v16  ;;  %6311 = vmatpush1.bf16.msra.mxu1 %v8277_v58 }
 0x9fa   :  { %6281 = vmatprep.subr.bf16.mxu0 %v8282_v50  ;;  %6313 = vmatprep.subr.bf16.mxu1 %v8284_v63 }
 0x9fd   :  { %6283 = vmatpush1.bf16.msra.mxu0 %v8286_v40  ;;  %6315 = vmatpush1.bf16.msra.mxu1 %v8289_v23 }
 0x9fe   :  { %6285 = vmatprep.subr.bf16.mxu0 %v8293_v42  ;;  %6317 = vmatprep.subr.bf16.mxu1 %v8295_v33 }
 0xa01   :  { %6287 = vmatpush1.bf16.msra.mxu0 %v8298_v38  ;;  %6319 = vmatpush1.bf16.msra.mxu1 %v8302_v46 }
 0xa02   :  { %6289 = vmatprep.subr.bf16.mxu0 %v8304_v48  ;;  %6321 = vmatprep.subr.bf16.mxu1 %v8306_v2 }
 0xa05   :  { %6291 = vmatpush1.bf16.msra.mxu0 %v8309_v52  ;;  %6323 = vmatpush1.bf16.msra.mxu1 %v8313_v20 }
 0xa06   :  { %6293 = vmatprep.subr.bf16.mxu0 %v8318_v55  ;;  %6325 = vmatprep.subr.bf16.mxu1 %v8320_v44 }
 0xa09   :  { %6295 = vmatpush1.bf16.msra.mxu0 %v8322_v27  ;;  %6327 = vmatpush1.bf16.msra.mxu1 %v8325_v36 }
 0xa0a   :  { %6329 = vmatprep.subr.bf16.mxu0 %v8234_v43  ;;  %6361 = vmatprep.subr.bf16.mxu1 %v8236_v57 }
 0xabf   :  { %v3153_v22 = vpop.f32.mrb[18].mxu0  ;;  %v3224_v35 = vpop.f32.mrb[18].mxu1 }
 0xac0   :  { %v6778_v31 = vadd.f32 %v3153_v22, %v8380_v54  ;;  %v3155_v12 = vpop.f32.mrb[19].mxu0  ;;  %v3226_v29 = vpop.f32.mrb[19].mxu1  ;;  %v6794_v45 = vadd.f32 %v3224_v35, %v8390_v24  ;;  %v3750_v35 = vld [vmem:[#allocation14 + $0x38] sm:$0xff] }
 0xac1   :  { %v6779_v47 = vadd.f32 %v3155_v12, %v8384_v6  ;;  %v6795_v53 = vadd.f32 %v3226_v29, %v8394_v11  ;;  %v3747_v12 = vld [vmem:[#allocation14 + $0x20] sm:$0xff] }
 0xac2   :  { %v5316_v0 = vmul.f32 -1.442695, %v6778_v31  ;;  %v5318_v15 = vmul.f32 -1.442695, %v6794_v45  ;;  %v3743_v31 = vld [vmem:[#allocation14] sm:$0xff] }
 0xac3   :  { %v5317_v14 = vmul.f32 -1.442695, %v6779_v47  ;;  %v8512_v47 = vpack.c.bf16 %v3747_v12, %v3743_v31  ;;  %v3781_v31 = vld [vmem:[#allocation14 + $0x130] sm:$0xff] }
 0xac4   :  { %7036 = vpow2.f32 %v5316_v0  ;;  %v3745_v0 = vld [vmem:[#allocation14 + $0x10] sm:$0xff] }
 0xac5   :  { %7038 = vpow2.f32 %v5317_v14  ;;  %v3749_v14 = vld [vmem:[#allocation14 + $0x30] sm:$0xff] }
 0xac6   :  { %7040 = vtanh.f32 %v6795_v53  ;;  %v8515_v45 = vpack.c.bf16 %v3749_v14, %v3745_v0  ;;  %v3752_v53 = vld [vmem:[#allocation14 + $0x48] sm:$0xff] }
 0xac7   :  { %7042 = vpow2.f32 %v5318_v15  ;;  %v3756_v15 = vld [vmem:[#allocation14 + $0x68] sm:$0xff] }
 0xac8   :  { %v3784_v0 = vld [vmem:[#allocation14 + $0x148] sm:$0xff] }
 0xac9   :  { %v3788_v14 = vld [vmem:[#allocation14 + $0x168] sm:$0xff] }
 0xace   :  { %v7037_v43 = vpop.eup %7036 }
 0xacf   :  { %v3242_v60 = vadd.f32 1.0, %v7037_v43  ;;  %v7039_v57 = vpop.eup %7038  ;;  %v3754_v43 = vld [vmem:[#allocation14 + $0x58] sm:$0xff] }
 0xad0   :  { %v3243_v49 = vadd.f32 1.0, %v7039_v57  ;;  %v7041_v18 = vpop.eup %7040  ;;  %v3758_v57 = vld [vmem:[#allocation14 + $0x78] sm:$0xff] }
 0xad1   :  { %7044 = vrcp.f32 %v3242_v60  ;;  %v7043_v17 = vpop.eup %7042  ;;  %v8520_v60 = vpack.c.bf16 %v3756_v15, %v3752_v53  ;;  %v3786_v53 = vld [vmem:[#allocation14 + $0x158] sm:$0xff]  ;;  %v8568_v15 = vpack.c.bf16 %v3788_v14, %v3784_v0 }
 0xad2   :  { %7046 = vrcp.f32 %v3243_v49  ;;  %v3244_v10 = vadd.f32 1.0, %v7043_v17  ;;  %v3751_v49 = vld [vmem:[#allocation14 + $0x40] sm:$0xff]  ;;  %v8522_v17 = vpack.c.bf16 %v3758_v57, %v3754_v43  ;;  %v3790_v43 = vld [vmem:[#allocation14 + $0x178] sm:$0xff] }
 0xad3   :  { %v3783_v57 = vld [vmem:[#allocation14 + $0x140] sm:$0xff] }
 0xad4   :  { %7048 = vrcp.f32 %v3244_v10 }
 0xadb   :  { %v7045_v56 = vpop.eup %7044 }
 0xadc   :  { %v3253_v19 = vmul.f32 %v7045_v56, %v7041_v18  ;;  %v7047_v4 = vpop.eup %7046  ;;  %v3755_v18 = vld [vmem:[#allocation14 + $0x60] sm:$0xff] }
 0xadd   :  { %v3252_v37 = vmul.f32 %v7047_v4, %v8398_v32  ;;  %v8524_v56 = vpack.c.bf16 %v3755_v18, %v3751_v49  ;;  %v3757_v4 = vld [vmem:[#allocation14 + $0x70] sm:$0xff]  ;;  %v3787_v49 = vld [vmem:[#allocation14 + $0x160] sm:$0xff]  ;;  %v8570_v18 = vpack.c.bf16 %v3790_v43, %v3786_v53 }
 0xade   :  { %v7049_v41 = vpop.eup %7048 }
 0xadf   :  { %v8451_v7 = vadd.f32 %v3253_v19, %v3252_v37  ;;  %v3753_v19 = vld [vmem:[#allocation14 + $0x50] sm:$0xff]  ;;  %v3760_v37 = vld [vmem:[#allocation14 + $0x88] sm:$0xff] }
 0xae0   :  { %v8527_v10 = vpack.c.bf16 %v3757_v4, %v3753_v19  ;;  %v8572_v19 = vpack.c.bf16 %v3787_v49, %v3783_v57  ;;  %v3785_v4 = vld [vmem:[#allocation14 + $0x150] sm:$0xff] }
 0xae1   :  { %7050 = vtanh.f32 %v8451_v7 }
 0xaeb   :  { %v7051_v8 = vpop.eup %7050 }
 0xaec   :  { %v8454_v25 = vmul.f32 %v7051_v8, %v7049_v41  ;;  %v3762_v41 = vld [vmem:[#allocation14 + $0x98] sm:$0xff] }
 0xaee   :  { %3392 = vmatmul.mubr.f32.vlgmr.msra.gmra.mrb[20].mxu0 %v8454_v25  ;;  %3463 = vmatmul.mubr.f32.vlgmr.msra.gmra.mrb[20].mxu1 %v8454_v25  ;;  %v4715_v22 = vmul.f32 %v8404_v30, %v8454_v25 }
 0xaef   :  { %6331 = vmatpush1.bf16.msra.mxu0 %v8238_v61  ;;  %6363 = vmatpush1.bf16.msra.mxu1 %v8241_v9 }
 0xaf0   :  { %4724 = vadd.xlane.f32.xlu0 %v4715_v22  ;;  %6333 = vmatprep.subr.bf16.mxu0 %v8246_v28  ;;  %v3766_v22 = vld [vmem:[#allocation14 + $0xb8] sm:$0xff] }
 0xaf1   :  { %6365 = vmatprep.subr.bf16.mxu1 %v8248_v5  ;;  %3631 = vmatprep.mubr.f32.mxu0 %v7416_v1 }
 0xaf2   :  { %3702 = vmatprep.mubr.f32.mxu1 %v7416_v1 }
 0xaf3   :  { %6335 = vmatpush1.bf16.msra.mxu0 %v8250_v3  ;;  %6367 = vmatpush1.bf16.msra.mxu1 %v8253_v39 }
 0xaf4   :  { %6337 = vmatprep.subr.bf16.mxu0 %v8258_v21  ;;  %6369 = vmatprep.subr.bf16.mxu1 %v8260_v51 }
 0xaf7   :  { %6339 = vmatpush1.bf16.msra.mxu0 %v8262_v62  ;;  %6371 = vmatpush1.bf16.msra.mxu1 %v8265_v34 }
 0xaf8   :  { %6341 = vmatprep.subr.bf16.mxu0 %v8270_v13  ;;  %6373 = vmatprep.subr.bf16.mxu1 %v8272_v59 }
 0xafb   :  { %6343 = vmatpush1.bf16.msra.mxu0 %v8274_v16  ;;  %6375 = vmatpush1.bf16.msra.mxu1 %v8277_v58 }
 0xafc   :  { %6345 = vmatprep.subr.bf16.mxu0 %v8282_v50  ;;  %6377 = vmatprep.subr.bf16.mxu1 %v8284_v63 }
 0xaff   :  { %6347 = vmatpush1.bf16.msra.mxu0 %v8286_v40  ;;  %6379 = vmatpush1.bf16.msra.mxu1 %v8289_v23 }
 0xb00   :  { %6349 = vmatprep.subr.bf16.mxu0 %v8293_v42  ;;  %6381 = vmatprep.subr.bf16.mxu1 %v8295_v33 }
 0xb03   :  { %6351 = vmatpush1.bf16.msra.mxu0 %v8298_v38  ;;  %6383 = vmatpush1.bf16.msra.mxu1 %v8302_v46 }
 0xb04   :  { %6353 = vmatprep.subr.bf16.mxu0 %v8304_v48  ;;  %6385 = vmatprep.subr.bf16.mxu1 %v8306_v2 }
 0xb07   :  { %6355 = vmatpush1.bf16.msra.mxu0 %v8309_v52  ;;  %6387 = vmatpush1.bf16.msra.mxu1 %v8313_v20 }
 0xb08   :  { %6357 = vmatprep.subr.bf16.mxu0 %v8318_v55  ;;  %6389 = vmatprep.subr.bf16.mxu1 %v8320_v44  ;;  %v3744_v44 = vld [vmem:[#allocation14 + $0x8] sm:$0xff] }
 0xb0b   :  { %6359 = vmatpush1.bf16.msra.mxu0 %v8322_v27  ;;  %6391 = vmatpush1.bf16.msra.mxu1 %v8325_v36  ;;  %v3748_v27 = vld [vmem:[#allocation14 + $0x28] sm:$0xff]  ;;  %v3746_v36 = vld [vmem:[#allocation14 + $0x18] sm:$0xff] }
 0xb0c   :  { %v8508_v32 = vpack.c.bf16 %v3748_v27, %v3744_v44  ;;  %v8510_v29 = vpack.c.bf16 %v3750_v35, %v3746_v36  ;;  %v3779_v44 = vld [vmem:[#allocation14 + $0x120] sm:$0xff]  ;;  %v3777_v35 = vld [vmem:[#allocation14 + $0x110] sm:$0xff] }
 0xb0d   :  { %v8563_v12 = vpack.c.bf16 %v3781_v31, %v3777_v35  ;;  %v3801_v35 = vld [vmem:[#allocation14 + $0x1d0] sm:$0xff] }
 0xb0e   :  { %6393 = vmatprep.subr.bf16.mxu0 %v8508_v32  ;;  %6425 = vmatprep.subr.bf16.mxu1 %v8510_v29  ;;  %v3805_v31 = vld [vmem:[#allocation14 + $0x1f0] sm:$0xff] }
 0xb0f   :  { %v8599_v14 = vpack.c.bf16 %v3805_v31, %v3801_v35 }
 0xbc1   :  { %v3393_v61 = vpop.f32.mrb[20].mxu0  ;;  %v3464_v9 = vpop.f32.mrb[20].mxu1 }
 0xbc2   :  { %v6780_v28 = vadd.f32 %v3393_v61, %v8380_v54  ;;  %v3395_v5 = vpop.f32.mrb[21].mxu0  ;;  %v3466_v3 = vpop.f32.mrb[21].mxu1  ;;  %v6796_v62 = vadd.f32 %v3464_v9, %v8390_v24  ;;  %v3759_v61 = vld [vmem:[#allocation14 + $0x80] sm:$0xff] }
 0xbc3   :  { %v6781_v39 = vadd.f32 %v3395_v5, %v8384_v6  ;;  %v6797_v34 = vadd.f32 %v3466_v3, %v8394_v11  ;;  %v3763_v9 = vld [vmem:[#allocation14 + $0xa0] sm:$0xff]  ;;  %v3761_v3 = vld [vmem:[#allocation14 + $0x90] sm:$0xff] }
 0xbc4   :  { %v5319_v21 = vmul.f32 -1.442695, %v6780_v28  ;;  %v5321_v13 = vmul.f32 -1.442695, %v6796_v62  ;;  %v8534_v28 = vpack.c.bf16 %v3766_v22, %v3762_v41  ;;  %v8536_v5 = vpack.c.bf16 %v3763_v9, %v3759_v61  ;;  %v3772_v62 = vld [vmem:[#allocation14 + $0xe8] sm:$0xff]  ;;  %v3794_v61 = vld [vmem:[#allocation14 + $0x198] sm:$0xff] }
 0xbc5   :  { %v5320_v51 = vmul.f32 -1.442695, %v6781_v39  ;;  %v3765_v39 = vld [vmem:[#allocation14 + $0xb0] sm:$0xff]  ;;  %v3796_v22 = vld [vmem:[#allocation14 + $0x1a8] sm:$0xff]  ;;  %v3798_v9 = vld [vmem:[#allocation14 + $0x1b8] sm:$0xff] }
 0xbc6   :  { %7052 = vpow2.f32 %v5319_v21  ;;  %v8539_v21 = vpack.c.bf16 %v3765_v39, %v3761_v3  ;;  %v8581_v39 = vpack.c.bf16 %v3798_v9, %v3794_v61 }
 0xbc7   :  { %7054 = vpow2.f32 %v5320_v51  ;;  %v3768_v51 = vld [vmem:[#allocation14 + $0xc8] sm:$0xff] }
 0xbc8   :  { %7056 = vtanh.f32 %v6797_v34  ;;  %v3770_v34 = vld [vmem:[#allocation14 + $0xd8] sm:$0xff] }
 0xbc9   :  { %7058 = vpow2.f32 %v5321_v13  ;;  %v8544_v13 = vpack.c.bf16 %v3772_v62, %v3768_v51  ;;  %v3791_v51 = vld [vmem:[#allocation14 + $0x180] sm:$0xff] }
 0xbca   :  { %v3795_v62 = vld [vmem:[#allocation14 + $0x1a0] sm:$0xff] }
 0xbd0   :  { %v7053_v59 = vpop.eup %7052 }
 0xbd1   :  { %v3482_v16 = vadd.f32 1.0, %v7053_v59  ;;  %v7055_v58 = vpop.eup %7054  ;;  %v3774_v59 = vld [vmem:[#allocation14 + $0xf8] sm:$0xff] }
 0xbd2   :  { %v3483_v50 = vadd.f32 1.0, %v7055_v58  ;;  %v7057_v63 = vpop.eup %7056  ;;  %v3771_v58 = vld [vmem:[#allocation14 + $0xe0] sm:$0xff] }
 0xbd3   :  { %7060 = vrcp.f32 %v3482_v16  ;;  %v7059_v40 = vpop.eup %7058  ;;  %v3767_v16 = vld [vmem:[#allocation14 + $0xc0] sm:$0xff] }
 0xbd4   :  { %7062 = vrcp.f32 %v3483_v50  ;;  %v3484_v38 = vadd.f32 1.0, %v7059_v40  ;;  %v8546_v50 = vpack.c.bf16 %v3774_v59, %v3770_v34  ;;  %v3769_v40 = vld [vmem:[#allocation14 + $0xd0] sm:$0xff]  ;;  %v8584_v59 = vpack.c.bf16 %v3795_v62, %v3791_v51 }
 0xbd5   :  { %v3793_v34 = vld [vmem:[#allocation14 + $0x190] sm:$0xff] }
 0xbd6   :  { %7064 = vrcp.f32 %v3484_v38  ;;  %v3780_v38 = vld [vmem:[#allocation14 + $0x128] sm:$0xff] }
 0xbdd   :  { %v7061_v23 = vpop.eup %7060 }
 0xbde   :  { %v3493_v42 = vmul.f32 %v7061_v23, %v7057_v63  ;;  %v7063_v33 = vpop.eup %7062  ;;  %v8548_v63 = vpack.c.bf16 %v3771_v58, %v3767_v16  ;;  %v3773_v23 = vld [vmem:[#allocation14 + $0xf0] sm:$0xff]  ;;  %v3800_v58 = vld [vmem:[#allocation14 + $0x1c8] sm:$0xff] }
 0xbdf   :  { %v3492_v46 = vmul.f32 %v7063_v33, %v8451_v7  ;;  %v3764_v7 = vld [vmem:[#allocation14 + $0xa8] sm:$0xff]  ;;  %v3797_v16 = vld [vmem:[#allocation14 + $0x1b0] sm:$0xff] }
 0xbe0   :  { %v7065_v2 = vpop.eup %7064  ;;  %v8532_v8 = vpack.c.bf16 %v3764_v7, %v3760_v37  ;;  %v3776_v33 = vld [vmem:[#allocation14 + $0x108] sm:$0xff]  ;;  %v3789_v37 = vld [vmem:[#allocation14 + $0x170] sm:$0xff] }
 0xbe1   :  { %v8497_v48 = vadd.f32 %v3493_v42, %v3492_v46  ;;  %v8551_v42 = vpack.c.bf16 %v3773_v23, %v3769_v40  ;;  %v3778_v46 = vld [vmem:[#allocation14 + $0x118] sm:$0xff]  ;;  %v3792_v7 = vld [vmem:[#allocation14 + $0x188] sm:$0xff]  ;;  %v8575_v41 = vpack.c.bf16 %v3789_v37, %v3785_v4  ;;  %v8588_v23 = vpack.c.bf16 %v3797_v16, %v3793_v34 }
 0xbe2   :  { %v8579_v3 = vpack.c.bf16 %v3796_v22, %v3792_v7  ;;  %v3804_v40 = vld [vmem:[#allocation14 + $0x1e8] sm:$0xff] }
 0xbe3   :  { %7066 = vtanh.f32 %v8497_v48 }
 0xbed   :  { %v7067_v52 = vpop.eup %7066 }
 0xbee   :  { %v8500_v20 = vmul.f32 %v7067_v52, %v7065_v2  ;;  %v8556_v2 = vpack.c.bf16 %v3780_v38, %v3776_v33  ;;  %v3782_v52 = vld [vmem:[#allocation14 + $0x138] sm:$0xff]  ;;  %v8590_v33 = vpack.c.bf16 %v3804_v40, %v3800_v58 }
 0xbef   :  { %v8558_v27 = vpack.c.bf16 %v3782_v52, %v3778_v46  ;;  %v3802_v38 = vld [vmem:[#allocation14 + $0x1d8] sm:$0xff]  ;;  %v3799_v52 = vld [vmem:[#allocation14 + $0x1c0] sm:$0xff] }
 0xbf0   :  { %3632 = vmatmul.mubr.f32.vlgmr.msra.gmra.mrb[22].mxu0 %v8500_v20  ;;  %3703 = vmatmul.mubr.f32.vlgmr.msra.gmra.mrb[22].mxu1 %v8500_v20  ;;  %v4716_v55 = vmul.f32 %v8404_v30, %v8500_v20  ;;  %v3806_v46 = vld [vmem:[#allocation14 + $0x1f8] sm:$0xff] }
 0xbf1   :  { %3871 = vmatprep.mubr.f32.mxu0 %v7416_v1  ;;  %3942 = vmatprep.mubr.f32.mxu1 %v7416_v1 }
 0xbf2   :  { %4726 = vadd.xlane.f32.xlu1 %v4716_v55  ;;  %6395 = vmatpush1.bf16.msra.mxu0 %v8512_v47  ;;  %v3775_v55 = vld [vmem:[#allocation14 + $0x100] sm:$0xff] }
 0xbf3   :  { %6427 = vmatpush1.bf16.msra.mxu1 %v8515_v45  ;;  %6397 = vmatprep.subr.bf16.mxu0 %v8520_v60  ;;  %v8560_v36 = vpack.c.bf16 %v3779_v44, %v3775_v55  ;;  %v8592_v55 = vpack.c.bf16 %v3806_v46, %v3802_v38  ;;  %v3803_v44 = vld [vmem:[#allocation14 + $0x1e0] sm:$0xff] }
 0xbf4   :  { %6429 = vmatprep.subr.bf16.mxu1 %v8522_v17  ;;  %v8595_v0 = vpack.c.bf16 %v3803_v44, %v3799_v52 }
 0xbf6   :  { %6399 = vmatpush1.bf16.msra.mxu0 %v8524_v56 }
 0xbf7   :  { %6431 = vmatpush1.bf16.msra.mxu1 %v8527_v10  ;;  %6401 = vmatprep.subr.bf16.mxu0 %v8532_v8 }
 0xbf8   :  { %6433 = vmatprep.subr.bf16.mxu1 %v8534_v28 }
 0xbfa   :  { %6403 = vmatpush1.bf16.msra.mxu0 %v8536_v5 }
 0xbfb   :  { %6435 = vmatpush1.bf16.msra.mxu1 %v8539_v21  ;;  %6405 = vmatprep.subr.bf16.mxu0 %v8544_v13 }
 0xbfc   :  { %6437 = vmatprep.subr.bf16.mxu1 %v8546_v50 }
 0xbfe   :  { %6407 = vmatpush1.bf16.msra.mxu0 %v8548_v63 }
 0xbff   :  { %6439 = vmatpush1.bf16.msra.mxu1 %v8551_v42  ;;  %6409 = vmatprep.subr.bf16.mxu0 %v8556_v2 }
 0xc00   :  { %6441 = vmatprep.subr.bf16.mxu1 %v8558_v27 }
 0xc02   :  { %6411 = vmatpush1.bf16.msra.mxu0 %v8560_v36 }
 0xc03   :  { %6443 = vmatpush1.bf16.msra.mxu1 %v8563_v12  ;;  %6413 = vmatprep.subr.bf16.mxu0 %v8568_v15 }
 0xc04   :  { %6445 = vmatprep.subr.bf16.mxu1 %v8570_v18 }
 0xc06   :  { %6415 = vmatpush1.bf16.msra.mxu0 %v8572_v19 }
 0xc07   :  { %6447 = vmatpush1.bf16.msra.mxu1 %v8575_v41  ;;  %6417 = vmatprep.subr.bf16.mxu0 %v8579_v3 }
 0xc08   :  { %6449 = vmatprep.subr.bf16.mxu1 %v8581_v39 }
 0xc0a   :  { %6419 = vmatpush1.bf16.msra.mxu0 %v8584_v59 }
 0xc0b   :  { %6451 = vmatpush1.bf16.msra.mxu1 %v8588_v23  ;;  %6421 = vmatprep.subr.bf16.mxu0 %v8590_v33 }
 0xc0c   :  { %6453 = vmatprep.subr.bf16.mxu1 %v8592_v55 }
 0xc0e   :  { %6423 = vmatpush1.bf16.msra.mxu0 %v8595_v0 }
 0xc0f   :  { %6455 = vmatpush1.bf16.msra.mxu1 %v8599_v14  ;;  %6457 = vmatprep.subr.bf16.mxu0 %v8508_v32 }
 0xc10   :  { %6489 = vmatprep.subr.bf16.mxu1 %v8510_v29 }
 0xcc3   :  { %v3633_v53 = vpop.f32.mrb[22].mxu0  ;;  %v3704_v43 = vpop.f32.mrb[22].mxu1 }
 0xcc4   :  { %v6782_v57 = vadd.f32 %v3633_v53, %v8380_v54  ;;  %v3635_v49 = vpop.f32.mrb[23].mxu0  ;;  %v3706_v4 = vpop.f32.mrb[23].mxu1  ;;  %v6798_v61 = vadd.f32 %v3704_v43, %v8390_v24 }
 0xcc5   :  { %v6783_v37 = vadd.f32 %v3635_v49, %v8384_v6  ;;  %v6799_v9 = vadd.f32 %v3706_v4, %v8394_v11 }
 0xcc6   :  { %v5322_v7 = vmul.f32 -1.442695, %v6782_v57  ;;  %v5324_v51 = vmul.f32 -1.442695, %v6798_v61 }
 0xcc7   :  { %v5323_v22 = vmul.f32 -1.442695, %v6783_v37 }
 0xcc8   :  { %7068 = vpow2.f32 %v5322_v7 }
 0xcc9   :  { %7070 = vpow2.f32 %v5323_v22 }
 0xcca   :  { %7072 = vtanh.f32 %v6799_v9 }
 0xccb   :  { %7074 = vpow2.f32 %v5324_v51 }
 0xcd2   :  { %v7069_v62 = vpop.eup %7068 }
 0xcd3   :  { %v3722_v34 = vadd.f32 1.0, %v7069_v62  ;;  %v7071_v16 = vpop.eup %7070 }
 0xcd4   :  { %v3723_v58 = vadd.f32 1.0, %v7071_v16  ;;  %v7073_v40 = vpop.eup %7072 }
 0xcd5   :  { %7076 = vrcp.f32 %v3722_v34  ;;  %v7075_v38 = vpop.eup %7074 }
 0xcd6   :  { %7078 = vrcp.f32 %v3723_v58  ;;  %v3724_v35 = vadd.f32 1.0, %v7075_v38 }
 0xcd8   :  { %7080 = vrcp.f32 %v3724_v35 }
 0xcdf   :  { %v7077_v46 = vpop.eup %7076 }
 0xce0   :  { %v3733_v52 = vmul.f32 %v7077_v46, %v7073_v40  ;;  %v7079_v44 = vpop.eup %7078 }
 0xce1   :  { %v3732_v31 = vmul.f32 %v7079_v44, %v8497_v48 }
 0xce2   :  { %v7081_v43 = vpop.eup %7080 }
 0xce3   :  { %v8611_v53 = vadd.f32 %v3733_v52, %v3732_v31 }
 0xce5   :  { %7082 = vtanh.f32 %v8611_v53 }
 0xcef   :  { %v7083_v57 = vpop.eup %7082 }
 0xcf0   :  { %v8614_v49 = vmul.f32 %v7083_v57, %v7081_v43 }
 0xcf2   :  { %3872 = vmatmul.mubr.f32.vlgmr.msra.gmra.mrb[24].mxu0 %v8614_v49  ;;  %3943 = vmatmul.mubr.f32.vlgmr.msra.gmra.mrb[24].mxu1 %v8614_v49  ;;  %v4717_v4 = vmul.f32 %v8404_v30, %v8614_v49 }
 0xcf3   :  { %6459 = vmatpush1.bf16.msra.mxu0 %v8512_v47  ;;  %6491 = vmatpush1.bf16.msra.mxu1 %v8515_v45 }
 0xcf4   :  { %4728 = vadd.xlane.f32.xlu1 %v4717_v4  ;;  %6461 = vmatprep.subr.bf16.mxu0 %v8520_v60 }
 0xcf5   :  { %6493 = vmatprep.subr.bf16.mxu1 %v8522_v17  ;;  %4111 = vmatprep.mubr.f32.mxu0 %v7416_v1 }
 0xcf6   :  { %4182 = vmatprep.mubr.f32.mxu1 %v7416_v1 }
 0xcf7   :  { %6463 = vmatpush1.bf16.msra.mxu0 %v8524_v56  ;;  %6495 = vmatpush1.bf16.msra.mxu1 %v8527_v10 }
 0xcf8   :  { %6465 = vmatprep.subr.bf16.mxu0 %v8532_v8  ;;  %6497 = vmatprep.subr.bf16.mxu1 %v8534_v28 }
 0xcfb   :  { %6467 = vmatpush1.bf16.msra.mxu0 %v8536_v5  ;;  %6499 = vmatpush1.bf16.msra.mxu1 %v8539_v21 }
 0xcfc   :  { %6469 = vmatprep.subr.bf16.mxu0 %v8544_v13  ;;  %6501 = vmatprep.subr.bf16.mxu1 %v8546_v50 }
 0xcff   :  { %6471 = vmatpush1.bf16.msra.mxu0 %v8548_v63  ;;  %6503 = vmatpush1.bf16.msra.mxu1 %v8551_v42 }
 0xd00   :  { %6473 = vmatprep.subr.bf16.mxu0 %v8556_v2  ;;  %6505 = vmatprep.subr.bf16.mxu1 %v8558_v27 }
 0xd03   :  { %6475 = vmatpush1.bf16.msra.mxu0 %v8560_v36  ;;  %6507 = vmatpush1.bf16.msra.mxu1 %v8563_v12 }
 0xd04   :  { %6477 = vmatprep.subr.bf16.mxu0 %v8568_v15  ;;  %6509 = vmatprep.subr.bf16.mxu1 %v8570_v18 }
 0xd07   :  { %6479 = vmatpush1.bf16.msra.mxu0 %v8572_v19  ;;  %6511 = vmatpush1.bf16.msra.mxu1 %v8575_v41 }
 0xd08   :  { %6481 = vmatprep.subr.bf16.mxu0 %v8579_v3  ;;  %6513 = vmatprep.subr.bf16.mxu1 %v8581_v39 }
 0xd0b   :  { %6483 = vmatpush1.bf16.msra.mxu0 %v8584_v59  ;;  %6515 = vmatpush1.bf16.msra.mxu1 %v8588_v23 }
 0xd0c   :  { %6485 = vmatprep.subr.bf16.mxu0 %v8590_v33  ;;  %6517 = vmatprep.subr.bf16.mxu1 %v8592_v55 }
 0xd0f   :  { %6487 = vmatpush1.bf16.msra.mxu0 %v8595_v0  ;;  %6519 = vmatpush1.bf16.msra.mxu1 %v8599_v14 }
 0xd10   :  { %6521 = vmatprep.subr.bf16.mxu0 %v8508_v32  ;;  %6553 = vmatprep.subr.bf16.mxu1 %v8510_v29 }
 0xdc5   :  { %v3873_v48 = vpop.f32.mrb[24].mxu0  ;;  %v3944_v37 = vpop.f32.mrb[24].mxu1 }
 0xdc6   :  { %v6784_v7 = vadd.f32 %v3873_v48, %v8380_v54  ;;  %v3875_v22 = vpop.f32.mrb[25].mxu0  ;;  %v3946_v61 = vpop.f32.mrb[25].mxu1  ;;  %v6800_v34 = vadd.f32 %v3944_v37, %v8390_v24 }
 0xdc7   :  { %v6785_v9 = vadd.f32 %v3875_v22, %v8384_v6  ;;  %v6801_v16 = vadd.f32 %v3946_v61, %v8394_v11 }
 0xdc8   :  { %v5325_v51 = vmul.f32 -1.442695, %v6784_v7  ;;  %v5327_v58 = vmul.f32 -1.442695, %v6800_v34 }
 0xdc9   :  { %v5326_v62 = vmul.f32 -1.442695, %v6785_v9 }
 0xdca   :  { %7084 = vpow2.f32 %v5325_v51 }
 0xdcb   :  { %7086 = vpow2.f32 %v5326_v62 }
 0xdcc   :  { %7088 = vtanh.f32 %v6801_v16 }
 0xdcd   :  { %7090 = vpow2.f32 %v5327_v58 }
 0xdd4   :  { %v7085_v40 = vpop.eup %7084 }
 0xdd5   :  { %v3962_v38 = vadd.f32 1.0, %v7085_v40  ;;  %v7087_v46 = vpop.eup %7086 }
 0xdd6   :  { %v3963_v52 = vadd.f32 1.0, %v7087_v46  ;;  %v7089_v44 = vpop.eup %7088 }
 0xdd7   :  { %7092 = vrcp.f32 %v3962_v38  ;;  %v7091_v35 = vpop.eup %7090 }
 0xdd8   :  { %7094 = vrcp.f32 %v3963_v52  ;;  %v3964_v4 = vadd.f32 1.0, %v7091_v35 }
 0xdda   :  { %7096 = vrcp.f32 %v3964_v4 }
 0xde1   :  { %v7093_v31 = vpop.eup %7092 }
 0xde2   :  { %v3973_v43 = vmul.f32 %v7093_v31, %v7089_v44  ;;  %v7095_v57 = vpop.eup %7094 }
 0xde3   :  { %v3972_v48 = vmul.f32 %v7095_v57, %v8611_v53 }
 0xde4   :  { %v7097_v7 = vpop.eup %7096 }
 0xde5   :  { %v8659_v37 = vadd.f32 %v3973_v43, %v3972_v48 }
 0xde7   :  { %7098 = vtanh.f32 %v8659_v37 }
 0xdf1   :  { %v7099_v22 = vpop.eup %7098 }
 0xdf2   :  { %v8662_v61 = vmul.f32 %v7099_v22, %v7097_v7 }
 0xdf4   :  { %4112 = vmatmul.mubr.f32.vlgmr.msra.gmra.mrb[26].mxu0 %v8662_v61  ;;  %4183 = vmatmul.mubr.f32.vlgmr.msra.gmra.mrb[26].mxu1 %v8662_v61  ;;  %v4718_v9 = vmul.f32 %v8404_v30, %v8662_v61 }
 0xdf5   :  { %6523 = vmatpush1.bf16.msra.mxu0 %v8512_v47  ;;  %6555 = vmatpush1.bf16.msra.mxu1 %v8515_v45 }
 0xdf6   :  { %4730 = vadd.xlane.f32.xlu0 %v4718_v9  ;;  %6525 = vmatprep.subr.bf16.mxu0 %v8520_v60 }
 0xdf7   :  { %6557 = vmatprep.subr.bf16.mxu1 %v8522_v17  ;;  %4351 = vmatprep.mubr.f32.mxu0 %v7416_v1 }
 0xdf8   :  { %4422 = vmatprep.mubr.f32.mxu1 %v7416_v1 }
 0xdf9   :  { %6527 = vmatpush1.bf16.msra.mxu0 %v8524_v56  ;;  %6559 = vmatpush1.bf16.msra.mxu1 %v8527_v10 }
 0xdfa   :  { %6529 = vmatprep.subr.bf16.mxu0 %v8532_v8  ;;  %6561 = vmatprep.subr.bf16.mxu1 %v8534_v28 }
 0xdfd   :  { %6531 = vmatpush1.bf16.msra.mxu0 %v8536_v5  ;;  %6563 = vmatpush1.bf16.msra.mxu1 %v8539_v21 }
 0xdfe   :  { %6533 = vmatprep.subr.bf16.mxu0 %v8544_v13  ;;  %6565 = vmatprep.subr.bf16.mxu1 %v8546_v50 }
 0xe01   :  { %6535 = vmatpush1.bf16.msra.mxu0 %v8548_v63  ;;  %6567 = vmatpush1.bf16.msra.mxu1 %v8551_v42 }
 0xe02   :  { %6537 = vmatprep.subr.bf16.mxu0 %v8556_v2  ;;  %6569 = vmatprep.subr.bf16.mxu1 %v8558_v27 }
 0xe05   :  { %6539 = vmatpush1.bf16.msra.mxu0 %v8560_v36  ;;  %6571 = vmatpush1.bf16.msra.mxu1 %v8563_v12 }
 0xe06   :  { %6541 = vmatprep.subr.bf16.mxu0 %v8568_v15  ;;  %6573 = vmatprep.subr.bf16.mxu1 %v8570_v18 }
 0xe09   :  { %6543 = vmatpush1.bf16.msra.mxu0 %v8572_v19  ;;  %6575 = vmatpush1.bf16.msra.mxu1 %v8575_v41 }
 0xe0a   :  { %6545 = vmatprep.subr.bf16.mxu0 %v8579_v3  ;;  %6577 = vmatprep.subr.bf16.mxu1 %v8581_v39 }
 0xe0d   :  { %6547 = vmatpush1.bf16.msra.mxu0 %v8584_v59  ;;  %6579 = vmatpush1.bf16.msra.mxu1 %v8588_v23 }
 0xe0e   :  { %6549 = vmatprep.subr.bf16.mxu0 %v8590_v33  ;;  %6581 = vmatprep.subr.bf16.mxu1 %v8592_v55 }
 0xe11   :  { %6551 = vmatpush1.bf16.msra.mxu0 %v8595_v0  ;;  %6583 = vmatpush1.bf16.msra.mxu1 %v8599_v14 }
 0xe12   :  { %6585 = vmatprep.subr.bf16.mxu0 %v8508_v32  ;;  %6617 = vmatprep.subr.bf16.mxu1 %v8510_v29 }
 0xec7   :  { %v4113_v53 = vpop.f32.mrb[26].mxu0  ;;  %v4184_v51 = vpop.f32.mrb[26].mxu1 }
 0xec8   :  { %v6786_v62 = vadd.f32 %v4113_v53, %v8380_v54  ;;  %v4115_v34 = vpop.f32.mrb[27].mxu0  ;;  %v4186_v16 = vpop.f32.mrb[27].mxu1  ;;  %v6802_v46 = vadd.f32 %v4184_v51, %v8390_v24 }
 0xec9   :  { %v6787_v58 = vadd.f32 %v4115_v34, %v8384_v6  ;;  %v6803_v52 = vadd.f32 %v4186_v16, %v8394_v11 }
 0xeca   :  { %v5328_v40 = vmul.f32 -1.442695, %v6786_v62  ;;  %v5330_v44 = vmul.f32 -1.442695, %v6802_v46 }
 0xecb   :  { %v5329_v38 = vmul.f32 -1.442695, %v6787_v58 }
 0xecc   :  { %7100 = vpow2.f32 %v5328_v40 }
 0xecd   :  { %7102 = vpow2.f32 %v5329_v38 }
 0xece   :  { %7104 = vtanh.f32 %v6803_v52 }
 0xecf   :  { %7106 = vpow2.f32 %v5330_v44 }
 0xed6   :  { %v7101_v32 = vpop.eup %7100 }
 0xed7   :  { %v4202_v35 = vadd.f32 1.0, %v7101_v32  ;;  %v7103_v29 = vpop.eup %7102 }
 0xed8   :  { %v4203_v31 = vadd.f32 1.0, %v7103_v29  ;;  %v7105_v43 = vpop.eup %7104 }
 0xed9   :  { %7108 = vrcp.f32 %v4202_v35  ;;  %v7107_v57 = vpop.eup %7106 }
 0xeda   :  { %7110 = vrcp.f32 %v4203_v31  ;;  %v4204_v22 = vadd.f32 1.0, %v7107_v57 }
 0xedc   :  { %7112 = vrcp.f32 %v4204_v22 }
 0xee3   :  { %v7109_v4 = vpop.eup %7108 }
 0xee4   :  { %v4213_v48 = vmul.f32 %v7109_v4, %v7105_v43  ;;  %v7111_v7 = vpop.eup %7110 }
 0xee5   :  { %v4212_v9 = vmul.f32 %v7111_v7, %v8659_v37 }
 0xee6   :  { %v7113_v51 = vpop.eup %7112 }
 0xee7   :  { %v8707_v53 = vadd.f32 %v4213_v48, %v4212_v9 }
 0xee9   :  { %7114 = vtanh.f32 %v8707_v53 }
 0xef3   :  { %v7115_v62 = vpop.eup %7114 }
 0xef4   :  { %v8710_v34 = vmul.f32 %v7115_v62, %v7113_v51  ;;  %v7417_v62 = vmov 0  }
 0xef5   :  { %6891 = vset.pattern.permute.xlu1 %v7417_v62  ;;  %6890 = vset.pattern.permute.xlu0 %v7417_v62 }
 0xef6   :  { %4352 = vmatmul.mubr.f32.vlgmr.msra.gmra.mrb[28].mxu0 %v8710_v34  ;;  %4423 = vmatmul.mubr.f32.vlgmr.msra.gmra.mrb[28].mxu1 %v8710_v34  ;;  %v4719_v16 = vmul.f32 %v8404_v30, %v8710_v34 }
 0xef7   :  { %6587 = vmatpush1.bf16.msra.mxu0 %v8512_v47  ;;  %6619 = vmatpush1.bf16.msra.mxu1 %v8515_v45 }
 0xef8   :  { %4732 = vadd.xlane.f32.xlu1 %v4719_v16  ;;  %6589 = vmatprep.subr.bf16.mxu0 %v8520_v60  ;;  %v4872_v16 = vld [vmem:[#allocation15] sm:$0xff] }
 0xef9   :  { %6621 = vmatprep.subr.bf16.mxu1 %v8522_v17  ;;  %4591 = vmatprep.mubr.f32.mxu0 %v7416_v1 }
 0xefa   :  { %4662 = vmatprep.mubr.f32.mxu1 %v7416_v1 }
 0xefb   :  { %6591 = vmatpush1.bf16.msra.mxu0 %v8524_v56  ;;  %6623 = vmatpush1.bf16.msra.mxu1 %v8527_v10 }
 0xefc   :  { %6593 = vmatprep.subr.bf16.mxu0 %v8532_v8  ;;  %6625 = vmatprep.subr.bf16.mxu1 %v8534_v28 }
 0xeff   :  { %6595 = vmatpush1.bf16.msra.mxu0 %v8536_v5  ;;  %6627 = vmatpush1.bf16.msra.mxu1 %v8539_v21 }
 0xf00   :  { %6597 = vmatprep.subr.bf16.mxu0 %v8544_v13  ;;  %6629 = vmatprep.subr.bf16.mxu1 %v8546_v50 }
 0xf03   :  { %6599 = vmatpush1.bf16.msra.mxu0 %v8548_v63  ;;  %6631 = vmatpush1.bf16.msra.mxu1 %v8551_v42 }
 0xf04   :  { %6601 = vmatprep.subr.bf16.mxu0 %v8556_v2  ;;  %6633 = vmatprep.subr.bf16.mxu1 %v8558_v27 }
 0xf07   :  { %6603 = vmatpush1.bf16.msra.mxu0 %v8560_v36  ;;  %6635 = vmatpush1.bf16.msra.mxu1 %v8563_v12 }
 0xf08   :  { %6605 = vmatprep.subr.bf16.mxu0 %v8568_v15  ;;  %6637 = vmatprep.subr.bf16.mxu1 %v8570_v18 }
 0xf0b   :  { %6607 = vmatpush1.bf16.msra.mxu0 %v8572_v19  ;;  %6639 = vmatpush1.bf16.msra.mxu1 %v8575_v41 }
 0xf0c   :  { %6609 = vmatprep.subr.bf16.mxu0 %v8579_v3  ;;  %6641 = vmatprep.subr.bf16.mxu1 %v8581_v39 }
 0xf0f   :  { %6611 = vmatpush1.bf16.msra.mxu0 %v8584_v59  ;;  %6643 = vmatpush1.bf16.msra.mxu1 %v8588_v23  ;;  %v7170_v23 = vld [vmem:[%s8863_s7] ss:$0 sm:$0xff] }
 0xf10   :  { %6613 = vmatprep.subr.bf16.mxu0 %v8590_v33  ;;  %6645 = vmatprep.subr.bf16.mxu1 %v8592_v55 }
 0xf13   :  { %6615 = vmatpush1.bf16.msra.mxu0 %v8595_v0  ;;  %6647 = vmatpush1.bf16.msra.mxu1 %v8599_v14 }
 0xfc9   :  { %v4353_v30 = vpop.f32.mrb[28].mxu0  ;;  %v4424_v47 = vpop.f32.mrb[28].mxu1 }
 0xfca   :  { %v6788_v45 = vadd.f32 %v4353_v30, %v8380_v54  ;;  %v4355_v60 = vpop.f32.mrb[29].mxu0  ;;  %v4426_v17 = vpop.f32.mrb[29].mxu1  ;;  %v6804_v28 = vadd.f32 %v4424_v47, %v8390_v24  ;;  %v4873_v30 = vld [vmem:[#allocation15 + $0x8] sm:$0xff]  ;;  %v7418_v47 = vmov 0.0|0.0  }
 0xfcb   :  { %v6789_v56 = vadd.f32 %v4355_v60, %v8384_v6  ;;  %v6805_v5 = vadd.f32 %v4426_v17, %v8394_v11  ;;  %6648 = vmatprep.subr.bf16.mxu0 %v7418_v47  ;;  %6672 = vmatprep.subr.bf16.mxu1 %v7418_v47  ;;  %v4723_v60 = vpop.xlane.xlu0 %4722  ;;  %v4727_v17 = vpop.xlane.xlu1 %4726 }
 0xfcc   :  { %v5331_v10 = vmul.f32 -1.442695, %v6788_v45  ;;  %v5333_v21 = vmul.f32 -1.442695, %v6804_v28  ;;  %v6649_v45 = vpack.c.bf16 %v4873_v30, %v4872_v16 }
 0xfcd   :  { %v5332_v8 = vmul.f32 -1.442695, %v6789_v56 }
 0xfce   :  { %7116 = vpow2.f32 %v5331_v10 }
 0xfcf   :  { %7118 = vpow2.f32 %v5332_v8  ;;  %v4725_v56 = vpop.xlane.xlu0 %4724  ;;  %v4729_v10 = vpop.xlane.xlu1 %4728 }
 0xfd0   :  { %7120 = vtanh.f32 %v6805_v5  ;;  %v5338_v5 = vld [vmem:[#allocation5] ss:$0 sm:$0xff] }
 0xfd1   :  { %7122 = vpow2.f32 %v5333_v21 }
 0xfd3   :  { %v4731_v8 = vpop.xlane.xlu0 %4730  ;;  %v4733_v28 = vpop.xlane.xlu1 %4732 }
 0xfd8   :  { %v7117_v13 = vpop.eup %7116 }
 0xfd9   :  { %v4442_v50 = vadd.f32 1.0, %v7117_v13  ;;  %v7119_v63 = vpop.eup %7118  ;;  %v4750_v13 = vadd.f32 %v5338_v5, %v4733_v28 }
 0xfda   :  { %v4443_v42 = vadd.f32 1.0, %v7119_v63  ;;  %v7121_v2 = vpop.eup %7120  ;;  %v4749_v63 = vadd.f32 %v5338_v5, %v4731_v8 }
 0xfdb   :  { %7124 = vrcp.f32 %v4442_v50  ;;  %v7123_v27 = vpop.eup %7122  ;;  %v4746_v50 = vadd.f32 %v5338_v5, %v4725_v56 }
 0xfdc   :  { %7126 = vrcp.f32 %v4443_v42  ;;  %v4444_v18 = vadd.f32 1.0, %v7123_v27  ;;  %v4747_v27 = vadd.f32 %v5338_v5, %v4727_v17 }
 0xfde   :  { %7128 = vrcp.f32 %v4444_v18  ;;  %v4755_v18 = vsel %vm4753_vm1, %v4746_v50, -inf }
 0xfe5   :  { %v7125_v36 = vpop.eup %7124 }
 0xfe6   :  { %v4453_v12 = vmul.f32 %v7125_v36, %v7121_v2  ;;  %v7127_v15 = vpop.eup %7126  ;;  %v4745_v2 = vadd.f32 %v5338_v5, %v4723_v60  ;;  %v4748_v36 = vadd.f32 %v5338_v5, %v4729_v10 }
 0xfe7   :  { %v4452_v19 = vmul.f32 %v7127_v15, %v8707_v53 }
 0xfe8   :  { %v7129_v3 = vpop.eup %7128 }
 0xfe9   :  { %v4454_v41 = vadd.f32 %v4453_v12, %v4452_v19  ;;  %v4760_v12 = vsel %vm4753_vm1, %v4750_v13, -inf  ;;  %v4758_v19 = vsel %vm4753_vm1, %v4749_v63, -inf }
 0xfeb   :  { %7130 = vtanh.f32 %v4454_v41 }
 0xff5   :  { %v7131_v39 = vpop.eup %7130 }
 0xff6   :  { %v8753_v59 = vmul.f32 %v7131_v39, %v7129_v3  ;;  %v4761_v39 = vmax.f32 %v4755_v18, %v4760_v12 }
 0xff8   :  { %4592 = vmatmul.mubr.f32.vlgmr.msra.gmra.mrb[30].mxu0 %v8753_v59  ;;  %4663 = vmatmul.mubr.f32.vlgmr.msra.gmra.mrb[30].mxu1 %v8753_v59  ;;  %v4720_v33 = vmul.f32 %v7170_v23, %v8753_v59 }
 0xff9   :  { %6650 = vmatpush3.bf16.msra.mxu0 %v6649_v45  ;;  %5444 = vmatprep.mubr.msk.f32.mxu0 %vm7419_vm2, %v7416_v1 }
 0xffa   :  { %4734 = vadd.xlane.f32.xlu0 %v4720_v33  ;;  %6651 = vmatprep.subr.bf16.mxu0 %v7418_v47  ;;  %v4756_v33 = vsel %vm4753_vm1, %v4747_v27, -inf }
 0xffb   :  { %5479 = vmatprep.mubr.msk.f32.mxu1 %vm7419_vm2, %v7416_v1 }
0x1087   :  { %v4735_v21 = vpop.xlane.xlu0 %4734 }
0x1088   :  { %v4751_v42 = vadd.f32 %v5338_v5, %v4735_v21 }
0x10cb   :  { %v4593_v55 = vpop.f32.mrb[30].mxu0  ;;  %v4664_v0 = vpop.f32.mrb[30].mxu1 }
0x10cc   :  { %v6790_v14 = vadd.f32 %v4593_v55, %v8380_v54  ;;  %v4595_v37 = vpop.f32.mrb[31].mxu0  ;;  %v4666_v58 = vpop.f32.mrb[31].mxu1  ;;  %v6806_v52 = vadd.f32 %v4664_v0, %v8390_v24  ;;  %v4757_v55 = vsel %vm4753_vm1, %v4748_v36, -inf }
0x10cd   :  { %v6791_v40 = vadd.f32 %v4595_v37, %v8384_v6  ;;  %v6807_v44 = vadd.f32 %v4666_v58, %v8394_v11 }
0x10ce   :  { %v5334_v38 = vmul.f32 -1.442695, %v6790_v14  ;;  %v5336_v32 = vmul.f32 -1.442695, %v6806_v52 }
0x10cf   :  { %v5335_v46 = vmul.f32 -1.442695, %v6791_v40 }
0x10d0   :  { %7132 = vpow2.f32 %v5334_v38 }
0x10d1   :  { %7134 = vpow2.f32 %v5335_v46 }
0x10d2   :  { %7136 = vtanh.f32 %v6807_v44 }
0x10d3   :  { %7138 = vpow2.f32 %v5336_v32 }
0x10da   :  { %v7133_v35 = vpop.eup %7132 }
0x10db   :  { %v4682_v29 = vadd.f32 1.0, %v7133_v35  ;;  %v7135_v31 = vpop.eup %7134 }
0x10dc   :  { %v4683_v54 = vadd.f32 1.0, %v7135_v31  ;;  %v7137_v43 = vpop.eup %7136 }
0x10dd   :  { %7140 = vrcp.f32 %v4682_v29  ;;  %v7139_v57 = vpop.eup %7138 }
0x10de   :  { %7142 = vrcp.f32 %v4683_v54  ;;  %v4684_v7 = vadd.f32 1.0, %v7139_v57 }
0x10e0   :  { %7144 = vrcp.f32 %v4684_v7 }
0x10e7   :  { %v7141_v6 = vpop.eup %7140 }
0x10e8   :  { %v4693_v4 = vmul.f32 %v7141_v6, %v7137_v43  ;;  %v7143_v48 = vpop.eup %7142 }
0x10e9   :  { %v4692_v22 = vmul.f32 %v7143_v48, %v4454_v41  ;;  %v4762_v41 = vsel %vm4753_vm1, %v4751_v42, -inf }
0x10ea   :  { %v7145_v24 = vpop.eup %7144  ;;  %v4763_v37 = vmax.f32 %v4756_v33, %v4762_v41 }
0x10eb   :  { %v4694_v9 = vadd.f32 %v4693_v4, %v4692_v22 }
0x10ed   :  { %7146 = vtanh.f32 %v4694_v9 }
0x10f7   :  { %v7147_v11 = vpop.eup %7146 }
0x10f8   :  { %v8765_v53 = vmul.f32 %v7147_v11, %v7145_v24 }
0x10fa   :  { %v4721_v51 = vmul.f32 %v7170_v23, %v8765_v53  ;;  %v4754_v23 = vsel %vm4753_vm1, %v4745_v2, -inf }
0x10fb   :  { %v4759_v14 = vmax.f32 %v4754_v23, %v4758_v19 }
0x10fc   :  { %4736 = vadd.xlane.f32.xlu1 %v4721_v51 }
0x10fd   :  { %v4766_v40 = vmax.f32 %v4759_v14, %v4761_v39  ;;  %v4875_v39 = vld [vmem:[#allocation15 + $0x18] sm:$0xff] }
0x1189   :  { %v4737_v15 = vpop.xlane.xlu1 %4736 }
0x118a   :  { %v4752_v3 = vadd.f32 %v5338_v5, %v4737_v15 }
0x118c   :  { %v4764_v0 = vsel %vm4753_vm1, %v4752_v3, -inf }
0x118d   :  { %v4765_v58 = vmax.f32 %v4757_v55, %v4764_v0  ;;  %v4876_v55 = vld [vmem:[#allocation15 + $0x20] sm:$0xff]  ;;  %v4877_v0 = vld [vmem:[#allocation15 + $0x28] sm:$0xff] }
0x118e   :  { %v6655_v14 = vpack.c.bf16 %v4877_v0, %v4876_v55 }
0x118f   :  { %v4767_v38 = vmax.f32 %v4763_v37, %v4765_v58  ;;  %v4878_v58 = vld [vmem:[#allocation15 + $0x30] sm:$0xff] }
0x1191   :  { %v4768_v46 = vmax.f32 %v4766_v40, %v4767_v38  ;;  %v4879_v40 = vld [vmem:[#allocation15 + $0x38] sm:$0xff] }
0x1192   :  { %v6658_v38 = vpack.c.bf16 %v4879_v40, %v4878_v58 }
0x1193   :  { %v4771_v52 = vsub.f32 %v4747_v27, %v4768_v46  ;;  %v4769_v44 = vsub.f32 %v4745_v2, %v4768_v46  ;;  %v4770_v32 = vsub.f32 %v4746_v50, %v4768_v46  ;;  %v4772_v35 = vsub.f32 %v4748_v36, %v4768_v46 }
0x1194   :  { %v4773_v54 = vsub.f32 %v4749_v63, %v4768_v46  ;;  %v4774_v57 = vsub.f32 %v4750_v13, %v4768_v46  ;;  %v4775_v4 = vsub.f32 %v4751_v42, %v4768_v46  ;;  %v4776_v7 = vsub.f32 %v4752_v3, %v4768_v46  ;;  %v4874_v3 = vld [vmem:[#allocation15 + $0x10] sm:$0xff] }
0x1195   :  { %v4781_v29 = vmul.f32 1.442695, %v4771_v52  ;;  %v4777_v31 = vmul.f32 1.442695, %v4769_v44  ;;  %v4779_v43 = vmul.f32 1.442695, %v4770_v32  ;;  %v6652_v23 = vpack.c.bf16 %v4875_v39, %v4874_v3 }
0x1196   :  { %v4783_v6 = vmul.f32 1.442695, %v4772_v35  ;;  %v4785_v48 = vmul.f32 1.442695, %v4773_v54  ;;  %v4787_v22 = vmul.f32 1.442695, %v4774_v57 }
0x1197   :  { %7148 = vpow2.f32 %v4781_v29  ;;  %v4789_v9 = vmul.f32 1.442695, %v4775_v4  ;;  %v4791_v24 = vmul.f32 1.442695, %v4776_v7  ;;  %6653 = vmatpush3.bf16.msra.mxu0 %v6652_v23  ;;  %v4880_v52 = vld [vmem:[#allocation15 + $0x40] sm:$0xff]  ;;  %v4881_v44 = vld [vmem:[#allocation15 + $0x48] sm:$0xff] }
0x1198   :  { %7150 = vpow2.f32 %v4777_v31  ;;  %6654 = vmatprep.subr.bf16.mxu0 %v7418_v47  ;;  %v6661_v32 = vpack.c.bf16 %v4881_v44, %v4880_v52  ;;  %v4882_v29 = vld [vmem:[#allocation15 + $0x50] sm:$0xff]  ;;  %v4883_v31 = vld [vmem:[#allocation15 + $0x58] sm:$0xff]  ;;  %v4884_v57 = vld [vmem:[#allocation15 + $0x60] sm:$0xff] }
0x1199   :  { %7152 = vpow2.f32 %v4779_v43  ;;  %v6664_v54 = vpack.c.bf16 %v4883_v31, %v4882_v29  ;;  %v4886_v7 = vld [vmem:[#allocation15 + $0x70] sm:$0xff]  ;;  %v5063_v31 = vld [vmem:[#allocation18 + $0x18] sm:$0xff] }
0x119a   :  { %7154 = vpow2.f32 %v4783_v6  ;;  %v4885_v6 = vld [vmem:[#allocation15 + $0x68] sm:$0xff]  ;;  %v5062_v29 = vld [vmem:[#allocation18 + $0x10] sm:$0xff] }
0x119b   :  { %7156 = vpow2.f32 %v4785_v48  ;;  %6656 = vmatpush3.bf16.msra.mxu0 %v6655_v14  ;;  %v6667_v4 = vpack.c.bf16 %v4885_v6, %v4884_v57  ;;  %v5066_v6 = vld [vmem:[#allocation18 + $0x30] sm:$0xff] }
0x119c   :  { %7158 = vpow2.f32 %v4787_v22  ;;  %6657 = vmatprep.subr.bf16.mxu0 %v7418_v47  ;;  %v4887_v22 = vld [vmem:[#allocation15 + $0x78] sm:$0xff] }
0x119d   :  { %7160 = vpow2.f32 %v4789_v9  ;;  %v6670_v9 = vpack.c.bf16 %v4887_v22, %v4886_v7  ;;  %v5068_v7 = vld [vmem:[#allocation18 + $0x40] sm:$0xff]  ;;  %v5069_v22 = vld [vmem:[#allocation18 + $0x48] sm:$0xff] }
0x119e   :  { %7162 = vpow2.f32 %v4791_v24  ;;  %v4966_v24 = vld [vmem:[#allocation17] sm:$0xff] }
0x119f   :  { %6659 = vmatpush3.bf16.msra.mxu0 %v6658_v38 }
0x11a0   :  { %6660 = vmatprep.subr.bf16.mxu0 %v7418_v47 }
0x11a1   :  { %v7149_v11 = vpop.eup %7148 }
0x11a2   :  { %v7151_v51 = vpop.eup %7150  ;;  %v4796_v17 = vsel %vm4753_vm1, %v7149_v11, 0.0 }
0x11a3   :  { %v7153_v62 = vpop.eup %7152  ;;  %v4793_v16 = vsel %vm4753_vm1, %v7151_v51, 0.0  ;;  %6662 = vmatpush3.bf16.msra.mxu0 %v6661_v32  ;;  %v4981_v32 = vld [vmem:[#allocation17 + $0x78] sm:$0xff] }
0x11a4   :  { %v4794_v30 = vsel %vm4753_vm1, %v7153_v62, 0.0  ;;  %v7155_v45 = vpop.eup %7154  ;;  %6663 = vmatprep.subr.bf16.mxu0 %v7418_v47 }
0x11a5   :  { %v4795_v60 = vadd.f32 %v4794_v30, %v4793_v16  ;;  %v7157_v56 = vpop.eup %7156  ;;  %v4798_v8 = vsel %vm4753_vm1, %v7155_v45, 0.0  ;;  %v4969_v16 = vld [vmem:[#allocation17 + $0x18] sm:$0xff] }
0x11a6   :  { %v7159_v28 = vpop.eup %7158  ;;  %v4800_v21 = vsel %vm4753_vm1, %v7157_v56, 0.0 }
0x11a7   :  { %v4797_v10 = vadd.f32 %v4796_v17, %v4795_v60  ;;  %v7161_v13 = vpop.eup %7160  ;;  %v4802_v63 = vsel %vm4753_vm1, %v7159_v28, 0.0  ;;  %6665 = vmatpush3.bf16.msra.mxu0 %v6664_v54  ;;  %v4971_v60 = vld [vmem:[#allocation17 + $0x28] sm:$0xff]  ;;  %v6700_v54 = vpack.c.bf16 %v5063_v31, %v5062_v29 }
0x11a8   :  { %v7163_v42 = vpop.eup %7162  ;;  %v4804_v27 = vsel %vm4753_vm1, %v7161_v13, 0.0  ;;  %6666 = vmatprep.subr.bf16.mxu0 %v7418_v47 }
0x11a9   :  { %v4799_v5 = vadd.f32 %v4798_v8, %v4797_v10  ;;  %v4806_v12 = vsel %vm4753_vm1, %v7163_v42, 0.0  ;;  %v4973_v10 = vld [vmem:[#allocation17 + $0x38] sm:$0xff] }
0x11ab   :  { %v4801_v50 = vadd.f32 %v4800_v21, %v4799_v5  ;;  %6668 = vmatpush3.bf16.msra.mxu0 %v6667_v4  ;;  %v4975_v5 = vld [vmem:[#allocation17 + $0x48] sm:$0xff]  ;;  %v5067_v4 = vld [vmem:[#allocation18 + $0x38] sm:$0xff] }
0x11ac   :  { %6669 = vmatprep.subr.bf16.mxu0 %v7418_v47 }
0x11ad   :  { %v4803_v2 = vadd.f32 %v4802_v63, %v4801_v50  ;;  %v4977_v50 = vld [vmem:[#allocation17 + $0x58] sm:$0xff] }
0x11af   :  { %v4805_v36 = vadd.f32 %v4804_v27, %v4803_v2  ;;  %6671 = vmatpush3.bf16.msra.mxu0 %v6670_v9  ;;  %v4979_v2 = vld [vmem:[#allocation17 + $0x68] sm:$0xff]  ;;  %v6709_v9 = vpack.c.bf16 %v5069_v22, %v5068_v7 }
0x11b0   :  { %6696 = vmatprep.subr.bf16.mxu0 %v7418_v47 }
0x11b1   :  { %v4807_v15 = vadd.f32 %v4806_v12, %v4805_v36 }
0x11b3   :  { %7164 = vrcp.f32 %v4807_v15 }
0x11bd   :  { %v7165_v18 = vpop.eup %7164 }
0x11be   :  { %v4810_v19 = vmul.f32 %v7165_v18, %v7153_v62  ;;  %v4809_v41 = vmul.f32 %v7165_v18, %v7151_v51  ;;  %v4811_v33 = vmul.f32 %v7165_v18, %v7149_v11  ;;  %v4812_v37 = vmul.f32 %v7165_v18, %v7155_v45  ;;  %v4967_v11 = vld [vmem:[#allocation17 + $0x8] sm:$0xff]  ;;  %v4968_v51 = vld [vmem:[#allocation17 + $0x10] sm:$0xff]  ;;  %v4970_v45 = vld [vmem:[#allocation17 + $0x20] sm:$0xff] }
0x11bf   :  { %v4813_v46 = vmul.f32 %v7165_v18, %v7157_v56  ;;  %v4814_v35 = vmul.f32 %v7165_v18, %v7159_v28  ;;  %v4815_v43 = vmul.f32 %v7165_v18, %v7161_v13  ;;  %v4816_v48 = vmul.f32 %v7165_v18, %v7163_v42  ;;  %v4972_v56 = vld [vmem:[#allocation17 + $0x30] sm:$0xff]  ;;  %v4974_v28 = vld [vmem:[#allocation17 + $0x40] sm:$0xff] }
0x11c0   :  { %4824 = vperm.xlu1 %6891, %v4810_v19   ;;  %4819 = vperm.xlu0 %6890, %v4809_v41   ;;  %v6673_v62 = vpack.c.bf16 %v4967_v11, %v4966_v24  ;;  %v6676_v30 = vpack.c.bf16 %v4969_v16, %v4968_v51  ;;  %v6679_v17 = vpack.c.bf16 %v4971_v60, %v4970_v45  ;;  %v4976_v13 = vld [vmem:[#allocation17 + $0x50] sm:$0xff]  ;;  %v4978_v42 = vld [vmem:[#allocation17 + $0x60] sm:$0xff]  ;;  %v5071_v11 = vld [vmem:[#allocation18 + $0x58] sm:$0xff] }
0x11c1   :  { %v6682_v8 = vpack.c.bf16 %v4973_v10, %v4972_v56  ;;  %v6685_v21 = vpack.c.bf16 %v4975_v5, %v4974_v28  ;;  %v6688_v63 = vpack.c.bf16 %v4977_v50, %v4976_v13  ;;  %v6691_v27 = vpack.c.bf16 %v4979_v2, %v4978_v42  ;;  %v5070_v24 = vld [vmem:[#allocation18 + $0x50] sm:$0xff]  ;;  %v5073_v16 = vld [vmem:[#allocation18 + $0x68] sm:$0xff]  ;;  %v5339_v45 = vld [vmem:[%s8866_s10] ss:$0 sm:$0xff] }
0x11c2   :  { %6674 = vmatpush3.bf16.msra.mxu1 %v6673_v62  ;;  %v6712_v51 = vpack.c.bf16 %v5071_v11, %v5070_v24  ;;  %v5072_v62 = vld [vmem:[#allocation18 + $0x60] sm:$0xff]  ;;  %v5075_v28 = vld [vmem:[#allocation18 + $0x78] sm:$0xff]  ;;  %v5155_v13 = vld [vmem:[#allocation20 + $0x8] sm:$0xff] }
0x11c3   :  { %6675 = vmatprep.subr.bf16.mxu1 %v7418_v47  ;;  %v5156_v50 = vld [vmem:[#allocation20 + $0x10] sm:$0xff]  ;;  %v5157_v42 = vld [vmem:[#allocation20 + $0x18] sm:$0xff] }
0x11c4   :  { %4829 = vperm.xlu1 %6891, %v4811_v33   ;;  %v6724_v2 = vpack.c.bf16 %v5157_v42, %v5156_v50 }
0x11c6   :  { %6677 = vmatpush3.bf16.msra.mxu1 %v6676_v30  ;;  %v6715_v30 = vpack.c.bf16 %v5073_v16, %v5072_v62 }
0x11c7   :  { %6678 = vmatprep.subr.bf16.mxu1 %v7418_v47 }
0x11c8   :  { %4834 = vperm.xlu1 %6891, %v4812_v37  }
0x11ca   :  { %6680 = vmatpush3.bf16.msra.mxu1 %v6679_v17 }
0x11cb   :  { %6681 = vmatprep.subr.bf16.mxu1 %v7418_v47 }
0x11cc   :  { %4839 = vperm.xlu1 %6891, %v4813_v46  }
0x11ce   :  { %6683 = vmatpush3.bf16.msra.mxu1 %v6682_v8  ;;  %v5074_v8 = vld [vmem:[#allocation18 + $0x70] sm:$0xff] }
0x11cf   :  { %6684 = vmatprep.subr.bf16.mxu1 %v7418_v47  ;;  %v6718_v5 = vpack.c.bf16 %v5075_v28, %v5074_v8 }
0x11d0   :  { %4844 = vperm.xlu1 %6891, %v4814_v35   ;;  %v5061_v35 = vld [vmem:[#allocation18 + $0x8] sm:$0xff] }
0x11d2   :  { %6686 = vmatpush3.bf16.msra.mxu1 %v6685_v21  ;;  %v5154_v21 = vld [vmem:[#allocation20] sm:$0xff] }
0x11d3   :  { %6687 = vmatprep.subr.bf16.mxu1 %v7418_v47 }
0x11d4   :  { %4849 = vperm.xlu1 %6891, %v4815_v43   ;;  %v5065_v43 = vld [vmem:[#allocation18 + $0x28] sm:$0xff] }
0x11d6   :  { %6689 = vmatpush3.bf16.msra.mxu1 %v6688_v63  ;;  %v6721_v63 = vpack.c.bf16 %v5155_v13, %v5154_v21 }
0x11d7   :  { %6690 = vmatprep.subr.bf16.mxu1 %v7418_v47 }
0x11d8   :  { %4854 = vperm.xlu1 %6891, %v4816_v48   ;;  %v6706_v48 = vpack.c.bf16 %v5067_v4, %v5066_v6 }
0x11da   :  { %6692 = vmatpush3.bf16.msra.mxu1 %v6691_v27  ;;  %v5158_v27 = vld [vmem:[#allocation20 + $0x20] sm:$0xff] }
0x11db   :  { %6693 = vmatprep.subr.bf16.mxu1 %v7418_v47 }
0x123f   :  { %v4825_v36 = vpop.permute.xlu1 %4824  ;;  %v4820_v15 = vpop.permute.xlu0 %4819 }
0x1240   :  { %v4858_v19 = vmul.f32 %v4825_v36, %v8454_v25  ;;  %v4857_v41 = vmul.f32 %v4820_v15, %v8406_v26  ;;  %v5159_v36 = vld [vmem:[#allocation20 + $0x28] sm:$0xff]  ;;  %v5161_v15 = vld [vmem:[#allocation20 + $0x38] sm:$0xff] }
0x1242   :  { %v4865_v23 = vadd.f32 %v4858_v19, %v4857_v41  ;;  %v5162_v19 = vld [vmem:[#allocation20 + $0x40] sm:$0xff]  ;;  %v5163_v41 = vld [vmem:[#allocation20 + $0x48] sm:$0xff] }
0x1243   :  { %v4830_v12 = vpop.permute.xlu1 %4829 }
0x1244   :  { %v4859_v39 = vmul.f32 %v4830_v12, %v8500_v20  ;;  %v6727_v12 = vpack.c.bf16 %v5159_v36, %v5158_v27 }
0x1246   :  { %v4866_v0 = vadd.f32 %v4865_v23, %v4859_v39  ;;  %v5164_v39 = vld [vmem:[#allocation20 + $0x50] sm:$0xff]  ;;  %v5165_v23 = vld [vmem:[#allocation20 + $0x58] sm:$0xff] }
0x1247   :  { %v4835_v18 = vpop.permute.xlu1 %4834 }
0x1248   :  { %v4860_v33 = vmul.f32 %v4835_v18, %v8614_v49  ;;  %v4980_v49 = vld [vmem:[#allocation17 + $0x70] sm:$0xff] }
0x124a   :  { %v4867_v37 = vadd.f32 %v4866_v0, %v4860_v33  ;;  %v6736_v33 = vpack.c.bf16 %v5165_v23, %v5164_v39  ;;  %v5167_v0 = vld [vmem:[#allocation20 + $0x68] sm:$0xff] }
0x124b   :  { %v4840_v3 = vpop.permute.xlu1 %4839 }
0x124c   :  { %v4861_v14 = vmul.f32 %v4840_v3, %v8662_v61  ;;  %v6694_v61 = vpack.c.bf16 %v4981_v32, %v4980_v49  ;;  %v6733_v3 = vpack.c.bf16 %v5163_v41, %v5162_v19 }
0x124e   :  { %v4868_v38 = vadd.f32 %v4867_v37, %v4861_v14  ;;  %6695 = vmatpush3.bf16.msra.mxu1 %v6694_v61  ;;  %v5340_v37 = vld [vmem:[%s8868_s12] ss:$0 sm:$0xff] }
0x124f   :  { %v4845_v55 = vpop.permute.xlu1 %4844  ;;  %6720 = vmatprep.subr.bf16.mxu1 %v7418_v47  ;;  %v5342_v61 = vld [vmem:[%s8872_s16] ss:$0 sm:$0xff] }
0x1250   :  { %v4862_v58 = vmul.f32 %v4845_v55, %v8710_v34  ;;  %v5060_v34 = vld [vmem:[#allocation18] sm:$0xff] }
0x1251   :  { %v5166_v55 = vld [vmem:[#allocation20 + $0x60] sm:$0xff] }
0x1252   :  { %v4869_v25 = vadd.f32 %v4868_v38, %v4862_v58  ;;  %v6739_v14 = vpack.c.bf16 %v5167_v0, %v5166_v55 }
0x1253   :  { %v4850_v40 = vpop.permute.xlu1 %4849 }
0x1254   :  { %v4863_v46 = vmul.f32 %v4850_v40, %v8753_v59  ;;  %v6697_v59 = vpack.c.bf16 %v5061_v35, %v5060_v34 }
0x1256   :  { %v4870_v26 = vadd.f32 %v4869_v25, %v4863_v46  ;;  %v5168_v25 = vld [vmem:[#allocation20 + $0x70] sm:$0xff] }
0x1257   :  { %v4855_v52 = vpop.permute.xlu1 %4854 }
0x1258   :  { %v4864_v44 = vmul.f32 %v4855_v52, %v8765_v53  ;;  %v5064_v53 = vld [vmem:[#allocation18 + $0x20] sm:$0xff]  ;;  %v5169_v52 = vld [vmem:[#allocation20 + $0x78] sm:$0xff] }
0x1259   :  { %v6703_v57 = vpack.c.bf16 %v5065_v43, %v5064_v53 }
0x125a   :  { %v4871_v20 = vadd.f32 %v4870_v26, %v4864_v44  ;;  %v6742_v26 = vpack.c.bf16 %v5169_v52, %v5168_v25  ;;  %v5341_v44 = vld [vmem:[%s8870_s14] ss:$0 sm:$0xff]  ;;  %s7369_s14 = scalar_lea.vmem %s5261_s13, 128 }
0x125b   :  { %p7370_p2 = scmp.ne.s32.totalorder %s5261_s13, %s7369_s14  ;;  %p7375_p4 = scmp.lt.s32.totalorder %s7369_s14, %s7369_s14 }
0x125c   :  { %5445 = vmatmul.mubr.f32.vlgmr.msra.gmra.mrb[32].mxu0 %v4871_v20 }
0x125d   :  { %5514 = vmatprep.mubr.msk.f32.mxu0 %vm7419_vm2, %v7416_v1  ;;  %6698 = vmatpush3.bf16.msra.mxu0 %v6697_v59  ;;  %p7376_p5 = por %p7375_p4, %p7374_p3 }
0x125e   :  { %6699 = vmatprep.subr.bf16.mxu0 %v7418_v47 }
0x125f   :  { %p7377_p6 = pnand %p7376_p5, %p7370_p2 }
0x1261   :  { %6701 = vmatpush3.bf16.msra.mxu0 %v6700_v54 }
0x1262   :  { %6702 = vmatprep.subr.bf16.mxu0 %v7418_v47 }
0x1265   :  { %6704 = vmatpush3.bf16.msra.mxu0 %v6703_v57 }
0x1266   :  { %6705 = vmatprep.subr.bf16.mxu0 %v7418_v47 }
0x1269   :  { %6707 = vmatpush3.bf16.msra.mxu0 %v6706_v48 }
0x126a   :  { %6708 = vmatprep.subr.bf16.mxu0 %v7418_v47 }
0x126d   :  { %6710 = vmatpush3.bf16.msra.mxu0 %v6709_v9 }
0x126e   :  { %6711 = vmatprep.subr.bf16.mxu0 %v7418_v47 }
0x1271   :  { %6713 = vmatpush3.bf16.msra.mxu0 %v6712_v51 }
0x1272   :  { %6714 = vmatprep.subr.bf16.mxu0 %v7418_v47 }
0x1275   :  { %6716 = vmatpush3.bf16.msra.mxu0 %v6715_v30 }
0x1276   :  { %6717 = vmatprep.subr.bf16.mxu0 %v7418_v47 }
0x1279   :  { %6719 = vmatpush3.bf16.msra.mxu0 %v6718_v5 }
0x132f   :  { %v4961_v60 = vpop.f32.mrb[32].mxu0 }
0x1330   :  { %v4962_v17 = vadd.f32 %v5339_v45, %v4961_v60  ;;  %v5446_v56 = vpop.f32.mrb[33].mxu0 }
0x1332   :  { %v4965_v10 = vmax.f32 %v4962_v17, 0.0 }
0x1334   :  { %5480 = vmatmul.mubr.f32.vlgmr.msra.gmra.mrb[32].mxu1 %v4965_v10 }
0x1335   :  { %5549 = vmatprep.mubr.msk.f32.mxu1 %vm7419_vm2, %v7416_v1  ;;  %6722 = vmatpush3.bf16.msra.mxu1 %v6721_v63  ;;  %v5160_v1 = vld [vmem:[#allocation20 + $0x30] sm:$0xff] }
0x1336   :  { %6723 = vmatprep.subr.bf16.mxu1 %v7418_v47  ;;  %v6730_v18 = vpack.c.bf16 %v5161_v15, %v5160_v1 }
0x1339   :  { %6725 = vmatpush3.bf16.msra.mxu1 %v6724_v2 }
0x133a   :  { %6726 = vmatprep.subr.bf16.mxu1 %v7418_v47 }
0x133d   :  { %6728 = vmatpush3.bf16.msra.mxu1 %v6727_v12 }
0x133e   :  { %6729 = vmatprep.subr.bf16.mxu1 %v7418_v47 }
0x1341   :  { %6731 = vmatpush3.bf16.msra.mxu1 %v6730_v18 }
0x1342   :  { %6732 = vmatprep.subr.bf16.mxu1 %v7418_v47 }
0x1345   :  { %6734 = vmatpush3.bf16.msra.mxu1 %v6733_v3 }
0x1346   :  { %6735 = vmatprep.subr.bf16.mxu1 %v7418_v47 }
0x1349   :  { %6737 = vmatpush3.bf16.msra.mxu1 %v6736_v33 }
0x134a   :  { %6738 = vmatprep.subr.bf16.mxu1 %v7418_v47 }
0x134d   :  { %6740 = vmatpush3.bf16.msra.mxu1 %v6739_v14 }
0x134e   :  { %6741 = vmatprep.subr.bf16.mxu1 %v7418_v47 }
0x1351   :  { %6743 = vmatpush3.bf16.msra.mxu1 %v6742_v26 }
0x1407   :  { %v5055_v58 = vpop.f32.mrb[32].mxu1 }
0x1408   :  { %v5056_v40 = vadd.f32 %v5340_v37, %v5055_v58  ;;  %v5481_v38 = vpop.f32.mrb[33].mxu1 }
0x140a   :  { %v5059_v46 = vmax.f32 %v5056_v40, 0.0 }
0x140c   :  { %5515 = vmatmul.mubr.f32.vlgmr.msra.gmra.mrb[34].mxu0 %v5059_v46 }
0x14df   :  { %v5149_v20 = vpop.f32.mrb[34].mxu0 }
0x14e0   :  { %v5150_v49 = vadd.f32 %v5341_v44, %v5149_v20  ;;  %v5516_v47 = vpop.f32.mrb[35].mxu0 }
0x14e2   :  { %v5153_v32 = vmax.f32 %v5150_v49, 0.0 }
0x14e4   :  { %5550 = vmatmul.mubr.f32.vlgmr.msra.gmra.mrb[34].mxu1 %v5153_v32 }
0x15b7   :  { %v5243_v34 = vpop.f32.mrb[34].mxu1 }
0x15b8   :  { %v5244_v35 = vadd.f32 %v5342_v61, %v5243_v34  ;;  %v5551_v29 = vpop.f32.mrb[35].mxu1 }
0x15ba   :  { %v5343_v59 = vmul.f32 -1.442695, %v5244_v35 }
0x15bc   :  { %7166 = vpow2.f32 %v5343_v59 }
0x15c6   :  { %v7167_v31 = vpop.eup %7166 }
0x15c7   :  { %v5250_v54 = vadd.f32 1.0, %v7167_v31 }
0x15c9   :  { %7168 = vrcp.f32 %v5250_v54 }
0x15d3   :  { %v7169_v53 = vpop.eup %7168 }
0x15d4   :  { %5253 = vst [vmem:[#allocation21] sm:$0xff] %v7169_v53 }
0x15d5   :  { %7380 = shalt.err (!%p7377_p6)
}
0x15d6   :  { %s7381_s30 = scalar_lea.hbm %s8873_s17, 128 }
0x15d7   :  { %p7382_p7 = scmp.ne.s32.totalorder %s8873_s17, %s7381_s30  ;;  %p7385_p8 = scmp.lt.u32.totalorder %s7381_s30, %s8873_s17 }
0x15d9   :  { %p7387_p9 = pnand %p7385_p8, %p7382_p7 }
0x15db   :  { %7390 = shalt.err (!%p7387_p9)
}
0x15dc   :  { %5263 = dma.vmem_to_hbm [thread:$0]  %s5261_s13, 128, %s8873_s17, [#allocation8]  }
0x15dd   :  { %7401 = dma.done.wait [#allocation8], 128  }
0x15de   :  { %7402 = vsyncadd [#allocation8], 4294967168 }
0x15df   :  { %5267 = vsyncpa [#allocation7], 1 }
0x15e0   :  { %5268 = vsyncpa [#allocation10], 1 }
0x15e1   :  { %5269 = vsyncpa [#allocation13], 1 }
0x15e2   :  { %5270 = vsyncpa [#allocation16], 1 }
0x15e3   :  { %5271 = vsyncpa [#allocation19], 1 }
0x15e4   :  { %5272 = vsyncpa [#allocation8], 1 }

</bundles_post_ra>
